<compile_context>
chip_gen: v7x
topology: tpu7x:2x2x1
jax: 0.10.0
libtpu: 0.0.40
codegen_flags: <defaults>
</compile_context>

<pallas_src>
import jax
import jax.numpy as jnp
from jax.experimental import pallas as pl
from jax.experimental.pallas import tpu as pltpu

# ----------------------------- model sizes (small) -----------------------------
DIM = 3          # input point dimension
HIDDEN = 64      # hidden_dim
C_DIM = 64       # c_dim (latent code)
T_POINTS = 128   # number of points per cloud
BATCH = 2
N_BLOCKS = 5     # block_0 .. block_4
TB = 1           # clouds per grid step (tile of the batch axis)


def pointnet_kernel(p_ref, wpos_ref, bias_ref, wblk0_ref, wnet_ref, wpool_ref,
                    w1_ref, wc_ref, out_ref):
    BT, D = p_ref.shape                      # BT = TB * T
    _, TB_, C = out_ref.shape                # out block is (1, TB, C)
    T = BT // TB_
    H2 = wpos_ref.shape[1]                   # 2H
    H = H2 // 2
    n_blocks = w1_ref.shape[0]

    relu = lambda x: jnp.maximum(x, 0.0)

    def mxu(x, w):
        # bf16 MXU operands, fp32 accumulation.
        return jnp.dot(x.astype(jnp.bfloat16), w, preferred_element_type=jnp.float32)

    def pool(x):
        # (BT, H) -> (TB, H): max over each cloud's T points.
        return jnp.max(x.reshape(TB_, T, H), axis=1)

    def add_per_cloud(x, y):
        # (BT, H) + broadcast-over-T of per-cloud (TB, H).
        return (x.reshape(TB_, T, H) + y[:, None, :]).reshape(BT, H)

    # ---- fc_pos: (BT, 3) @ (3, 2H) with K = 3 -> three VPU FMAs, no MXU. ----
    # TODO(synk): for large cloud tiles, DMA p as (3, TB*T) lane-dense instead of
    # the lane-padded (TB*T, 3) tile; irrelevant at this toy size.
    p = p_ref[...]                                         # (BT, D) f32
    net = bias_ref[0:1, :]                                 # bpos, (1, 2H)
    for d in range(D):
        net = net + p[:, d:d + 1] * wpos_ref[d:d + 1, :]   # -> (BT, 2H)

    # ---- block_0: fc_0 + shortcut merged into one (2BT, 2H) x (2H, 2H) matmul ----
    m0 = mxu(jnp.concatenate([relu(net), net], axis=0), wblk0_ref[...])   # (2BT, 2H)
    h = m0[:BT, :H] + bias_ref[1:2, :H]                    # relu(net) @ W0 + b0
    dx = mxu(relu(h), w1_ref[0]) + bias_ref[1 + n_blocks:2 + n_blocks, :H]
    net = m0[BT:, H:] + dx                                 # net @ Ws (no bias) + dx -> (BT, H)

    # ---- block_1 .. block_{n-1}: input is conceptually cat([net, bcast(pooled)]);
    #      computed as two merged matmuls, never materializing the concat. ----
    for i in range(1, n_blocks):
        pooled = pool(net)                                                  # (TB, H)
        mn = mxu(jnp.concatenate([relu(net), net], axis=0), wnet_ref[i - 1])        # (2BT, 2H)
        mp = mxu(jnp.concatenate([relu(pooled), pooled], axis=0), wpool_ref[i - 1])  # (2TB, 2H)

        h = mn[:BT, :H] + bias_ref[1 + i:2 + i, :H]        # relu(net) @ W0_top + b0
        h = add_per_cloud(h, mp[:TB_, :H])                 # + bcast(relu(pooled) @ W0_bot)
        dx = mxu(relu(h), w1_ref[i]) + bias_ref[1 + n_blocks + i:2 + n_blocks + i, :H]

        xs = mn[BT:, H:] + dx                              # net @ Ws_top + dx
        net = add_per_cloud(xs, mp[TB_:, H:])              # + bcast(pooled @ Ws_bot)

    # ---- final max-pool over points + fc_c ----
    pooled = pool(net)                                                      # (TB, H)
    c = mxu(relu(pooled), wc_ref[...]) + bias_ref[1 + 2 * n_blocks:2 + 2 * n_blocks, :C]
    out_ref[...] = c.reshape(1, TB_, C).astype(out_ref.dtype)


def resnet_pointnet(p, params, tb=TB):
    B, T, D = p.shape
    H = params["w1"].shape[-1]
    H2 = 2 * H
    C = params["bc"].shape[-1]
    n_blocks = params["w0"].shape[0]
    assert B % tb == 0, "batch must be divisible by the cloud tile"
    assert C <= H2, "bias slab packing assumes c_dim <= 2*hidden_dim"
    num_tiles = B // tb
    bf16 = jnp.bfloat16

    # ---- pack all biases into one (rows, 2H) fp32 slab (row layout below). ----
    #   row 0                : bpos              (2H wide)
    #   rows 1 .. n          : fc_0 biases       (H wide)
    #   rows 1+n .. 2n       : fc_1 biases       (H wide)
    #   row 1+2n             : fc_c bias         (C wide)
    n_rows = 2 + 2 * n_blocks
    n_rows_pad = ((n_rows + 7) // 8) * 8
    biases = jnp.zeros((n_rows_pad, H2), jnp.float32)
    biases = biases.at[0, :].set(params["bpos"][0])
    biases = biases.at[1:1 + n_blocks, :H].set(params["b0"][:, 0, :])
    biases = biases.at[1 + n_blocks:1 + 2 * n_blocks, :H].set(params["b1"][:, 0, :])
    biases = biases.at[1 + 2 * n_blocks, :C].set(params["bc"][0])

    # ---- pre-pack merged MXU weights in the wrapper (free), cast to bf16 once. ----
    # block_0: [fc_0 | shortcut]                         -> (2H, 2H)
    w_blk0 = jnp.concatenate([params["w0"][0], params["ws"][0]], axis=1).astype(bf16)
    # blocks 1..: net path   [W0_top | Ws_top]           -> (n-1, H, 2H)
    w_net = jnp.concatenate(
        [params["w0"][1:, :H, :], params["ws"][1:, :H, :]], axis=2).astype(bf16)
    # blocks 1..: pooled path [W0_bot | Ws_bot]          -> (n-1, H, 2H)
    w_pool = jnp.concatenate(
        [params["w0"][1:, H:, :], params["ws"][1:, H:, :]], axis=2).astype(bf16)
    w1 = params["w1"].astype(bf16)                       # (n, H, H)
    wc = params["wc"].astype(bf16)                       # (H, C)

    inputs = [
        p.reshape(B * T, D),          # batch folded into rows; tiled per grid step
        params["wpos"],               # fc_pos weight stays fp32 (VPU FMA path)
        biases,
        w_blk0, w_net, w_pool, w1, wc,
    ]

    def resident(x):
        # Constant index_map -> fetched once, stays VMEM-resident across grid steps.
        nd = x.ndim
        return pl.BlockSpec(x.shape, lambda i, nd=nd: (0,) * nd)

    in_specs = [pl.BlockSpec((tb * T, D), lambda i: (i, 0))]
    in_specs += [resident(x) for x in inputs[1:]]

    out = pl.pallas_call(
        pointnet_kernel,
        out_shape=jax.ShapeDtypeStruct((num_tiles, tb, C), jnp.float32),
        grid=(num_tiles,),
        in_specs=in_specs,
        out_specs=pl.BlockSpec((1, tb, C), lambda i: (i, 0, 0)),
        compiler_params=pltpu.CompilerParams(
            dimension_semantics=("parallel",),   # independent cloud tiles -> v7x 2-TC
        ),
    )(*inputs)
    return out.reshape(B, C)


# ----------------------------- parameter init ----------------------------------
def init_params(key, dim=DIM, hidden=HIDDEN, c_dim=C_DIM, n_blocks=N_BLOCKS):
    # NOTE: the PyTorch module zero-inits fc_1.weight; here we use small random
    # values everywhere (deterministic) so the full compute path is exercised.
    def dense(k, fan_in, fan_out):
        kw, kb = jax.random.split(k)
        w = jax.random.normal(kw, (fan_in, fan_out), jnp.float32) * 0.05
        b = jax.random.normal(kb, (1, fan_out), jnp.float32) * 0.05
        return w, b

    keys = jax.random.split(key, 2 + n_blocks)
    wpos, bpos = dense(keys[0], dim, 2 * hidden)
    w0s, b0s, w1s, b1s, wss = [], [], [], [], []
    for i in range(n_blocks):
        k0, k1, ks = jax.random.split(keys[1 + i], 3)
        w0, b0 = dense(k0, 2 * hidden, hidden)      # fc_0: 2H -> H
        w1, b1 = dense(k1, hidden, hidden)          # fc_1: H -> H
        ws = jax.random.normal(ks, (2 * hidden, hidden), jnp.float32) * 0.05  # shortcut, no bias
        w0s.append(w0); b0s.append(b0); w1s.append(w1); b1s.append(b1); wss.append(ws)
    wc, bc = dense(keys[-1], hidden, c_dim)
    return {
        "wpos": wpos, "bpos": bpos,
        "w0": jnp.stack(w0s), "b0": jnp.stack(b0s),
        "w1": jnp.stack(w1s), "b1": jnp.stack(b1s),
        "ws": jnp.stack(wss),
        "wc": wc, "bc": bc,
    }


# ----------------------------- pure-JAX reference (fp32, concat form) ----------
def ref_forward(p, params):
    def block(x, w0, b0, w1, b1, ws):
        h = jnp.maximum(x, 0.0) @ w0 + b0
        dx = jnp.maximum(h, 0.0) @ w1 + b1
        return x @ ws + dx

    n_blocks = params["w0"].shape[0]
    blocks = [(params["w0"][i], params["b0"][i], params["w1"][i],
               params["b1"][i], params["ws"][i]) for i in range(n_blocks)]

    net = p @ params["wpos"] + params["bpos"]
    net = block(net, *blocks[0])
    for i in range(1, n_blocks):
        pooled = jnp.max(net, axis=1, keepdims=True)
        net = jnp.concatenate([net, jnp.broadcast_to(pooled, net.shape)], axis=-1)
        net = block(net, *blocks[i])
    net = jnp.max(net, axis=1)
    return jnp.maximum(net, 0.0) @ params["wc"] + params["bc"]


if __name__ == "__main__":
    key = jax.random.PRNGKey(0)
    kp, kx = jax.random.split(key)
    params = init_params(kp)
    p = jax.random.normal(kx, (BATCH, T_POINTS, DIM), jnp.float32)

    out = jax.block_until_ready(resnet_pointnet(p, params))
    ref = jax.block_until_ready(ref_forward(p, params))

    assert out.shape == (BATCH, C_DIM)
    # bf16 MXU operands (fp32 accumulation) vs fp32 reference -> loosened tolerance.
    assert jnp.allclose(out, ref, atol=2e-2, rtol=2e-2), "mismatch vs JAX reference"
    print("KERNEL_OK")
</pallas_src>

<mosaic_0001>
module attributes {stable_mosaic.version = 11 : i64} {
  func.func @pointnet_kernel(%arg0: i32, %arg1: memref<128x3xf32, #tpu.memory_space<vmem>>, %arg2: memref<3x128xf32, #tpu.memory_space<vmem>>, %arg3: memref<16x128xf32, #tpu.memory_space<vmem>>, %arg4: memref<128x128xbf16, #tpu.memory_space<vmem>>, %arg5: memref<4x64x128xbf16, #tpu.memory_space<vmem>>, %arg6: memref<4x64x128xbf16, #tpu.memory_space<vmem>>, %arg7: memref<5x64x64xbf16, #tpu.memory_space<vmem>>, %arg8: memref<64x64xbf16, #tpu.memory_space<vmem>>, %arg9: memref<1x1x64xf32, #tpu.memory_space<vmem>>) attributes {dimension_semantics = [#tpu.dimension_semantics<parallel>], iteration_bounds = array<i64: 2>, scalar_prefetch = 0 : i64, scratch_operands = 0 : i64, tpu.core_type = #tpu.core_type<tc>, window_params = [{transform_indices = @transform_0, window_bounds = array<i64: 128, 3>}, {pipeline_mode = #tpu.pipeline_mode<synchronous>, transform_indices = @transform_1, window_bounds = array<i64: 3, 128>}, {pipeline_mode = #tpu.pipeline_mode<synchronous>, transform_indices = @transform_2, window_bounds = array<i64: 16, 128>}, {pipeline_mode = #tpu.pipeline_mode<synchronous>, transform_indices = @transform_3, window_bounds = array<i64: 128, 128>}, {pipeline_mode = #tpu.pipeline_mode<synchronous>, transform_indices = @transform_4, window_bounds = array<i64: 4, 64, 128>}, {pipeline_mode = #tpu.pipeline_mode<synchronous>, transform_indices = @transform_5, window_bounds = array<i64: 4, 64, 128>}, {pipeline_mode = #tpu.pipeline_mode<synchronous>, transform_indices = @transform_6, window_bounds = array<i64: 5, 64, 64>}, {pipeline_mode = #tpu.pipeline_mode<synchronous>, transform_indices = @transform_7, window_bounds = array<i64: 64, 64>}, {transform_indices = @transform_8, window_bounds = array<i64: 1, 1, 64>}]} {
    %c0 = arith.constant 0 : index
    %c0_0 = arith.constant 0 : index
    %0 = vector.load %arg1[%c0, %c0_0] : memref<128x3xf32, #tpu.memory_space<vmem>>, vector<128x3xf32>
    %c0_1 = arith.constant 0 : index
    %c0_2 = arith.constant 0 : index
    %1 = vector.load %arg3[%c0_1, %c0_2] : memref<16x128xf32, #tpu.memory_space<vmem>>, vector<1x128xf32>
    %2 = vector.extract_strided_slice %0 {offsets = [0, 0], sizes = [128, 1], strides = [1, 1]} : vector<128x3xf32> to vector<128x1xf32>
    %c0_3 = arith.constant 0 : index
    %c0_4 = arith.constant 0 : index
    %3 = vector.load %arg2[%c0_3, %c0_4] : memref<3x128xf32, #tpu.memory_space<vmem>>, vector<1x128xf32>
    %4 = vector.broadcast %2 : vector<128x1xf32> to vector<128x128xf32>
    %5 = vector.broadcast %3 : vector<1x128xf32> to vector<128x128xf32>
    %6 = arith.mulf %4, %5 : vector<128x128xf32>
    %7 = vector.broadcast %1 : vector<1x128xf32> to vector<128x128xf32>
    %8 = arith.addf %7, %6 : vector<128x128xf32>
    %9 = vector.extract_strided_slice %0 {offsets = [0, 1], sizes = [128, 1], strides = [1, 1]} : vector<128x3xf32> to vector<128x1xf32>
    %c1 = arith.constant 1 : index
    %c0_5 = arith.constant 0 : index
    %10 = vector.load %arg2[%c1, %c0_5] : memref<3x128xf32, #tpu.memory_space<vmem>>, vector<1x128xf32>
    %11 = vector.broadcast %9 : vector<128x1xf32> to vector<128x128xf32>
    %12 = vector.broadcast %10 : vector<1x128xf32> to vector<128x128xf32>
    %13 = arith.mulf %11, %12 : vector<128x128xf32>
    %14 = arith.addf %8, %13 : vector<128x128xf32>
    %15 = vector.extract_strided_slice %0 {offsets = [0, 2], sizes = [128, 1], strides = [1, 1]} : vector<128x3xf32> to vector<128x1xf32>
    %c2 = arith.constant 2 : index
    %c0_6 = arith.constant 0 : index
    %16 = vector.load %arg2[%c2, %c0_6] : memref<3x128xf32, #tpu.memory_space<vmem>>, vector<1x128xf32>
    %17 = vector.broadcast %15 : vector<128x1xf32> to vector<128x128xf32>
    %18 = vector.broadcast %16 : vector<1x128xf32> to vector<128x128xf32>
    %19 = arith.mulf %17, %18 : vector<128x128xf32>
    %20 = arith.addf %14, %19 : vector<128x128xf32>
    %cst = arith.constant 0.000000e+00 : f32
    %21 = vector.broadcast %cst : f32 to vector<128x128xf32>
    %22 = arith.maximumf %20, %21 : vector<128x128xf32>
    %23 = tpu.concatenate %22, %20 in 0 : vector<128x128xf32>, vector<128x128xf32> -> vector<256x128xf32>
    %c0_7 = arith.constant 0 : index
    %c0_8 = arith.constant 0 : index
    %24 = vector.load %arg4[%c0_7, %c0_8] : memref<128x128xbf16, #tpu.memory_space<vmem>>, vector<128x128xbf16>
    %25 = arith.truncf %23 : vector<256x128xf32> to vector<256x128xbf16>
    %cst_9 = arith.constant dense<0.000000e+00> : vector<256x128xf32>
    %26 = tpu.matmul %25, %24, %cst_9 {dimension_numbers = #tpu.dot_dimension_numbers<[1], [0], [0], [1], [0, 0, 1, 1], [], []>} : vector<256x128xbf16>, vector<128x128xbf16>, vector<256x128xf32> -> vector<256x128xf32>
    %27 = vector.extract_strided_slice %26 {offsets = [0, 0], sizes = [128, 64], strides = [1, 1]} : vector<256x128xf32> to vector<128x64xf32>
    %c1_10 = arith.constant 1 : index
    %c0_11 = arith.constant 0 : index
    %28 = vector.load %arg3[%c1_10, %c0_11] : memref<16x128xf32, #tpu.memory_space<vmem>>, vector<1x64xf32>
    %29 = vector.broadcast %28 : vector<1x64xf32> to vector<128x64xf32>
    %30 = arith.addf %27, %29 : vector<128x64xf32>
    %cst_12 = arith.constant 0.000000e+00 : f32
    %31 = vector.broadcast %cst_12 : f32 to vector<128x64xf32>
    %32 = arith.maximumf %30, %31 : vector<128x64xf32>
    %c0_13 = arith.constant 0 : index
    %c0_14 = arith.constant 0 : index
    %c0_15 = arith.constant 0 : index
    %33 = vector.load %arg7[%c0_13, %c0_14, %c0_15] : memref<5x64x64xbf16, #tpu.memory_space<vmem>>, vector<1x64x64xbf16>
    %34 = vector.shape_cast %33 : vector<1x64x64xbf16> to vector<64x64xbf16>
    %35 = arith.truncf %32 : vector<128x64xf32> to vector<128x64xbf16>
    %cst_16 = arith.constant dense<0.000000e+00> : vector<128x64xf32>
    %36 = tpu.matmul %35, %34, %cst_16 {dimension_numbers = #tpu.dot_dimension_numbers<[1], [0], [0], [1], [0, 0, 1, 1], [], []>} : vector<128x64xbf16>, vector<64x64xbf16>, vector<128x64xf32> -> vector<128x64xf32>
    %c6 = arith.constant 6 : index
    %c0_17 = arith.constant 0 : index
    %37 = vector.load %arg3[%c6, %c0_17] : memref<16x128xf32, #tpu.memory_space<vmem>>, vector<1x64xf32>
    %38 = vector.broadcast %37 : vector<1x64xf32> to vector<128x64xf32>
    %39 = arith.addf %36, %38 : vector<128x64xf32>
    %40 = vector.extract_strided_slice %26 {offsets = [128, 64], sizes = [128, 64], strides = [1, 1]} : vector<256x128xf32> to vector<128x64xf32>
    %41 = arith.addf %40, %39 : vector<128x64xf32>
    %42 = vector.shape_cast %41 : vector<128x64xf32> to vector<1x128x64xf32>
    %cst_18 = arith.constant dense<0xFF800000> : vector<1x64xf32>
    %43 = vector.multi_reduction <maximumf>, %42, %cst_18 [1] : vector<1x128x64xf32> to vector<1x64xf32>
    %cst_19 = arith.constant 0.000000e+00 : f32
    %44 = vector.broadcast %cst_19 : f32 to vector<128x64xf32>
    %45 = arith.maximumf %41, %44 : vector<128x64xf32>
    %46 = tpu.concatenate %45, %41 in 0 : vector<128x64xf32>, vector<128x64xf32> -> vector<256x64xf32>
    %c0_20 = arith.constant 0 : index
    %c0_21 = arith.constant 0 : index
    %c0_22 = arith.constant 0 : index
    %47 = vector.load %arg5[%c0_20, %c0_21, %c0_22] : memref<4x64x128xbf16, #tpu.memory_space<vmem>>, vector<1x64x128xbf16>
    %48 = vector.shape_cast %47 : vector<1x64x128xbf16> to vector<64x128xbf16>
    %49 = arith.truncf %46 : vector<256x64xf32> to vector<256x64xbf16>
    %cst_23 = arith.constant dense<0.000000e+00> : vector<256x128xf32>
    %50 = tpu.matmul %49, %48, %cst_23 {dimension_numbers = #tpu.dot_dimension_numbers<[1], [0], [0], [1], [0, 0, 1, 1], [], []>} : vector<256x64xbf16>, vector<64x128xbf16>, vector<256x128xf32> -> vector<256x128xf32>
    %cst_24 = arith.constant 0.000000e+00 : f32
    %51 = vector.broadcast %cst_24 : f32 to vector<1x64xf32>
    %52 = arith.maximumf %43, %51 : vector<1x64xf32>
    %53 = tpu.concatenate %52, %43 in 0 : vector<1x64xf32>, vector<1x64xf32> -> vector<2x64xf32>
    %c0_25 = arith.constant 0 : index
    %c0_26 = arith.constant 0 : index
    %c0_27 = arith.constant 0 : index
    %54 = vector.load %arg6[%c0_25, %c0_26, %c0_27] : memref<4x64x128xbf16, #tpu.memory_space<vmem>>, vector<1x64x128xbf16>
    %55 = vector.shape_cast %54 : vector<1x64x128xbf16> to vector<64x128xbf16>
    %56 = arith.truncf %53 : vector<2x64xf32> to vector<2x64xbf16>
    %cst_28 = arith.constant dense<0.000000e+00> : vector<2x128xf32>
    %57 = tpu.matmul %56, %55, %cst_28 {dimension_numbers = #tpu.dot_dimension_numbers<[1], [0], [0], [1], [0, 0, 1, 1], [], []>} : vector<2x64xbf16>, vector<64x128xbf16>, vector<2x128xf32> -> vector<2x128xf32>
    %58 = vector.extract_strided_slice %50 {offsets = [0, 0], sizes = [128, 64], strides = [1, 1]} : vector<256x128xf32> to vector<128x64xf32>
    %c2_29 = arith.constant 2 : index
    %c0_30 = arith.constant 0 : index
    %59 = vector.load %arg3[%c2_29, %c0_30] : memref<16x128xf32, #tpu.memory_space<vmem>>, vector<1x64xf32>
    %60 = vector.broadcast %59 : vector<1x64xf32> to vector<128x64xf32>
    %61 = arith.addf %58, %60 : vector<128x64xf32>
    %62 = vector.extract_strided_slice %57 {offsets = [0, 0], sizes = [1, 64], strides = [1, 1]} : vector<2x128xf32> to vector<1x64xf32>
    %63 = vector.shape_cast %61 : vector<128x64xf32> to vector<1x128x64xf32>
    %64 = vector.shape_cast %62 : vector<1x64xf32> to vector<1x1x64xf32>
    %65 = vector.broadcast %64 : vector<1x1x64xf32> to vector<1x128x64xf32>
    %66 = arith.addf %63, %65 : vector<1x128x64xf32>
    %67 = vector.shape_cast %66 : vector<1x128x64xf32> to vector<128x64xf32>
    %cst_31 = arith.constant 0.000000e+00 : f32
    %68 = vector.broadcast %cst_31 : f32 to vector<128x64xf32>
    %69 = arith.maximumf %67, %68 : vector<128x64xf32>
    %c1_32 = arith.constant 1 : index
    %c0_33 = arith.constant 0 : index
    %c0_34 = arith.constant 0 : index
    %70 = vector.load %arg7[%c1_32, %c0_33, %c0_34] : memref<5x64x64xbf16, #tpu.memory_space<vmem>>, vector<1x64x64xbf16>
    %71 = vector.shape_cast %70 : vector<1x64x64xbf16> to vector<64x64xbf16>
    %72 = arith.truncf %69 : vector<128x64xf32> to vector<128x64xbf16>
    %cst_35 = arith.constant dense<0.000000e+00> : vector<128x64xf32>
    %73 = tpu.matmul %72, %71, %cst_35 {dimension_numbers = #tpu.dot_dimension_numbers<[1], [0], [0], [1], [0, 0, 1, 1], [], []>} : vector<128x64xbf16>, vector<64x64xbf16>, vector<128x64xf32> -> vector<128x64xf32>
    %c7 = arith.constant 7 : index
    %c0_36 = arith.constant 0 : index
    %74 = vector.load %arg3[%c7, %c0_36] : memref<16x128xf32, #tpu.memory_space<vmem>>, vector<1x64xf32>
    %75 = vector.broadcast %74 : vector<1x64xf32> to vector<128x64xf32>
    %76 = arith.addf %73, %75 : vector<128x64xf32>
    %77 = vector.extract_strided_slice %50 {offsets = [128, 64], sizes = [128, 64], strides = [1, 1]} : vector<256x128xf32> to vector<128x64xf32>
    %78 = arith.addf %77, %76 : vector<128x64xf32>
    %79 = vector.extract_strided_slice %57 {offsets = [1, 64], sizes = [1, 64], strides = [1, 1]} : vector<2x128xf32> to vector<1x64xf32>
    %80 = vector.shape_cast %78 : vector<128x64xf32> to vector<1x128x64xf32>
    %81 = vector.shape_cast %79 : vector<1x64xf32> to vector<1x1x64xf32>
    %82 = vector.broadcast %81 : vector<1x1x64xf32> to vector<1x128x64xf32>
    %83 = arith.addf %80, %82 : vector<1x128x64xf32>
    %84 = vector.shape_cast %83 : vector<1x128x64xf32> to vector<128x64xf32>
    %85 = vector.shape_cast %84 : vector<128x64xf32> to vector<1x128x64xf32>
    %cst_37 = arith.constant dense<0xFF800000> : vector<1x64xf32>
    %86 = vector.multi_reduction <maximumf>, %85, %cst_37 [1] : vector<1x128x64xf32> to vector<1x64xf32>
    %cst_38 = arith.constant 0.000000e+00 : f32
    %87 = vector.broadcast %cst_38 : f32 to vector<128x64xf32>
    %88 = arith.maximumf %84, %87 : vector<128x64xf32>
    %89 = tpu.concatenate %88, %84 in 0 : vector<128x64xf32>, vector<128x64xf32> -> vector<256x64xf32>
    %c1_39 = arith.constant 1 : index
    %c0_40 = arith.constant 0 : index
    %c0_41 = arith.constant 0 : index
    %90 = vector.load %arg5[%c1_39, %c0_40, %c0_41] : memref<4x64x128xbf16, #tpu.memory_space<vmem>>, vector<1x64x128xbf16>
    %91 = vector.shape_cast %90 : vector<1x64x128xbf16> to vector<64x128xbf16>
    %92 = arith.truncf %89 : vector<256x64xf32> to vector<256x64xbf16>
    %cst_42 = arith.constant dense<0.000000e+00> : vector<256x128xf32>
    %93 = tpu.matmul %92, %91, %cst_42 {dimension_numbers = #tpu.dot_dimension_numbers<[1], [0], [0], [1], [0, 0, 1, 1], [], []>} : vector<256x64xbf16>, vector<64x128xbf16>, vector<256x128xf32> -> vector<256x128xf32>
    %cst_43 = arith.constant 0.000000e+00 : f32
    %94 = vector.broadcast %cst_43 : f32 to vector<1x64xf32>
    %95 = arith.maximumf %86, %94 : vector<1x64xf32>
    %96 = tpu.concatenate %95, %86 in 0 : vector<1x64xf32>, vector<1x64xf32> -> vector<2x64xf32>
    %c1_44 = arith.constant 1 : index
    %c0_45 = arith.constant 0 : index
    %c0_46 = arith.constant 0 : index
    %97 = vector.load %arg6[%c1_44, %c0_45, %c0_46] : memref<4x64x128xbf16, #tpu.memory_space<vmem>>, vector<1x64x128xbf16>
    %98 = vector.shape_cast %97 : vector<1x64x128xbf16> to vector<64x128xbf16>
    %99 = arith.truncf %96 : vector<2x64xf32> to vector<2x64xbf16>
    %cst_47 = arith.constant dense<0.000000e+00> : vector<2x128xf32>
    %100 = tpu.matmul %99, %98, %cst_47 {dimension_numbers = #tpu.dot_dimension_numbers<[1], [0], [0], [1], [0, 0, 1, 1], [], []>} : vector<2x64xbf16>, vector<64x128xbf16>, vector<2x128xf32> -> vector<2x128xf32>
    %101 = vector.extract_strided_slice %93 {offsets = [0, 0], sizes = [128, 64], strides = [1, 1]} : vector<256x128xf32> to vector<128x64xf32>
    %c3 = arith.constant 3 : index
    %c0_48 = arith.constant 0 : index
    %102 = vector.load %arg3[%c3, %c0_48] : memref<16x128xf32, #tpu.memory_space<vmem>>, vector<1x64xf32>
    %103 = vector.broadcast %102 : vector<1x64xf32> to vector<128x64xf32>
    %104 = arith.addf %101, %103 : vector<128x64xf32>
    %105 = vector.extract_strided_slice %100 {offsets = [0, 0], sizes = [1, 64], strides = [1, 1]} : vector<2x128xf32> to vector<1x64xf32>
    %106 = vector.shape_cast %104 : vector<128x64xf32> to vector<1x128x64xf32>
    %107 = vector.shape_cast %105 : vector<1x64xf32> to vector<1x1x64xf32>
    %108 = vector.broadcast %107 : vector<1x1x64xf32> to vector<1x128x64xf32>
    %109 = arith.addf %106, %108 : vector<1x128x64xf32>
    %110 = vector.shape_cast %109 : vector<1x128x64xf32> to vector<128x64xf32>
    %cst_49 = arith.constant 0.000000e+00 : f32
    %111 = vector.broadcast %cst_49 : f32 to vector<128x64xf32>
    %112 = arith.maximumf %110, %111 : vector<128x64xf32>
    %c2_50 = arith.constant 2 : index
    %c0_51 = arith.constant 0 : index
    %c0_52 = arith.constant 0 : index
    %113 = vector.load %arg7[%c2_50, %c0_51, %c0_52] : memref<5x64x64xbf16, #tpu.memory_space<vmem>>, vector<1x64x64xbf16>
    %114 = vector.shape_cast %113 : vector<1x64x64xbf16> to vector<64x64xbf16>
    %115 = arith.truncf %112 : vector<128x64xf32> to vector<128x64xbf16>
    %cst_53 = arith.constant dense<0.000000e+00> : vector<128x64xf32>
    %116 = tpu.matmul %115, %114, %cst_53 {dimension_numbers = #tpu.dot_dimension_numbers<[1], [0], [0], [1], [0, 0, 1, 1], [], []>} : vector<128x64xbf16>, vector<64x64xbf16>, vector<128x64xf32> -> vector<128x64xf32>
    %c8 = arith.constant 8 : index
    %c0_54 = arith.constant 0 : index
    %117 = vector.load %arg3[%c8, %c0_54] : memref<16x128xf32, #tpu.memory_space<vmem>>, vector<1x64xf32>
    %118 = vector.broadcast %117 : vector<1x64xf32> to vector<128x64xf32>
    %119 = arith.addf %116, %118 : vector<128x64xf32>
    %120 = vector.extract_strided_slice %93 {offsets = [128, 64], sizes = [128, 64], strides = [1, 1]} : vector<256x128xf32> to vector<128x64xf32>
    %121 = arith.addf %120, %119 : vector<128x64xf32>
    %122 = vector.extract_strided_slice %100 {offsets = [1, 64], sizes = [1, 64], strides = [1, 1]} : vector<2x128xf32> to vector<1x64xf32>
    %123 = vector.shape_cast %121 : vector<128x64xf32> to vector<1x128x64xf32>
    %124 = vector.shape_cast %122 : vector<1x64xf32> to vector<1x1x64xf32>
    %125 = vector.broadcast %124 : vector<1x1x64xf32> to vector<1x128x64xf32>
    %126 = arith.addf %123, %125 : vector<1x128x64xf32>
    %127 = vector.shape_cast %126 : vector<1x128x64xf32> to vector<128x64xf32>
    %128 = vector.shape_cast %127 : vector<128x64xf32> to vector<1x128x64xf32>
    %cst_55 = arith.constant dense<0xFF800000> : vector<1x64xf32>
    %129 = vector.multi_reduction <maximumf>, %128, %cst_55 [1] : vector<1x128x64xf32> to vector<1x64xf32>
    %cst_56 = arith.constant 0.000000e+00 : f32
    %130 = vector.broadcast %cst_56 : f32 to vector<128x64xf32>
    %131 = arith.maximumf %127, %130 : vector<128x64xf32>
    %132 = tpu.concatenate %131, %127 in 0 : vector<128x64xf32>, vector<128x64xf32> -> vector<256x64xf32>
    %c2_57 = arith.constant 2 : index
    %c0_58 = arith.constant 0 : index
    %c0_59 = arith.constant 0 : index
    %133 = vector.load %arg5[%c2_57, %c0_58, %c0_59] : memref<4x64x128xbf16, #tpu.memory_space<vmem>>, vector<1x64x128xbf16>
    %134 = vector.shape_cast %133 : vector<1x64x128xbf16> to vector<64x128xbf16>
    %135 = arith.truncf %132 : vector<256x64xf32> to vector<256x64xbf16>
    %cst_60 = arith.constant dense<0.000000e+00> : vector<256x128xf32>
    %136 = tpu.matmul %135, %134, %cst_60 {dimension_numbers = #tpu.dot_dimension_numbers<[1], [0], [0], [1], [0, 0, 1, 1], [], []>} : vector<256x64xbf16>, vector<64x128xbf16>, vector<256x128xf32> -> vector<256x128xf32>
    %cst_61 = arith.constant 0.000000e+00 : f32
    %137 = vector.broadcast %cst_61 : f32 to vector<1x64xf32>
    %138 = arith.maximumf %129, %137 : vector<1x64xf32>
    %139 = tpu.concatenate %138, %129 in 0 : vector<1x64xf32>, vector<1x64xf32> -> vector<2x64xf32>
    %c2_62 = arith.constant 2 : index
    %c0_63 = arith.constant 0 : index
    %c0_64 = arith.constant 0 : index
    %140 = vector.load %arg6[%c2_62, %c0_63, %c0_64] : memref<4x64x128xbf16, #tpu.memory_space<vmem>>, vector<1x64x128xbf16>
    %141 = vector.shape_cast %140 : vector<1x64x128xbf16> to vector<64x128xbf16>
    %142 = arith.truncf %139 : vector<2x64xf32> to vector<2x64xbf16>
    %cst_65 = arith.constant dense<0.000000e+00> : vector<2x128xf32>
    %143 = tpu.matmul %142, %141, %cst_65 {dimension_numbers = #tpu.dot_dimension_numbers<[1], [0], [0], [1], [0, 0, 1, 1], [], []>} : vector<2x64xbf16>, vector<64x128xbf16>, vector<2x128xf32> -> vector<2x128xf32>
    %144 = vector.extract_strided_slice %136 {offsets = [0, 0], sizes = [128, 64], strides = [1, 1]} : vector<256x128xf32> to vector<128x64xf32>
    %c4 = arith.constant 4 : index
    %c0_66 = arith.constant 0 : index
    %145 = vector.load %arg3[%c4, %c0_66] : memref<16x128xf32, #tpu.memory_space<vmem>>, vector<1x64xf32>
    %146 = vector.broadcast %145 : vector<1x64xf32> to vector<128x64xf32>
    %147 = arith.addf %144, %146 : vector<128x64xf32>
    %148 = vector.extract_strided_slice %143 {offsets = [0, 0], sizes = [1, 64], strides = [1, 1]} : vector<2x128xf32> to vector<1x64xf32>
    %149 = vector.shape_cast %147 : vector<128x64xf32> to vector<1x128x64xf32>
    %150 = vector.shape_cast %148 : vector<1x64xf32> to vector<1x1x64xf32>
    %151 = vector.broadcast %150 : vector<1x1x64xf32> to vector<1x128x64xf32>
    %152 = arith.addf %149, %151 : vector<1x128x64xf32>
    %153 = vector.shape_cast %152 : vector<1x128x64xf32> to vector<128x64xf32>
    %cst_67 = arith.constant 0.000000e+00 : f32
    %154 = vector.broadcast %cst_67 : f32 to vector<128x64xf32>
    %155 = arith.maximumf %153, %154 : vector<128x64xf32>
    %c3_68 = arith.constant 3 : index
    %c0_69 = arith.constant 0 : index
    %c0_70 = arith.constant 0 : index
    %156 = vector.load %arg7[%c3_68, %c0_69, %c0_70] : memref<5x64x64xbf16, #tpu.memory_space<vmem>>, vector<1x64x64xbf16>
    %157 = vector.shape_cast %156 : vector<1x64x64xbf16> to vector<64x64xbf16>
    %158 = arith.truncf %155 : vector<128x64xf32> to vector<128x64xbf16>
    %cst_71 = arith.constant dense<0.000000e+00> : vector<128x64xf32>
    %159 = tpu.matmul %158, %157, %cst_71 {dimension_numbers = #tpu.dot_dimension_numbers<[1], [0], [0], [1], [0, 0, 1, 1], [], []>} : vector<128x64xbf16>, vector<64x64xbf16>, vector<128x64xf32> -> vector<128x64xf32>
    %c9 = arith.constant 9 : index
    %c0_72 = arith.constant 0 : index
    %160 = vector.load %arg3[%c9, %c0_72] : memref<16x128xf32, #tpu.memory_space<vmem>>, vector<1x64xf32>
    %161 = vector.broadcast %160 : vector<1x64xf32> to vector<128x64xf32>
    %162 = arith.addf %159, %161 : vector<128x64xf32>
    %163 = vector.extract_strided_slice %136 {offsets = [128, 64], sizes = [128, 64], strides = [1, 1]} : vector<256x128xf32> to vector<128x64xf32>
    %164 = arith.addf %163, %162 : vector<128x64xf32>
    %165 = vector.extract_strided_slice %143 {offsets = [1, 64], sizes = [1, 64], strides = [1, 1]} : vector<2x128xf32> to vector<1x64xf32>
    %166 = vector.shape_cast %164 : vector<128x64xf32> to vector<1x128x64xf32>
    %167 = vector.shape_cast %165 : vector<1x64xf32> to vector<1x1x64xf32>
    %168 = vector.broadcast %167 : vector<1x1x64xf32> to vector<1x128x64xf32>
    %169 = arith.addf %166, %168 : vector<1x128x64xf32>
    %170 = vector.shape_cast %169 : vector<1x128x64xf32> to vector<128x64xf32>
    %171 = vector.shape_cast %170 : vector<128x64xf32> to vector<1x128x64xf32>
    %cst_73 = arith.constant dense<0xFF800000> : vector<1x64xf32>
    %172 = vector.multi_reduction <maximumf>, %171, %cst_73 [1] : vector<1x128x64xf32> to vector<1x64xf32>
    %cst_74 = arith.constant 0.000000e+00 : f32
    %173 = vector.broadcast %cst_74 : f32 to vector<128x64xf32>
    %174 = arith.maximumf %170, %173 : vector<128x64xf32>
    %175 = tpu.concatenate %174, %170 in 0 : vector<128x64xf32>, vector<128x64xf32> -> vector<256x64xf32>
    %c3_75 = arith.constant 3 : index
    %c0_76 = arith.constant 0 : index
    %c0_77 = arith.constant 0 : index
    %176 = vector.load %arg5[%c3_75, %c0_76, %c0_77] : memref<4x64x128xbf16, #tpu.memory_space<vmem>>, vector<1x64x128xbf16>
    %177 = vector.shape_cast %176 : vector<1x64x128xbf16> to vector<64x128xbf16>
    %178 = arith.truncf %175 : vector<256x64xf32> to vector<256x64xbf16>
    %cst_78 = arith.constant dense<0.000000e+00> : vector<256x128xf32>
    %179 = tpu.matmul %178, %177, %cst_78 {dimension_numbers = #tpu.dot_dimension_numbers<[1], [0], [0], [1], [0, 0, 1, 1], [], []>} : vector<256x64xbf16>, vector<64x128xbf16>, vector<256x128xf32> -> vector<256x128xf32>
    %cst_79 = arith.constant 0.000000e+00 : f32
    %180 = vector.broadcast %cst_79 : f32 to vector<1x64xf32>
    %181 = arith.maximumf %172, %180 : vector<1x64xf32>
    %182 = tpu.concatenate %181, %172 in 0 : vector<1x64xf32>, vector<1x64xf32> -> vector<2x64xf32>
    %c3_80 = arith.constant 3 : index
    %c0_81 = arith.constant 0 : index
    %c0_82 = arith.constant 0 : index
    %183 = vector.load %arg6[%c3_80, %c0_81, %c0_82] : memref<4x64x128xbf16, #tpu.memory_space<vmem>>, vector<1x64x128xbf16>
    %184 = vector.shape_cast %183 : vector<1x64x128xbf16> to vector<64x128xbf16>
    %185 = arith.truncf %182 : vector<2x64xf32> to vector<2x64xbf16>
    %cst_83 = arith.constant dense<0.000000e+00> : vector<2x128xf32>
    %186 = tpu.matmul %185, %184, %cst_83 {dimension_numbers = #tpu.dot_dimension_numbers<[1], [0], [0], [1], [0, 0, 1, 1], [], []>} : vector<2x64xbf16>, vector<64x128xbf16>, vector<2x128xf32> -> vector<2x128xf32>
    %187 = vector.extract_strided_slice %179 {offsets = [0, 0], sizes = [128, 64], strides = [1, 1]} : vector<256x128xf32> to vector<128x64xf32>
    %c5 = arith.constant 5 : index
    %c0_84 = arith.constant 0 : index
    %188 = vector.load %arg3[%c5, %c0_84] : memref<16x128xf32, #tpu.memory_space<vmem>>, vector<1x64xf32>
    %189 = vector.broadcast %188 : vector<1x64xf32> to vector<128x64xf32>
    %190 = arith.addf %187, %189 : vector<128x64xf32>
    %191 = vector.extract_strided_slice %186 {offsets = [0, 0], sizes = [1, 64], strides = [1, 1]} : vector<2x128xf32> to vector<1x64xf32>
    %192 = vector.shape_cast %190 : vector<128x64xf32> to vector<1x128x64xf32>
    %193 = vector.shape_cast %191 : vector<1x64xf32> to vector<1x1x64xf32>
    %194 = vector.broadcast %193 : vector<1x1x64xf32> to vector<1x128x64xf32>
    %195 = arith.addf %192, %194 : vector<1x128x64xf32>
    %196 = vector.shape_cast %195 : vector<1x128x64xf32> to vector<128x64xf32>
    %cst_85 = arith.constant 0.000000e+00 : f32
    %197 = vector.broadcast %cst_85 : f32 to vector<128x64xf32>
    %198 = arith.maximumf %196, %197 : vector<128x64xf32>
    %c4_86 = arith.constant 4 : index
    %c0_87 = arith.constant 0 : index
    %c0_88 = arith.constant 0 : index
    %199 = vector.load %arg7[%c4_86, %c0_87, %c0_88] : memref<5x64x64xbf16, #tpu.memory_space<vmem>>, vector<1x64x64xbf16>
    %200 = vector.shape_cast %199 : vector<1x64x64xbf16> to vector<64x64xbf16>
    %201 = arith.truncf %198 : vector<128x64xf32> to vector<128x64xbf16>
    %cst_89 = arith.constant dense<0.000000e+00> : vector<128x64xf32>
    %202 = tpu.matmul %201, %200, %cst_89 {dimension_numbers = #tpu.dot_dimension_numbers<[1], [0], [0], [1], [0, 0, 1, 1], [], []>} : vector<128x64xbf16>, vector<64x64xbf16>, vector<128x64xf32> -> vector<128x64xf32>
    %c10 = arith.constant 10 : index
    %c0_90 = arith.constant 0 : index
    %203 = vector.load %arg3[%c10, %c0_90] : memref<16x128xf32, #tpu.memory_space<vmem>>, vector<1x64xf32>
    %204 = vector.broadcast %203 : vector<1x64xf32> to vector<128x64xf32>
    %205 = arith.addf %202, %204 : vector<128x64xf32>
    %206 = vector.extract_strided_slice %179 {offsets = [128, 64], sizes = [128, 64], strides = [1, 1]} : vector<256x128xf32> to vector<128x64xf32>
    %207 = arith.addf %206, %205 : vector<128x64xf32>
    %208 = vector.extract_strided_slice %186 {offsets = [1, 64], sizes = [1, 64], strides = [1, 1]} : vector<2x128xf32> to vector<1x64xf32>
    %209 = vector.shape_cast %207 : vector<128x64xf32> to vector<1x128x64xf32>
    %210 = vector.shape_cast %208 : vector<1x64xf32> to vector<1x1x64xf32>
    %211 = vector.broadcast %210 : vector<1x1x64xf32> to vector<1x128x64xf32>
    %212 = arith.addf %209, %211 : vector<1x128x64xf32>
    %213 = vector.shape_cast %212 : vector<1x128x64xf32> to vector<128x64xf32>
    %214 = vector.shape_cast %213 : vector<128x64xf32> to vector<1x128x64xf32>
    %cst_91 = arith.constant dense<0xFF800000> : vector<1x64xf32>
    %215 = vector.multi_reduction <maximumf>, %214, %cst_91 [1] : vector<1x128x64xf32> to vector<1x64xf32>
    %cst_92 = arith.constant 0.000000e+00 : f32
    %216 = vector.broadcast %cst_92 : f32 to vector<1x64xf32>
    %217 = arith.maximumf %215, %216 : vector<1x64xf32>
    %c0_93 = arith.constant 0 : index
    %c0_94 = arith.constant 0 : index
    %218 = vector.load %arg8[%c0_93, %c0_94] : memref<64x64xbf16, #tpu.memory_space<vmem>>, vector<64x64xbf16>
    %219 = arith.truncf %217 : vector<1x64xf32> to vector<1x64xbf16>
    %cst_95 = arith.constant dense<0.000000e+00> : vector<1x64xf32>
    %220 = tpu.matmul %219, %218, %cst_95 {dimension_numbers = #tpu.dot_dimension_numbers<[1], [0], [0], [1], [0, 0, 1, 1], [], []>} : vector<1x64xbf16>, vector<64x64xbf16>, vector<1x64xf32> -> vector<1x64xf32>
    %c11 = arith.constant 11 : index
    %c0_96 = arith.constant 0 : index
    %221 = vector.load %arg3[%c11, %c0_96] : memref<16x128xf32, #tpu.memory_space<vmem>>, vector<1x64xf32>
    %222 = arith.addf %220, %221 : vector<1x64xf32>
    %223 = vector.shape_cast %222 : vector<1x64xf32> to vector<1x1x64xf32>
    %c0_97 = arith.constant 0 : index
    %c0_98 = arith.constant 0 : index
    %c0_99 = arith.constant 0 : index
    %224 = vector.load %arg9[%c0_97, %c0_98, %c0_99] : memref<1x1x64xf32, #tpu.memory_space<vmem>>, vector<1x1x64xf32>
    tpu.vector_store %arg9[%c0_97, %c0_98, %c0_99], %223 {strides = array<i32>} : memref<1x1x64xf32, #tpu.memory_space<vmem>>, vector<1x1x64xf32>,
    return
  }
  func.func @transform_0(%arg0: i32) -> (i32, i32) {
    %c0_i32 = arith.constant 0 : i32
    %c0_i32_0 = arith.constant 0 : i32
    return %arg0, %c0_i32 : i32, i32
  }
  func.func @transform_1(%arg0: i32) -> (i32, i32) {
    %c0_i32 = arith.constant 0 : i32
    %c0_i32_0 = arith.constant 0 : i32
    %c0_i32_1 = arith.constant 0 : i32
    return %c0_i32, %c0_i32_0 : i32, i32
  }
  func.func @transform_2(%arg0: i32) -> (i32, i32) {
    %c0_i32 = arith.constant 0 : i32
    %c0_i32_0 = arith.constant 0 : i32
    %c0_i32_1 = arith.constant 0 : i32
    return %c0_i32, %c0_i32_0 : i32, i32
  }
  func.func @transform_3(%arg0: i32) -> (i32, i32) {
    %c0_i32 = arith.constant 0 : i32
    %c0_i32_0 = arith.constant 0 : i32
    %c0_i32_1 = arith.constant 0 : i32
    return %c0_i32, %c0_i32_0 : i32, i32
  }
  func.func @transform_4(%arg0: i32) -> (i32, i32, i32) {
    %c0_i32 = arith.constant 0 : i32
    %c0_i32_0 = arith.constant 0 : i32
    %c0_i32_1 = arith.constant 0 : i32
    %c0_i32_2 = arith.constant 0 : i32
    return %c0_i32, %c0_i32_0, %c0_i32_1 : i32, i32, i32
  }
  func.func @transform_5(%arg0: i32) -> (i32, i32, i32) {
    %c0_i32 = arith.constant 0 : i32
    %c0_i32_0 = arith.constant 0 : i32
    %c0_i32_1 = arith.constant 0 : i32
    %c0_i32_2 = arith.constant 0 : i32
    return %c0_i32, %c0_i32_0, %c0_i32_1 : i32, i32, i32
  }
  func.func @transform_6(%arg0: i32) -> (i32, i32, i32) {
    %c0_i32 = arith.constant 0 : i32
    %c0_i32_0 = arith.constant 0 : i32
    %c0_i32_1 = arith.constant 0 : i32
    %c0_i32_2 = arith.constant 0 : i32
    return %c0_i32, %c0_i32_0, %c0_i32_1 : i32, i32, i32
  }
  func.func @transform_7(%arg0: i32) -> (i32, i32) {
    %c0_i32 = arith.constant 0 : i32
    %c0_i32_0 = arith.constant 0 : i32
    %c0_i32_1 = arith.constant 0 : i32
    return %c0_i32, %c0_i32_0 : i32, i32
  }
  func.func @transform_8(%arg0: i32) -> (i32, i32, i32) {
    %c0_i32 = arith.constant 0 : i32
    %c0_i32_0 = arith.constant 0 : i32
    %c0_i32_1 = arith.constant 0 : i32
    return %arg0, %c0_i32, %c0_i32_0 : i32, i32, i32
  }
}

</mosaic_0001>

<bundles_post_ra>
// kernel: tpu_custom_call.1
= control target key start
LH: loop header
LB: loop body
LE: loop exit
PB: predicated region body
PF: predicated region fallthrough
CT: control target
= control target key end

     0   :  { %13 = vsyncpa [#allocation3], 0  ;;  %s7258_s0 = inlined_call_operand.vmem [shape: f32[256,3], index: 0, kind: input, shape index: {}]   ;;  %s7259_s1 = inlined_call_operand.vmem [shape: f32[3,128], index: 1, kind: input, shape index: {}]   ;;  %s7260_s2 = inlined_call_operand.vmem [shape: f32[16,128], index: 2, kind: input, shape index: {}]   ;;  %s7261_s3 = inlined_call_operand.vmem [shape: bf16[128,128], index: 3, kind: input, shape index: {}]   ;;  %s7262_s4 = inlined_call_operand.hbm [shape: bf16[4,64,128], index: 4, kind: input, shape index: {}]   ;;  %s7263_s5 = inlined_call_operand.hbm [shape: bf16[4,64,128], index: 5, kind: input, shape index: {}]   ;;  %s7264_s6 = inlined_call_operand.vmem [shape: bf16[5,64,64], index: 6, kind: input, shape index: {}]   ;;  %s7265_s7 = inlined_call_operand.vmem [shape: bf16[64,64], index: 7, kind: input, shape index: {}]   ;;  %s7266_s8 = inlined_call_operand.hbm [shape: f32[2,1,64], index: 8, kind: output, shape index: {}]  }
   0x1   :  { %14 = vsyncpa [#allocation6], 0 }
   0x2   :  { %15 = vsyncpa [#allocation4], 0 }
   0x3   :  { %17 = vsyncpa [#allocation4 + $0x1], 0  ;;  %s5628_s27 = smov 0   ;;  %s5630_s28 = smov 0  }
   0x4   :  { %s5632_s29 = smov 0   ;;  %s5634_s30 = smov 0  }
   0x5 LB: > { %7271 = sst [smem:[#allocation11_spill]] %s5566_s29  ;;  %s5649_s9 = sadd.s32 4294967295, %s5570_s30   ;;  %s5570_s30 = sphi %s5634_s30, %s7288_s30   ;;  %s5566_s29 = sphi %s5632_s29, %s7285_s29   ;;  %s5562_s28 = sphi %s5630_s28, %s7287_s28   ;;  %s5558_s27 = sphi %s5628_s27, %s7286_s27  }
   0x6   : > { %s4487_s10 = sadd.s32 4294967294, %s5570_s30   ;;  %s5653_s11 = sadd.s32 1, %s5570_s30  }
   0x7   : > { %s203_s12 = sadd.s32 1, %s5566_s29  ;;  %s200_s13 = ssub.s32 %s5570_s30, %s5653_s11 }
   0x8   : > { %p213_p0 = scmp.ne.s32.totalorder %s5566_s29, %s5562_s28  ;;  %p201_p1 = scmp.eq.s32.totalorder %s200_s13, 0 }
   0x9   : > { %p214_p2 = scmp.eq.s32.totalorder %s5649_s9, 1  ;;  %p219_p3 = scmp.ne.s32.totalorder %s5562_s28, %s5558_s27 }
   0xa   : > { %p220_p4 = scmp.eq.s32.totalorder %s4487_s10, 1  ;;  %p4488_p7 = scmp.ge.s32.totalorder %s5570_s30, 1 }
   0xb   : > { %s5664_s14 = scalar_select %p201_p1, %s5566_s29, %s203_s12  }
   0xc   : > { %p5666_p5 = por %p214_p2, %p213_p0  ;;  %p5670_p6 = por %p220_p4, %p219_p3 }
   0xd   : > { %7272 = sst [smem:[#allocation12_spill]] %s5664_s14  ;;  %p227_p8 = scmp.lt.s32.totalorder %s5570_s30, 3 }
   0xe   : > { %s7273_s15 = scalar_select %p5666_p5, 1, 0 }
   0xf   : > { %s7274_s16 = scalar_select %p5670_p6, 1, 0 }
  0x10   : > { %p7267_p9 = scmp.eq.s32.totalorder %s5649_s9, 0  ;;  %p5677_p10 = pnand %p4488_p7, %p227_p8 }
  0x11   : > { %s5572_s18 = smov [#allocation2]   ;;  %s5573_s21 = smov [#allocation5]  }
  0x12   : > { %s7275_s17 = scalar_select %p5677_p10, 1, 0 }
  0x13   : > { %s248_s19 = sshll.u32 %s5572_s18, 4  ;;  %p5306_p11 = pneg %p5677_p10  ;;  %s249_s19 = int_to_ptr.vmem [resolvable:$true] %s248_s19 }
  0x14   : > { %s261_s22 = sshll.u32 %s5573_s21, 4  ;;  %s5444_s25 = scalar_lea.hbm %s7262_s4, 2048  ;;  %s5689_s22 = int_to_ptr.vmem [resolvable:$true] %s261_s22 }
  0x15   : > { %p5685_p12 = pnand %p7267_p9, %p5306_p11  ;;  %p5445_p13 = scmp.ne.s32.totalorder %s7262_s4, %s5444_s25 }
  0x16   : > { %p5451_p3 = scmp.lt.u32.totalorder %s5444_s25, %s7262_s4 }
  0x17   : > { %p5446_p0 = pneg %p5685_p12 }
  0x19   : > { %p5447_p1 = pnand %p5446_p0, %p5445_p13 }
  0x1b   : > { %p5448_p2 = pneg %p5447_p1 }
  0x1d   : > { %p5453_p4 = pnand %p5451_p3, %p5448_p2 }
  0x1f   : > { %5456 = shalt.err (!%p5453_p4)
}
  0x20   : > { %s5457_s18 = scalar_lea.vmem %s249_s19, 2048  ;;  %p5465_p9 = scmp.lt.s32.totalorder %s249_s19, %s249_s19 }
  0x21   : > { %p5458_p7 = scmp.ne.s32.totalorder %s249_s19, %s5457_s18  ;;  %p5466_p6 = scmp.lt.s32.totalorder %s5457_s18, %s5457_s18 }
  0x23   : > { %p5460_p8 = pnand %p5458_p7, %p5446_p0  ;;  %p5467_p5 = por %p5466_p6, %p5465_p9 }
  0x25   : > { %p5461_p11 = pneg %p5460_p8 }
  0x27   : > { %p5468_p10 = pnand %p5467_p5, %p5461_p11 }
  0x29   : > { %5471 = shalt.err (!%p5468_p10)
}
  0x2a   : > { %s5574_s21 = smov 64   ;;  %s5575_s23 = smov 4  }
  0x2b   : > { %5309 = dma.hbm_to_vmem [thread:$0]  (!%p5685_p12), %s7262_s4, 2048, %s249_s19, [#allocation3], %s5574_s21, %s5574_s21, %s5575_s23  }
  0x2c   : > { %s5472_s12 = scalar_lea.hbm %s7263_s5, 2048 }
  0x2d   : > { %p5473_p13 = scmp.ne.s32.totalorder %s7263_s5, %s5472_s12  ;;  %p5479_p9 = scmp.lt.u32.totalorder %s5472_s12, %s7263_s5 }
  0x2f   : > { %p5475_p5 = pnand %p5473_p13, %p5446_p0 }
  0x31   : > { %p5476_p6 = pneg %p5475_p5 }
  0x33   : > { %p5481_p10 = pnand %p5479_p9, %p5476_p6 }
  0x35   : > { %5484 = shalt.err (!%p5481_p10)
}
  0x36   : > { %s5485_s19 = scalar_lea.vmem %s5689_s22, 2048  ;;  %p5493_p4 = scmp.lt.s32.totalorder %s5689_s22, %s5689_s22 }
  0x37   : > { %p5486_p1 = scmp.ne.s32.totalorder %s5689_s22, %s5485_s19  ;;  %p5494_p7 = scmp.lt.s32.totalorder %s5485_s19, %s5485_s19 }
  0x39   : > { %p5488_p2 = pnand %p5486_p1, %p5446_p0  ;;  %p5495_p8 = por %p5494_p7, %p5493_p4 }
  0x3b   : > { %p5489_p3 = pneg %p5488_p2 }
  0x3d   : > { %p5496_p11 = pnand %p5495_p8, %p5489_p3 }
  0x3f   : > { %5499 = shalt.err (!%p5496_p11)
}
  0x40   : > { %5312 = dma.hbm_to_vmem [thread:$0]  (!%p5685_p12), %s7263_s5, 2048, %s5689_s22, [#allocation6], %s5574_s21, %s5574_s21, %s5575_s23  }
  0x41   : > { %p7277_p13 = scmp.ne.s32.totalorder %s7275_s17, 0 }
  0x42   : > { %p7278_p5 = scmp.eq.s32.totalorder (!%p7277_p13), %s5649_s9, 0 }
  0x43   : > { %292 = sbr.rel (%p7277_p13) target bundleno = 4170 (0x104a), region = 52 }
  0x4a   : > { %5545 = dma.done.wait (%p7278_p5), [#allocation3], 2048   ;;  %p7279_p0 = pmov %p7278_p5 }
  0x4c   : > { %5547 = vsyncadd (%p7279_p0), [#allocation3], 4294965248  ;;  %p7280_p6 = pmov %p7279_p0 }
  0x4d   : > { %p7281_p9 = pmov %p7279_p0 }
  0x4e   : > { %5549 = dma.done.wait (%p7280_p6), [#allocation6], 2048  }
  0x4f   : > { %5551 = vsyncadd (%p7281_p9), [#allocation6], 4294965248  ;;  %s5749_s20 = sshll.u32 %s5649_s9, 4  ;;  %v5576_v0 = vmov 2   ;;  %v5577_v1 = vmov 0   ;;  %v5578_v7 = vmov 1  }
  0x50   : > { %5367 = vset.pattern.permute.xlu0 %v5576_v0  ;;  %5364 = vset.pattern.permute.xlu1 %v5577_v1  ;;  %p330_p12 = scmp.lt.s32.totalorder %s5749_s20, 31  ;;  %v5380_v11 = vld [vmem:[%s7261_s3] sm:$0xff]   ;;  %v5381_v13 = vld [vmem:[%s7261_s3 + $0x8] sm:$0xff]   ;;  %v5382_v15 = vld [vmem:[%s7261_s3 + $0x10] sm:$0xff]   ;;  %vm1015_vm0 = vcmask 523264   ;;  %s5579_s18 = smov 64  }
  0x51   : > { %4908 = vmatprep.subr.bf16.mxu0 %v5380_v11  ;;  %v5383_v17 = vld [vmem:[%s7261_s3 + $0x18] sm:$0xff]   ;;  %v5384_v18 = vld [vmem:[%s7261_s3 + $0x20] sm:$0xff]   ;;  %v5385_v19 = vld [vmem:[%s7261_s3 + $0x28] sm:$0xff]   ;;  %vm1217_vm1 = vcmask 1048064   ;;  %vm5581_vm2 = vmmov 0   ;;  %vm1577_vm3 = vcmask 1040384   ;;  %s7216_s9 = scalar_lea.hbm %s7266_s8, %s5749_s20 }
  0x52   : > { %s331_s17 = scalar_select %p330_p12, %s5749_s20, 31  ;;  %4909 = vmatpush3.bf16.msra.mxu0 %v5380_v11  ;;  %v5386_v20 = vld [vmem:[%s7261_s3 + $0x30] sm:$0xff]   ;;  %v5387_v21 = vld [vmem:[%s7261_s3 + $0x38] sm:$0xff]   ;;  %v5828_v45 = vld [vmem:[%s7259_s1] ss:$0 sm:$0xff]  ;;  %vm4395_vm4 = vcmask 516096  }
  0x53   : > { %4910 = vmatprep.subr.bf16.mxu0 %v5381_v13  ;;  %v5388_v46 = vld [vmem:[%s7264_s6] sm:$0xff]   ;;  %v5389_v47 = vld [vmem:[%s7264_s6 + $0x8] sm:$0xff]   ;;  %s327_s19 = sand.u32 1, %s5562_s28   ;;  %p7282_p1 = scmp.ne.s32.totalorder %s7273_s15, 0 }
  0x54   : > { %s4496_s22 = sshll.u32 %s331_s17, 3  ;;  %4956 = vmatprep.subr.bf16.mxu1 %v5388_v46  ;;  %v5842_v50 = vld [vmem:[%s7260_s2] ss:$0 sm:$0xff]  ;;  %v5847_v51 = vld [vmem:[%s7259_s1 + $0x1] ss:$0 sm:$0xff]  ;;  %s328_s17 = scalar_lea.vmem [#allocation7], %s327_s19 }
  0x55   : > { %s5758_s24 = scalar_lea.vmem %s7258_s0, %s4496_s22  ;;  %4957 = vmatpush3.bf16.msra.mxu1 %v5388_v46  ;;  %v5858_v58 = vld [vmem:[%s7259_s1 + $0x2] ss:$0 sm:$0xff]  ;;  %s4410_s22 = sshll.u32 %s328_s17, 4  ;;  %s7218_s22 = int_to_ptr.vmem [resolvable:$true] %s4410_s22 }
  0x56   : > { %v338_v2 = vld [vmem:[%s5758_s24 + $0x10] sm:$0xff]  ;;  %v337_v3 = vld [vmem:[%s5758_s24 + $0x8] sm:$0xff]  ;;  %v339_v4 = vld [vmem:[%s5758_s24 + $0x18] sm:$0xff]  ;;  %4911 = vmatpush3.bf16.msra.mxu0 %v5381_v13  ;;  %4958 = vmatprep.subr.bf16.mxu1 %v5389_v47  ;;  %s5500_s25 = scalar_lea.vmem %s7218_s22, 16 }
  0x57   : > { %366 = vperm.xlu1 %5364, %v338_v2   ;;  %581 = vperm.xlu0 %5367, %v337_v3   ;;  %v340_v5 = vld [vmem:[%s5758_s24 + $0x20] sm:$0xff]  ;;  %v343_v6 = vld [vmem:[%s5758_s24 + $0x38] sm:$0xff]  ;;  %v5767_v8 = vld [vmem:[%s5758_s24 + $0x48] sm:$0xff]  ;;  %p5501_p10 = scmp.ne.s32.totalorder %s7218_s22, %s5500_s25 }
  0x58   : > { %v336_v9 = vld [vmem:[%s5758_s24] sm:$0xff]  ;;  %v341_v10 = vld [vmem:[%s5758_s24 + $0x28] sm:$0xff]  ;;  %v342_v12 = vld [vmem:[%s5758_s24 + $0x30] sm:$0xff]  ;;  %4912 = vmatprep.subr.bf16.mxu0 %v5382_v15 }
  0x59   : > { %v348_v14 = vld [vmem:[%s5758_s24 + $0x60] sm:$0xff]  ;;  %v351_v16 = vld [vmem:[%s5758_s24 + $0x78] sm:$0xff]  ;;  %v346_v24 = vld [vmem:[%s5758_s24 + $0x50] sm:$0xff]  ;;  %4959 = vmatpush3.bf16.msra.mxu1 %v5389_v47  ;;  %p5502_p2 = pnand %p5501_p10, %p7282_p1 }
  0x5a   : > { %4913 = vmatpush3.bf16.msra.mxu0 %v5382_v15  ;;  %v344_v22 = vld [vmem:[%s5758_s24 + $0x40] sm:$0xff]  ;;  %v347_v23 = vld [vmem:[%s5758_s24 + $0x58] sm:$0xff]  ;;  %v349_v25 = vld [vmem:[%s5758_s24 + $0x68] sm:$0xff] }
  0x5b   : > { %371 = vperm.xlu1 %5364, %v339_v4   ;;  %593 = vperm.xlu0 %5367, %v340_v5   ;;  %v350_v26 = vld [vmem:[%s5758_s24 + $0x70] sm:$0xff]  ;;  %p5503_p3 = pneg %p5502_p2  ;;  %s5582_s24 = smov [#allocation7]  }
  0x5c   : > { %4914 = vmatprep.subr.bf16.mxu0 %v5383_v17  ;;  %s5504_s26 = sshll.u32 %s5582_s24, 4  ;;  %s5505_s26 = int_to_ptr.vmem [resolvable:$false] %s5504_s26 }
  0x5d   : > { %s5506_s10 = scalar_lea.vmem %s5505_s26, 32  ;;  %p5507_p4 = scmp.lt.s32.totalorder %s7218_s22, %s5505_s26 }
  0x5e   : > { %4915 = vmatpush3.bf16.msra.mxu0 %v5383_v17  ;;  %p5508_p7 = scmp.lt.s32.totalorder %s5506_s10, %s5500_s25 }
  0x5f   : > { %5365 = vset.pattern.permute.xlu1 %v5578_v7  ;;  %605 = vperm.xlu0 %5367, %v343_v6  }
  0x60   : > { %480 = vperm.xlu1 %5365, %v337_v3   ;;  %4916 = vmatprep.subr.bf16.mxu0 %v5384_v18  ;;  %p5509_p8 = por %p5508_p7, %p5507_p4 }
  0x62   : > { %4917 = vmatpush3.bf16.msra.mxu0 %v5384_v18  ;;  %p5510_p11 = pnand %p5509_p8, %p5503_p3 }
  0x63   : > { %613 = vperm.xlu0 %5367, %v5767_v8   ;;  %4918 = vmatprep.subr.bf16.mxu0 %v5385_v19 }
  0x64   : > { %484 = vperm.xlu1 %5365, %v338_v2  }
  0x66   : > { %4919 = vmatpush3.bf16.msra.mxu0 %v5385_v19 }
  0x67   : > { %5374 = vset.pattern.permute.xlu0 %v5577_v1  ;;  %4920 = vmatprep.subr.bf16.mxu0 %v5386_v20 }
  0x68   : > { %5366 = vset.pattern.permute.xlu1 %v5576_v0  ;;  %356 = vperm.xlu0 %5374, %v336_v9  }
  0x69   : > { %577 = vperm.xlu1 %5366, %v336_v9  }
  0x6a   : > { %4921 = vmatpush3.bf16.msra.mxu0 %v5386_v20 }
  0x6b   : > { %4922 = vmatprep.subr.bf16.mxu0 %v5387_v21 }
  0x6c   : > { %361 = vperm.xlu0 %5374, %v337_v3  }
  0x6d   : > { %585 = vperm.xlu1 %5366, %v338_v2  }
  0x6e   : > { %4923 = vmatpush3.bf16.msra.mxu0 %v5387_v21 }
  0x70   : > { %376 = vperm.xlu0 %5374, %v340_v5  }
  0x71   : > { %589 = vperm.xlu1 %5366, %v339_v4  }
  0x74   : > { %391 = vperm.xlu0 %5374, %v343_v6  }
  0x75   : > { %5368 = vset.pattern.permute.xlu1 %v5577_v1 }
  0x76   : > { %381 = vperm.xlu1 %5368, %v341_v10  }
  0x78   : > { %401 = vperm.xlu0 %5374, %v5767_v8  }
  0x7a   : > { %386 = vperm.xlu1 %5368, %v342_v12  }
  0x7c   : > { %416 = vperm.xlu0 %5374, %v348_v14  }
  0x7e   : > { %5369 = vset.pattern.permute.xlu1 %v5578_v7 }
  0x7f   : > { %492 = vperm.xlu1 %5369, %v340_v5  }
  0x80   : > { %431 = vperm.xlu0 %5374, %v351_v16  }
  0x83   : > { %500 = vperm.xlu1 %5369, %v342_v12  }
  0x84   : > { %5376 = vset.pattern.permute.xlu0 %v5578_v7 }
  0x85   : > { %476 = vperm.xlu0 %5376, %v336_v9  }
  0x87   : > { %504 = vperm.xlu1 %5369, %v343_v6  }
  0x89   : > { %488 = vperm.xlu0 %5376, %v339_v4  }
  0x8b   : > { %5370 = vset.pattern.permute.xlu1 %v5576_v0 }
  0x8c   : > { %597 = vperm.xlu1 %5370, %v341_v10  }
  0x8d   : > { %496 = vperm.xlu0 %5376, %v341_v10  }
  0x90   : > { %601 = vperm.xlu1 %5370, %v342_v12  }
  0x91   : > { %508 = vperm.xlu0 %5376, %v344_v22  }
  0x94   : > { %5371 = vset.pattern.permute.xlu1 %v5577_v1 }
  0x95   : > { %396 = vperm.xlu1 %5371, %v344_v22   ;;  %520 = vperm.xlu0 %5376, %v347_v23  }
  0x99   : > { %406 = vperm.xlu1 %5371, %v346_v24   ;;  %528 = vperm.xlu0 %5376, %v349_v25  }
  0x9d   : > { %411 = vperm.xlu1 %5371, %v347_v23   ;;  %5378 = vset.pattern.permute.xlu0 %v5576_v0 }
  0x9e   : > { %625 = vperm.xlu0 %5378, %v348_v14  }
  0xa1   : > { %5372 = vset.pattern.permute.xlu1 %v5578_v7 }
  0xa2   : > { %512 = vperm.xlu1 %5372, %v5767_v8   ;;  %637 = vperm.xlu0 %5378, %v351_v16  }
  0xa6   : > { %516 = vperm.xlu1 %5372, %v346_v24  }
  0xaa   : > { %5373 = vset.pattern.permute.xlu1 %v5576_v0 }
  0xab   : > { %609 = vperm.xlu1 %5373, %v344_v22  }
  0xaf   : > { %617 = vperm.xlu1 %5373, %v346_v24  }
  0xb3   : > { %621 = vperm.xlu1 %5373, %v347_v23  }
  0xb7   : > { %5375 = vset.pattern.permute.xlu1 %v5577_v1 }
  0xb8   : > { %421 = vperm.xlu1 %5375, %v349_v25  }
  0xbc   : > { %426 = vperm.xlu1 %5375, %v350_v26  }
  0xc0   : > { %5377 = vset.pattern.permute.xlu1 %v5578_v7 }
  0xc1   : > { %524 = vperm.xlu1 %5377, %v348_v14  }
  0xc5   : > { %532 = vperm.xlu1 %5377, %v350_v26  }
  0xc9   : > { %536 = vperm.xlu1 %5377, %v351_v16  }
  0xcd   : > { %5379 = vset.pattern.permute.xlu1 %v5576_v0 }
  0xce   : > { %629 = vperm.xlu1 %5379, %v349_v25  }
  0xd2   : > { %633 = vperm.xlu1 %5379, %v350_v26  }
  0xd6   : > { %v367_v27 = vpop.permute.xlu1 %366  ;;  %v582_v28 = vpop.permute.xlu0 %581 }
  0xd7   : > { %v440_v56 = vmul.f32 %v5828_v45, %v367_v27  ;;  %v645_v62 = vmul.f32 %v5858_v58, %v582_v28 }
  0xd9   : > { %v460_v1 = vadd.f32 %v5842_v50, %v440_v56 }
  0xda   : > { %v372_v29 = vpop.permute.xlu1 %371  ;;  %v594_v30 = vpop.permute.xlu0 %593 }
  0xdb   : > { %v441_v2 = vmul.f32 %v5828_v45, %v372_v29  ;;  %v648_v15 = vmul.f32 %v5858_v58, %v594_v30 }
  0xdd   : > { %v461_v14 = vadd.f32 %v5842_v50, %v441_v2 }
  0xde   : > { %v5819_v31 = vpop.permute.xlu0 %605 }
  0xdf   : > { %v481_v32 = vpop.permute.xlu1 %480 }
  0xe0   : > { %v544_v57 = vmul.f32 %v5847_v51, %v481_v32 }
  0xe2   : > { %v5821_v33 = vpop.permute.xlu0 %613 }
  0xe3   : > { %v485_v34 = vpop.permute.xlu1 %484 }
  0xe4   : > { %v545_v59 = vmul.f32 %v5847_v51, %v485_v34 }
  0xe6   : > { %v561_v6 = vadd.f32 %v545_v59, %v460_v1 }
  0xe7   : > { %v357_v35 = vpop.permute.xlu0 %356 }
  0xe8   : > { %v578_v36 = vpop.permute.xlu1 %577  ;;  %v438_v53 = vmul.f32 %v5828_v45, %v357_v35 }
  0xe9   : > { %v644_v11 = vmul.f32 %v5858_v58, %v578_v36 }
  0xea   : > { %v458_v63 = vadd.f32 %v5842_v50, %v438_v53  ;;  %v651_v53 = vmul.f32 %v5858_v58, %v5819_v31 }
  0xeb   : > { %v362_v37 = vpop.permute.xlu0 %361 }
  0xec   : > { %v586_v38 = vpop.permute.xlu1 %585  ;;  %v439_v48 = vmul.f32 %v5828_v45, %v362_v37 }
  0xed   : > { %v646_v3 = vmul.f32 %v5858_v58, %v586_v38 }
  0xee   : > { %v459_v54 = vadd.f32 %v5842_v50, %v439_v48 }
  0xef   : > { %v377_v39 = vpop.permute.xlu0 %376  ;;  %v5876_v16 = vadd.f32 %v646_v3, %v561_v6 }
  0xf0   : > { %v590_v40 = vpop.permute.xlu1 %589  ;;  %v442_v60 = vmul.f32 %v5828_v45, %v377_v39  ;;  %v560_v0 = vadd.f32 %v544_v57, %v459_v54 }
  0xf1   : > { %v647_v18 = vmul.f32 %v5858_v58, %v590_v40  ;;  %v678_v39 = vmax.f32 %v5876_v16, 0.0 }
  0xf2   : > { %v462_v7 = vadd.f32 %v5842_v50, %v442_v60  ;;  %v5872_v13 = vadd.f32 %v645_v62, %v560_v0 }
  0xf3   : > { %v392_v41 = vpop.permute.xlu0 %391 }
  0xf4   : > { %v445_v8 = vmul.f32 %v5828_v45, %v392_v41  ;;  %v677_v29 = vmax.f32 %v5872_v13, 0.0 }
  0xf5   : > { %v382_v42 = vpop.permute.xlu1 %381 }
  0xf6   : > { %v443_v19 = vmul.f32 %v5828_v45, %v382_v42  ;;  %v465_v22 = vadd.f32 %v5842_v50, %v445_v8 }
  0xf7   : > { %v5823_v43 = vpop.permute.xlu0 %401 }
  0xf8   : > { %v463_v35 = vadd.f32 %v5842_v50, %v443_v19  ;;  %v447_v8 = vmul.f32 %v5828_v45, %v5823_v43 }
  0xf9   : > { %v387_v44 = vpop.permute.xlu1 %386 }
  0xfa   : > { %v444_v23 = vmul.f32 %v5828_v45, %v387_v44 }
  0xfb   : > { %v5837_v49 = vpop.permute.xlu0 %416 }
  0xfc   : > { %v464_v40 = vadd.f32 %v5842_v50, %v444_v23 }
  0xfe   : > { %v493_v52 = vpop.permute.xlu1 %492 }
  0xff   : > { %v5851_v55 = vpop.permute.xlu0 %431  ;;  %v547_v9 = vmul.f32 %v5847_v51, %v493_v52 }
 0x101   : > { %v563_v24 = vadd.f32 %v547_v9, %v462_v7 }
 0x102   : > { %v501_v61 = vpop.permute.xlu1 %500 }
 0x103   : > { %v549_v32 = vmul.f32 %v5847_v51, %v501_v61  ;;  %v5897_v41 = vadd.f32 %v648_v15, %v563_v24 }
 0x104   : > { %v477_v4 = vpop.permute.xlu0 %476 }
 0x105   : > { %v543_v5 = vmul.f32 %v5847_v51, %v477_v4  ;;  %v565_v54 = vadd.f32 %v549_v32, %v464_v40  ;;  %v680_v62 = vmax.f32 %v5897_v41, 0.0 }
 0x106   : > { %v505_v10 = vpop.permute.xlu1 %504 }
 0x107   : > { %v559_v12 = vadd.f32 %v543_v5, %v458_v63  ;;  %v550_v25 = vmul.f32 %v5847_v51, %v505_v10 }
 0x108   : > { %v489_v17 = vpop.permute.xlu0 %488 }
 0x109   : > { %v546_v20 = vmul.f32 %v5847_v51, %v489_v17  ;;  %v5881_v21 = vadd.f32 %v644_v11, %v559_v12  ;;  %v566_v42 = vadd.f32 %v550_v25, %v465_v22 }
 0x10b   : > { %v562_v26 = vadd.f32 %v546_v20, %v461_v14  ;;  %v598_v27 = vpop.permute.xlu1 %597  ;;  %v676_v28 = vmax.f32 %v5881_v21, 0.0  ;;  %v716_v30 = vpack.c.bf16 %v5872_v13, %v5881_v21  ;;  %v5908_v60 = vadd.f32 %v651_v53, %v566_v42  ;;  %v5391_v13 = vld [vmem:[%s7264_s6 + $0x18] sm:$0xff]  }
 0x10c   : > { %v497_v34 = vpop.permute.xlu0 %496  ;;  %v649_v44 = vmul.f32 %v5858_v58, %v598_v27  ;;  %v467_v14 = vadd.f32 %v5842_v50, %v447_v8  ;;  %v653_v20 = vmul.f32 %v5858_v58, %v5821_v33 }
 0x10d   : > { %v5892_v36 = vadd.f32 %v647_v18, %v562_v26  ;;  %v548_v37 = vmul.f32 %v5847_v51, %v497_v34  ;;  %v708_v38 = vpack.c.bf16 %v677_v29, %v676_v28  ;;  %v683_v4 = vmax.f32 %v5908_v60, 0.0 }
 0x10f   : > { %v564_v46 = vadd.f32 %v548_v37, %v463_v35  ;;  %4924 = vmatprep.mubr.bf16.mxu0 %v708_v38  ;;  %v602_v47 = vpop.permute.xlu1 %601  ;;  %v679_v48 = vmax.f32 %v5892_v36, 0.0  ;;  %v717_v52 = vpack.c.bf16 %v5892_v36, %v5876_v16  ;;  %v4509_v36 = vld [vmem:[%s7260_s2 + $0x1] ss:$0 sm:$0xff] }
 0x110   : > { %v650_v56 = vmul.f32 %v5858_v58, %v602_v47  ;;  %v509_v12 = vpop.permute.xlu0 %508 }
 0x111   : > { %v5906_v57 = vadd.f32 %v649_v44, %v564_v46  ;;  %v709_v59 = vpack.c.bf16 %v679_v48, %v678_v39  ;;  %v551_v18 = vmul.f32 %v5847_v51, %v509_v12 }
 0x112   : > { %v5910_v61 = vadd.f32 %v650_v56, %v565_v54 }
 0x113   : > { %4925 = vmatmul.mubr.bf16.vlgmr.msra.gmra.mrb[0].mxu0 %v709_v59  ;;  %v681_v63 = vmax.f32 %v5906_v57, 0.0  ;;  %v718_v0 = vpack.c.bf16 %v5906_v57, %v5897_v41 }
 0x114   : > { %v397_v1 = vpop.permute.xlu1 %396  ;;  %v719_v31 = vpack.c.bf16 %v5908_v60, %v5910_v61  ;;  %v682_v2 = vmax.f32 %v5910_v61, 0.0  ;;  %v521_v25 = vpop.permute.xlu0 %520 }
 0x115   : > { %v710_v3 = vpack.c.bf16 %v681_v63, %v680_v62  ;;  %v446_v10 = vmul.f32 %v5828_v45, %v397_v1  ;;  %v554_v34 = vmul.f32 %v5847_v51, %v521_v25 }
 0x116   : > { %v711_v6 = vpack.c.bf16 %v683_v4, %v682_v2 }
 0x117   : > { %4928 = vmatprep.mubr.bf16.mxu0 %v710_v3  ;;  %v466_v17 = vadd.f32 %v5842_v50, %v446_v10  ;;  %v450_v3 = vmul.f32 %v5828_v45, %v5837_v49 }
 0x118   : > { %v407_v5 = vpop.permute.xlu1 %406  ;;  %v529_v2 = vpop.permute.xlu0 %528 }
 0x119   : > { %v448_v22 = vmul.f32 %v5828_v45, %v407_v5  ;;  %v567_v23 = vadd.f32 %v551_v18, %v466_v17  ;;  %v470_v8 = vadd.f32 %v5842_v50, %v450_v3  ;;  %v556_v18 = vmul.f32 %v5847_v51, %v529_v2 }
 0x11b   : > { %4929 = vmatmul.mubr.bf16.gmra.mrb[4].mxu0 %v711_v6  ;;  %v468_v32 = vadd.f32 %v5842_v50, %v448_v22 }
 0x11c   : > { %v412_v7 = vpop.permute.xlu1 %411 }
 0x11d   : > { %v449_v24 = vmul.f32 %v5828_v45, %v412_v7  ;;  %v626_v7 = vpop.permute.xlu0 %625 }
 0x11e   : > { %v656_v12 = vmul.f32 %v5858_v58, %v626_v7 }
 0x11f   : > { %v469_v35 = vadd.f32 %v5842_v50, %v449_v24 }
 0x121   : > { %v513_v9 = vpop.permute.xlu1 %512  ;;  %v570_v46 = vadd.f32 %v554_v34, %v469_v35  ;;  %v638_v49 = vpop.permute.xlu0 %637 }
 0x122   : > { %v552_v11 = vmul.f32 %v5847_v51, %v513_v9  ;;  %v453_v9 = vmul.f32 %v5828_v45, %v5851_v55  ;;  %v659_v22 = vmul.f32 %v5858_v58, %v638_v49 }
 0x124   : > { %v568_v19 = vadd.f32 %v552_v11, %v467_v14  ;;  %v473_v17 = vadd.f32 %v5842_v50, %v453_v9 }
 0x125   : > { %v517_v15 = vpop.permute.xlu1 %516 }
 0x126   : > { %v5931_v26 = vadd.f32 %v653_v20, %v568_v19  ;;  %v553_v28 = vmul.f32 %v5847_v51, %v517_v15 }
 0x128   : > { %v685_v39 = vmax.f32 %v5931_v26, 0.0  ;;  %v569_v40 = vadd.f32 %v553_v28, %v468_v32 }
 0x12a   : > { %v610_v43 = vpop.permute.xlu1 %609 }
 0x12b   : > { %v652_v27 = vmul.f32 %v5858_v58, %v610_v43 }
 0x12d   : > { %v5935_v29 = vadd.f32 %v652_v27, %v567_v23 }
 0x12e   : > { %v618_v33 = vpop.permute.xlu1 %617 }
 0x12f   : > { %v684_v37 = vmax.f32 %v5935_v29, 0.0  ;;  %v654_v38 = vmul.f32 %v5858_v58, %v618_v33 }
 0x131   : > { %v712_v42 = vpack.c.bf16 %v685_v39, %v684_v37  ;;  %v5943_v47 = vadd.f32 %v654_v38, %v569_v40 }
 0x132   : > { %v622_v44 = vpop.permute.xlu1 %621 }
 0x133   : > { %v655_v48 = vmul.f32 %v5858_v58, %v622_v44  ;;  %4932 = vmatprep.mubr.bf16.mxu0 %v712_v42  ;;  %v686_v54 = vmax.f32 %v5943_v47, 0.0 }
 0x135   : > { %v671_v53 = vadd.f32 %v655_v48, %v570_v46 }
 0x137   : > { %v687_v56 = vmax.f32 %v671_v53, 0.0  ;;  %v422_v59 = vpop.permute.xlu1 %421  ;;  %v721_v16 = vpack.c.bf16 %v671_v53, %v5943_v47 }
 0x138   : > { %v451_v6 = vmul.f32 %v5828_v45, %v422_v59 }
 0x139   : > { %v713_v62 = vpack.c.bf16 %v687_v56, %v686_v54 }
 0x13a   : > { %v471_v14 = vadd.f32 %v5842_v50, %v451_v6 }
 0x13b   : > { %4933 = vmatmul.mubr.bf16.gmra.mrb[8].mxu0 %v713_v62  ;;  %v427_v63 = vpop.permute.xlu1 %426 }
 0x13c   : > { %v452_v19 = vmul.f32 %v5828_v45, %v427_v63  ;;  %v572_v24 = vadd.f32 %v556_v18, %v471_v14 }
 0x13e   : > { %v472_v27 = vadd.f32 %v5842_v50, %v452_v19  ;;  %v5390_v50 = vld [vmem:[%s7264_s6 + $0x10] sm:$0xff]  }
 0x13f   : > { %4960 = vmatprep.subr.bf16.mxu1 %v5390_v50 }
 0x140   : > { %v525_v1 = vpop.permute.xlu1 %524  ;;  %4961 = vmatpush3.bf16.msra.mxu1 %v5390_v50 }
 0x141   : > { %v555_v5 = vmul.f32 %v5847_v51, %v525_v1  ;;  %4962 = vmatprep.subr.bf16.mxu1 %v5391_v13 }
 0x143   : > { %v571_v11 = vadd.f32 %v555_v5, %v470_v8 }
 0x144   : > { %v533_v4 = vpop.permute.xlu1 %532  ;;  %4963 = vmatpush3.bf16.msra.mxu1 %v5391_v13 }
 0x145   : > { %v672_v20 = vadd.f32 %v656_v12, %v571_v11  ;;  %v557_v55 = vmul.f32 %v5847_v51, %v533_v4 }
 0x147   : > { %v688_v32 = vmax.f32 %v672_v20, 0.0  ;;  %v573_v33 = vadd.f32 %v557_v55, %v472_v27 }
 0x148   : > { %v537_v10 = vpop.permute.xlu1 %536 }
 0x149   : > { %v558_v15 = vmul.f32 %v5847_v51, %v537_v10 }
 0x14b   : > { %v574_v23 = vadd.f32 %v558_v15, %v473_v17 }
 0x14d   : > { %v630_v43 = vpop.permute.xlu1 %629  ;;  %v675_v35 = vadd.f32 %v659_v22, %v574_v23 }
 0x14e   : > { %v657_v25 = vmul.f32 %v5858_v58, %v630_v43 }
 0x14f   : > { %v691_v40 = vmax.f32 %v675_v35, 0.0 }
 0x150   : > { %v673_v28 = vadd.f32 %v657_v25, %v572_v24 }
 0x151   : > { %v634_v34 = vpop.permute.xlu1 %633 }
 0x152   : > { %v689_v37 = vmax.f32 %v673_v28, 0.0  ;;  %v658_v45 = vmul.f32 %v5858_v58, %v634_v34  ;;  %v720_v58 = vpack.c.bf16 %v5931_v26, %v5935_v29  ;;  %v722_v21 = vpack.c.bf16 %v673_v28, %v672_v20 }
 0x154   : > { %v674_v38 = vadd.f32 %v658_v45, %v573_v33  ;;  %v714_v39 = vpack.c.bf16 %v689_v37, %v688_v32 }
 0x156   : > { %v690_v42 = vmax.f32 %v674_v38, 0.0  ;;  %4936 = vmatprep.mubr.bf16.mxu0 %v714_v39 }
 0x158   : > { %v715_v51 = vpack.c.bf16 %v691_v40, %v690_v42 }
 0x15a   : > { %4937 = vmatmul.mubr.bf16.gmra.mrb[12].mxu0 %v715_v51 }
 0x15b   : > { %4940 = vmatprep.mubr.bf16.mxu0 %v716_v30  ;;  %v723_v30 = vpack.c.bf16 %v675_v35, %v674_v38 }
 0x162   : > { %4941 = vmatmul.mubr.bf16.gmra.mrb[16].mxu0 %v717_v52 }
 0x163   : > { %4944 = vmatprep.mubr.bf16.mxu0 %v718_v0 }
 0x16a   : > { %4945 = vmatmul.mubr.bf16.gmra.mrb[20].mxu0 %v719_v31 }
 0x16b   : > { %4948 = vmatprep.mubr.bf16.mxu0 %v720_v58 }
 0x172   : > { %4949 = vmatmul.mubr.bf16.gmra.mrb[24].mxu0 %v721_v16 }
 0x173   : > { %4952 = vmatprep.mubr.bf16.mxu0 %v722_v21 }
 0x17a   : > { %4953 = vmatmul.mubr.bf16.gmra.mrb[28].mxu0 %v723_v30 }
 0x1e6   : > { %v4926_v41 = vpop.f32.mrb[0].mxu0 }
 0x1e7   : > { %v940_v52 = vadd.f32 %v4926_v41, %v4509_v36  ;;  %v806_v57 = vpop.f32.mrb[1].mxu0 }
 0x1e8   : > { %v938_v60 = vadd.f32 %v4509_v36, %v806_v57  ;;  %v4927_v61 = vpop.f32.mrb[2].mxu0 }
 0x1e9   : > { %v941_v0 = vadd.f32 %v4927_v61, %v4509_v36  ;;  %v809_v31 = vpop.f32.mrb[3].mxu0  ;;  %v956_v29 = vmax.f32 %v940_v52, 0.0 }
 0x1ea   : > { %v939_v26 = vadd.f32 %v4509_v36, %v809_v31  ;;  %v954_v46 = vmax.f32 %v938_v60, 0.0 }
 0x1eb   : > { %v957_v44 = vmax.f32 %v941_v0, 0.0 }
 0x1ec   : > { %v955_v47 = vmax.f32 %v939_v26, 0.0 }
 0x1ed   : > { %v979_v48 = vpack.c.bf16 %v957_v44, %v956_v29  ;;  %v4510_v29 = vld [vmem:[%s7260_s2 + $0x6] ss:$0 sm:$0xff] }
 0x1ee   : > { %v4930_v53 = vpop.f32.mrb[4].mxu0  ;;  %v978_v54 = vpack.c.bf16 %v955_v47, %v954_v46 }
 0x1ef   : > { %v944_v56 = vadd.f32 %v4930_v53, %v4509_v36  ;;  %v822_v59 = vpop.f32.mrb[5].mxu0 }
 0x1f0   : > { %v942_v62 = vadd.f32 %v4509_v36, %v822_v59  ;;  %v4931_v63 = vpop.f32.mrb[6].mxu0  ;;  %4964 = vmatprep.mubr.msk.bf16.mxu1 %vm1015_vm0, %v978_v54 }
 0x1f1   : > { %v945_v1 = vadd.f32 %v4931_v63, %v4509_v36  ;;  %v825_v2 = vpop.f32.mrb[7].mxu0  ;;  %4965 = vmatmul.mubr.msk.bf16.vlgmr.msra.gmra.mrb[0].mxu1 %vm1015_vm0, %v979_v48  ;;  %v960_v4 = vmax.f32 %v944_v56, 0.0 }
 0x1f2   : > { %v943_v3 = vadd.f32 %v4509_v36, %v825_v2  ;;  %v958_v6 = vmax.f32 %v942_v62, 0.0 }
 0x1f3   : > { %v961_v5 = vmax.f32 %v945_v1, 0.0 }
 0x1f4   : > { %v959_v7 = vmax.f32 %v943_v3, 0.0 }
 0x1f5   : > { %v981_v8 = vpack.c.bf16 %v961_v5, %v960_v4 }
 0x1f6   : > { %v980_v9 = vpack.c.bf16 %v959_v7, %v958_v6 }
 0x1f8   : > { %4968 = vmatprep.mubr.msk.bf16.mxu1 %vm1015_vm0, %v980_v9 }
 0x1f9   : > { %4969 = vmatmul.mubr.msk.bf16.gmra.mrb[4].mxu1 %vm1015_vm0, %v981_v8 }
 0x20e   : > { %v4934_v10 = vpop.f32.mrb[8].mxu0 }
 0x20f   : > { %v948_v11 = vadd.f32 %v4934_v10, %v4509_v36  ;;  %v838_v12 = vpop.f32.mrb[9].mxu0 }
 0x210   : > { %v946_v14 = vadd.f32 %v4509_v36, %v838_v12  ;;  %v4935_v15 = vpop.f32.mrb[10].mxu0 }
 0x211   : > { %v949_v49 = vadd.f32 %v4935_v15, %v4509_v36  ;;  %v841_v17 = vpop.f32.mrb[11].mxu0  ;;  %v964_v19 = vmax.f32 %v948_v11, 0.0 }
 0x212   : > { %v947_v18 = vadd.f32 %v4509_v36, %v841_v17  ;;  %v962_v22 = vmax.f32 %v946_v14, 0.0 }
 0x213   : > { %v965_v20 = vmax.f32 %v949_v49, 0.0 }
 0x214   : > { %v963_v43 = vmax.f32 %v947_v18, 0.0 }
 0x215   : > { %v983_v55 = vpack.c.bf16 %v965_v20, %v964_v19 }
 0x216   : > { %v982_v23 = vpack.c.bf16 %v963_v43, %v962_v22 }
 0x218   : > { %4972 = vmatprep.mubr.msk.bf16.mxu1 %vm1015_vm0, %v982_v23  ;;  %v5392_v23 = vld [vmem:[#allocation2] sm:$0xff]  }
 0x219   : > { %4973 = vmatmul.mubr.msk.bf16.gmra.mrb[8].mxu1 %vm1015_vm0, %v983_v55  ;;  %4980 = vmatprep.subr.bf16.mxu1 %v5392_v23 }
 0x21a   : > { %4981 = vmatpush3.bf16.msra.mxu1 %v5392_v23 }
 0x22d   : > { %v4938_v24 = vpop.f32.mrb[12].mxu0 }
 0x22e   : > { %v952_v25 = vadd.f32 %v4938_v24, %v4509_v36  ;;  %v854_v27 = vpop.f32.mrb[13].mxu0  ;;  %v5393_v24 = vld [vmem:[#allocation2 + $0x8] sm:$0xff]  }
 0x22f   : > { %v950_v28 = vadd.f32 %v4509_v36, %v854_v27  ;;  %v4939_v32 = vpop.f32.mrb[14].mxu0  ;;  %4982 = vmatprep.subr.bf16.mxu1 %v5393_v24  ;;  %v5395_v27 = vld [vmem:[#allocation2 + $0x18] sm:$0xff]  }
 0x230   : > { %v953_v34 = vadd.f32 %v4939_v32, %v4509_v36  ;;  %v857_v33 = vpop.f32.mrb[15].mxu0  ;;  %v968_v37 = vmax.f32 %v952_v25, 0.0  ;;  %4983 = vmatpush3.bf16.msra.mxu1 %v5393_v24  ;;  %v5394_v25 = vld [vmem:[#allocation2 + $0x10] sm:$0xff]  }
 0x231   : > { %v951_v35 = vadd.f32 %v4509_v36, %v857_v33  ;;  %v966_v38 = vmax.f32 %v950_v28, 0.0  ;;  %4984 = vmatprep.subr.bf16.mxu1 %v5394_v25 }
 0x232   : > { %v969_v45 = vmax.f32 %v953_v34, 0.0 }
 0x233   : > { %v967_v39 = vmax.f32 %v951_v35, 0.0 }
 0x234   : > { %v985_v40 = vpack.c.bf16 %v969_v45, %v968_v37  ;;  %4985 = vmatpush3.bf16.msra.mxu1 %v5394_v25 }
 0x235   : > { %v984_v42 = vpack.c.bf16 %v967_v39, %v966_v38  ;;  %v5995_v51 = vpop.f32.mrb[16].mxu0  ;;  %4986 = vmatprep.subr.bf16.mxu1 %v5395_v27 }
 0x236   : > { %v5997_v50 = vpop.f32.mrb[17].mxu0 }
 0x237   : > { %v5999_v58 = vpop.f32.mrb[18].mxu0  ;;  %4976 = vmatprep.mubr.msk.bf16.mxu1 %vm1015_vm0, %v984_v42 }
 0x238   : > { %v6002_v13 = vpop.f32.mrb[19].mxu0  ;;  %4977 = vmatmul.mubr.msk.bf16.gmra.mrb[12].mxu1 %vm1015_vm0, %v985_v40 }
 0x239   : > { %4987 = vmatpush3.bf16.msra.mxu1 %v5395_v27 }
 0x23d   : > { %v6005_v16 = vpop.f32.mrb[20].mxu0 }
 0x23e   : > { %v6007_v21 = vpop.f32.mrb[21].mxu0 }
 0x23f   : > { %v6009_v30 = vpop.f32.mrb[22].mxu0 }
 0x240   : > { %v6011_v36 = vpop.f32.mrb[23].mxu0 }
 0x245   : > { %v6013_v41 = vpop.f32.mrb[24].mxu0 }
 0x246   : > { %v6015_v52 = vpop.f32.mrb[25].mxu0 }
 0x247   : > { %v6017_v57 = vpop.f32.mrb[26].mxu0 }
 0x248   : > { %v6019_v60 = vpop.f32.mrb[27].mxu0 }
 0x24d   : > { %v6021_v61 = vpop.f32.mrb[28].mxu0 }
 0x24e   : > { %v6023_v0 = vpop.f32.mrb[29].mxu0 }
 0x24f   : > { %v6025_v31 = vpop.f32.mrb[30].mxu0 }
 0x250   : > { %v6027_v26 = vpop.f32.mrb[31].mxu0 }
 0x2c4   : > { %v4966_v44 = vpop.f32.mrb[0].mxu1 }
 0x2c5   : > { %v1083_v46 = vadd.f32 %v4966_v44, %v4510_v29  ;;  %v1074_v47 = vpop.f32.mrb[1].mxu1 }
 0x2c6   : > { %v4967_v48 = vpop.f32.mrb[2].mxu1  ;;  %v1075_v56 = vadd.f32 %v4510_v29, %v1074_v47 }
 0x2c7   : > { %v1086_v53 = vadd.f32 %v4967_v48, %v4510_v29  ;;  %1157 = vrot.lane.b32.xlu1 %v1083_v46, %s5579_s18  ;;  %v1077_v54 = vpop.f32.mrb[3].mxu1  ;;  %v5580_v48 = vmov 0.0  }
 0x2c8   : > { %v1078_v59 = vadd.f32 %v4510_v29, %v1077_v54  ;;  %5020 = vmatprep.subr.bf16.mxu0 %v5580_v48  ;;  %5028 = vmatprep.mubr.msk.bf16.mxu0 %vm5581_vm2, %v5580_v48 }
 0x2c9   : > { %1159 = vrot.lane.b32.xlu0 %v1086_v53, %s5579_s18 }
 0x2cb   : > { %1153 = vrot.lane.b32.xlu1 %v1075_v56, %s5579_s18 }
 0x2cc   : > { %v4970_v62 = vpop.f32.mrb[4].mxu1 }
 0x2cd   : > { %v1099_v63 = vadd.f32 %v4970_v62, %v4510_v29  ;;  %1155 = vrot.lane.b32.xlu0 %v1078_v59, %s5579_s18  ;;  %v1090_v1 = vpop.f32.mrb[5].mxu1 }
 0x2ce   : > { %v4971_v2 = vpop.f32.mrb[6].mxu1  ;;  %v1091_v5 = vadd.f32 %v4510_v29, %v1090_v1 }
 0x2cf   : > { %v1102_v3 = vadd.f32 %v4971_v2, %v4510_v29  ;;  %1165 = vrot.lane.b32.xlu1 %v1099_v63, %s5579_s18  ;;  %v1093_v4 = vpop.f32.mrb[7].mxu1 }
 0x2d0   : > { %v1094_v6 = vadd.f32 %v4510_v29, %v1093_v4 }
 0x2d1   : > { %1167 = vrot.lane.b32.xlu0 %v1102_v3, %s5579_s18 }
 0x2d3   : > { %1161 = vrot.lane.b32.xlu1 %v1091_v5, %s5579_s18 }
 0x2d5   : > { %1163 = vrot.lane.b32.xlu0 %v1094_v6, %s5579_s18 }
 0x2ec   : > { %v4974_v7 = vpop.f32.mrb[8].mxu1 }
 0x2ed   : > { %v1115_v8 = vadd.f32 %v4974_v7, %v4510_v29  ;;  %v1106_v9 = vpop.f32.mrb[9].mxu1 }
 0x2ee   : > { %v4975_v10 = vpop.f32.mrb[10].mxu1  ;;  %v1107_v14 = vadd.f32 %v4510_v29, %v1106_v9 }
 0x2ef   : > { %v1118_v11 = vadd.f32 %v4975_v10, %v4510_v29  ;;  %1173 = vrot.lane.b32.xlu1 %v1115_v8, %s5579_s18  ;;  %v1109_v12 = vpop.f32.mrb[11].mxu1 }
 0x2f0   : > { %v1110_v15 = vadd.f32 %v4510_v29, %v1109_v12 }
 0x2f1   : > { %1175 = vrot.lane.b32.xlu0 %v1118_v11, %s5579_s18 }
 0x2f3   : > { %1169 = vrot.lane.b32.xlu1 %v1107_v14, %s5579_s18 }
 0x2f5   : > { %1171 = vrot.lane.b32.xlu0 %v1110_v15, %s5579_s18 }
 0x30b   : > { %v4978_v49 = vpop.f32.mrb[12].mxu1 }
 0x30c   : > { %v1122_v17 = vpop.f32.mrb[13].mxu1  ;;  %v1131_v43 = vadd.f32 %v4978_v49, %v4510_v29 }
 0x30d   : > { %v1123_v18 = vadd.f32 %v4510_v29, %v1122_v17  ;;  %v4979_v19 = vpop.f32.mrb[14].mxu1 }
 0x30e   : > { %v1125_v20 = vpop.f32.mrb[15].mxu1  ;;  %v1134_v55 = vadd.f32 %v4979_v19, %v4510_v29 }
 0x30f   : > { %v1126_v22 = vadd.f32 %v4510_v29, %v1125_v20  ;;  %1177 = vrot.lane.b32.xlu1 %v1123_v18, %s5579_s18 }
 0x311   : > { %1179 = vrot.lane.b32.xlu0 %v1126_v22, %s5579_s18  ;;  %v5398_v22 = vld [vmem:[#allocation5 + $0x10] sm:$0xff]  }
 0x313   : > { %1181 = vrot.lane.b32.xlu1 %v1131_v43, %s5579_s18 }
 0x315   : > { %1183 = vrot.lane.b32.xlu0 %v1134_v55, %s5579_s18 }
 0x339   : > { %v1158_v28 = vpop.permute.xlu1 %1157 }
 0x33a   : > { %v6049_v32 = vadd.f32 %v5995_v51, %v1158_v28 }
 0x33b   : > { %v1160_v34 = vpop.permute.xlu0 %1159 }
 0x33c   : > { %v6052_v33 = vadd.f32 %v5999_v58, %v1160_v34  ;;  %v1257_v45 = vmax.f32 %v6049_v32, 0.0  ;;  %v5396_v58 = vld [vmem:[#allocation5] sm:$0xff]   ;;  %v1220_v53 = vsel %vm1217_vm1, %v6049_v32, -inf }
 0x33d   : > { %v1154_v35 = vpop.permute.xlu1 %1153  ;;  %5021 = vmatpush3.bf16.msra.mxu0 %v5396_v58 }
 0x33e   : > { %v6055_v37 = vadd.f32 %v1154_v35, %v5997_v50  ;;  %v1258_v38 = vmax.f32 %v6052_v33, 0.0  ;;  %v1288_v39 = vpack.c.bf16 %v6052_v33, %v6049_v32  ;;  %5022 = vmatprep.subr.bf16.mxu0 %v5580_v48  ;;  %v1221_v59 = vsel %vm1217_vm1, %v6052_v33, -inf  ;;  %v5400_v33 = vld [vmem:[%s7264_s6 + $0x20] sm:$0xff]  }
 0x33f   : > { %v1156_v40 = vpop.permute.xlu0 %1155 }
 0x340   : > { %v6062_v42 = vadd.f32 %v1156_v40, %v6002_v13  ;;  %v1280_v51 = vpack.c.bf16 %v1258_v38, %v1257_v45  ;;  %v1255_v50 = vmax.f32 %v6055_v37, 0.0  ;;  %v1218_v7 = vsel %vm1217_vm1, %v6055_v37, -inf }
 0x341   : > { %v1166_v29 = vpop.permute.xlu1 %1165 }
 0x342   : > { %v6065_v44 = vadd.f32 %v6005_v16, %v1166_v29  ;;  %1313 = vrot.lane.b32.xlu0 %v1280_v51, %s5579_s18  ;;  %v1256_v46 = vmax.f32 %v6062_v42, 0.0  ;;  %v1287_v47 = vpack.c.bf16 %v6062_v42, %v6055_v37  ;;  %v1219_v10 = vsel %vm1217_vm1, %v6062_v42, -inf }
 0x343   : > { %v1168_v13 = vpop.permute.xlu0 %1167 }
 0x344   : > { %v1226_v16 = vsel %vm1217_vm1, %v6065_v44, -inf  ;;  %v6078_v54 = vadd.f32 %v6009_v30, %v1168_v13  ;;  %v1279_v56 = vpack.c.bf16 %v1256_v46, %v1255_v50  ;;  %v1261_v1 = vmax.f32 %v6065_v44, 0.0 }
 0x345   : > { %v1227_v62 = vmax.f32 %v1220_v53, %v1226_v16  ;;  %v1162_v63 = vpop.permute.xlu1 %1161 }
 0x346   : > { %v1228_v2 = vsel %vm1217_vm1, %v6078_v54, -inf  ;;  %v6087_v3 = vadd.f32 %v1162_v63, %v6007_v21  ;;  %1311 = vrot.lane.b32.xlu1 %v1279_v56, %s5579_s18  ;;  %v1262_v30 = vmax.f32 %v6078_v54, 0.0  ;;  %v1290_v4 = vpack.c.bf16 %v6078_v54, %v6065_v44 }
 0x347   : > { %v1229_v5 = vmax.f32 %v1221_v59, %v1228_v2  ;;  %v1164_v6 = vpop.permute.xlu0 %1163 }
 0x348   : > { %v1222_v8 = vsel %vm1217_vm1, %v6087_v3, -inf  ;;  %v6098_v9 = vadd.f32 %v1164_v6, %v6011_v36  ;;  %v6100_v21 = vpack.c.bf16 %v1262_v30, %v1261_v1  ;;  %v1259_v14 = vmax.f32 %v6087_v3, 0.0  ;;  %v5397_v36 = vld [vmem:[#allocation5 + $0x8] sm:$0xff]  }
 0x349   : > { %v1223_v11 = vmax.f32 %v1218_v7, %v1222_v8  ;;  %5023 = vmatpush3.bf16.msra.mxu0 %v5397_v36 }
 0x34a   : > { %v1224_v12 = vsel %vm1217_vm1, %v6098_v9, -inf  ;;  %v1260_v15 = vmax.f32 %v6098_v9, 0.0  ;;  %v1289_v49 = vpack.c.bf16 %v6098_v9, %v6087_v3  ;;  %5024 = vmatprep.subr.bf16.mxu0 %v5580_v48 }
 0x34b   : > { %v1225_v17 = vmax.f32 %v1219_v10, %v1224_v12 }
 0x34c   : > { %v1281_v18 = vpack.c.bf16 %v1260_v15, %v1259_v14 }
 0x34d   : > { %5025 = vmatpush3.bf16.msra.mxu0 %v5398_v22 }
 0x34e   : > { %1315 = vrot.lane.b32.xlu0 %v1281_v18, %s5579_s18  ;;  %5026 = vmatprep.subr.bf16.mxu0 %v5580_v48 }
 0x361   : > { %v1174_v19 = vpop.permute.xlu1 %1173 }
 0x362   : > { %v6112_v20 = vadd.f32 %v6013_v41, %v1174_v19 }
 0x363   : > { %v1176_v43 = vpop.permute.xlu0 %1175 }
 0x364   : > { %v1234_v55 = vsel %vm1217_vm1, %v6112_v20, -inf  ;;  %v6118_v23 = vadd.f32 %v6017_v57, %v1176_v43  ;;  %v1265_v27 = vmax.f32 %v6112_v20, 0.0 }
 0x365   : > { %v1235_v24 = vmax.f32 %v1227_v62, %v1234_v55  ;;  %v1170_v25 = vpop.permute.xlu1 %1169 }
 0x366   : > { %v1236_v28 = vsel %vm1217_vm1, %v6118_v23, -inf  ;;  %v1209_v41 = vadd.f32 %v1170_v25, %v6015_v52  ;;  %v1266_v34 = vmax.f32 %v6118_v23, 0.0  ;;  %v1292_v35 = vpack.c.bf16 %v6118_v23, %v6112_v20 }
 0x367   : > { %v1237_v45 = vmax.f32 %v1229_v5, %v1236_v28  ;;  %v1172_v38 = vpop.permute.xlu0 %1171 }
 0x368   : > { %v1230_v57 = vsel %vm1217_vm1, %v1209_v41, -inf  ;;  %v1210_v40 = vadd.f32 %v1172_v38, %v6019_v60  ;;  %v1284_v51 = vpack.c.bf16 %v1266_v34, %v1265_v27  ;;  %v1263_v50 = vmax.f32 %v1209_v41, 0.0  ;;  %v5399_v60 = vld [vmem:[#allocation5 + $0x18] sm:$0xff]  }
 0x369   : > { %v1231_v29 = vmax.f32 %v1223_v11, %v1230_v57  ;;  %5027 = vmatpush3.bf16.msra.mxu0 %v5399_v60 }
 0x36a   : > { %v1232_v58 = vsel %vm1217_vm1, %v1210_v40, -inf  ;;  %v1264_v52 = vmax.f32 %v1210_v40, 0.0  ;;  %v1291_v46 = vpack.c.bf16 %v1210_v40, %v1209_v41  ;;  %5032 = vmatprep.subr.bf16.mxu0 %v5400_v33 }
 0x36b   : > { %v1233_v13 = vmax.f32 %v1225_v17, %v1232_v58  ;;  %v5403_v58 = vld [vmem:[%s7264_s6 + $0x38] sm:$0xff]  }
 0x36c   : > { %v1283_v53 = vpack.c.bf16 %v1264_v52, %v1263_v50 }
 0x36e   : > { %1319 = vrot.lane.b32.xlu0 %v1283_v53, %s5579_s18  ;;  %v1679_v53 = vlaneseq }
 0x381   : > { %v1178_v16 = vpop.permute.xlu1 %1177 }
 0x382   : > { %v1213_v56 = vadd.f32 %v1178_v16, %v6023_v0  ;;  %v6202_v16 = vshrl.u32 %v1679_v53, 7 }
 0x383   : > { %v1180_v59 = vpop.permute.xlu0 %1179 }
 0x384   : > { %v1238_v62 = vsel %vm1217_vm1, %v1213_v56, -inf  ;;  %v1214_v63 = vadd.f32 %v1180_v59, %v6027_v26  ;;  %v1267_v30 = vmax.f32 %v1213_v56, 0.0  ;;  %v6210_v59 = vsub.s32 0, %v6202_v16 }
 0x385   : > { %v1239_v1 = vmax.f32 %v1231_v29, %v1238_v62  ;;  %v1182_v2 = vpop.permute.xlu1 %1181  ;;  %v5402_v29 = vld [vmem:[%s7264_s6 + $0x30] sm:$0xff]  }
 0x386   : > { %v1240_v5 = vsel %vm1217_vm1, %v1214_v63, -inf  ;;  %v1215_v6 = vadd.f32 %v6021_v61, %v1182_v2  ;;  %v1268_v7 = vmax.f32 %v1214_v63, 0.0  ;;  %v1293_v8 = vpack.c.bf16 %v1214_v63, %v1213_v56  ;;  %v6207_v56 = vld [vmem:[%s7260_s2 + $0x2] ss:$0 sm:$0xff] }
 0x387   : > { %v1241_v10 = vmax.f32 %v1233_v13, %v1240_v5  ;;  %v1184_v11 = vpop.permute.xlu0 %1183 }
 0x388   : > { %v1242_v0 = vsel %vm1217_vm1, %v1215_v6, -inf  ;;  %v1216_v12 = vadd.f32 %v6025_v31, %v1184_v11  ;;  %v1285_v14 = vpack.c.bf16 %v1268_v7, %v1267_v30  ;;  %v1269_v18 = vmax.f32 %v1215_v6, 0.0 }
 0x389   : > { %v1246_v15 = vmax.f32 %v1239_v1, %v1241_v10  ;;  %v1243_v26 = vmax.f32 %v1235_v24, %v1242_v0 }
 0x38a   : > { %v1244_v17 = vsel %vm1217_vm1, %v1216_v12, -inf  ;;  %1323 = vrot.lane.b32.xlu0 %v1285_v14, %s5579_s18  ;;  %v1270_v36 = vmax.f32 %v1216_v12, 0.0  ;;  %v1294_v19 = vpack.c.bf16 %v1216_v12, %v1215_v6 }
 0x38b   : > { %v1245_v61 = vmax.f32 %v1237_v45, %v1244_v17 }
 0x38c   : > { %v1286_v22 = vpack.c.bf16 %v1270_v36, %v1269_v18 }
 0x38d   : > { %v1247_v43 = vmax.f32 %v1243_v26, %v1245_v61 }
 0x38e   : > { %1327 = vrot.lane.b32.xlu0 %v1287_v47, %s5579_s18 }
 0x38f   : > { %v1248_v31 = vmax.f32 %v1246_v15, %v1247_v43 }
 0x391   : > { %v1249_v55 = vrot.slane %v1248_v31, 4 }
 0x392   : > { %1331 = vrot.lane.b32.xlu0 %v1289_v49, %s5579_s18 }
 0x393   : > { %v1250_v24 = vmax.f32 %v1248_v31, %v1249_v55 }
 0x395   : > { %v1251_v25 = vrot.slane %v1250_v24, 2 }
 0x396   : > { %1335 = vrot.lane.b32.xlu0 %v1291_v46, %s5579_s18 }
 0x397   : > { %v1252_v27 = vmax.f32 %v1250_v24, %v1251_v25 }
 0x399   : > { %v1253_v28 = vrot.slane %v1252_v27, 1 }
 0x39a   : > { %1339 = vrot.lane.b32.xlu0 %v1293_v8, %s5579_s18 }
 0x39b   : > { %v1254_v41 = vmax.f32 %v1252_v27, %v1253_v28 }
 0x39d   : > { %v1576_v34 = vmax.f32 %v1254_v41, 0.0 }
 0x39f   : > { %v1578_v37 = vsel %vm1577_vm3, %v1576_v34, %v1254_v41 }
 0x3a0   : > { %v1587_v42 = vpack.c.bf16 %v1578_v37, %v1578_v37 }
 0x3a2   : > { %1589 = vrot.lane.b32.xlu1 %v1587_v42, %s5579_s18 }
 0x3a6   : > { %1317 = vrot.lane.b32.xlu1 %v6100_v21, %s5579_s18 }
 0x3aa   : > { %1321 = vrot.lane.b32.xlu1 %v1284_v51, %s5579_s18 }
 0x3ae   : > { %1325 = vrot.lane.b32.xlu1 %v1286_v22, %s5579_s18 }
 0x3b2   : > { %1329 = vrot.lane.b32.xlu1 %v1288_v39, %s5579_s18  ;;  %v5401_v39 = vld [vmem:[%s7264_s6 + $0x28] sm:$0xff]  }
 0x3b4   : > { %v1314_v3 = vpop.permute.xlu0 %1313 }
 0x3b6   : > { %1333 = vrot.lane.b32.xlu1 %v1290_v4, %s5579_s18 }
 0x3b8   : > { %v1312_v47 = vpop.permute.xlu1 %1311 }
 0x3b9   : > { %4988 = vmatprep.mubr.msk.bf16.mxu1 %vm1015_vm0, %v1312_v47 }
 0x3ba   : > { %1337 = vrot.lane.b32.xlu1 %v1292_v35, %s5579_s18  ;;  %4989 = vmatmul.mubr.msk.bf16.vlgmr.msra.gmra.mrb[16].mxu1 %vm1015_vm0, %v1314_v3 }
 0x3be   : > { %1341 = vrot.lane.b32.xlu1 %v1294_v19, %s5579_s18 }
 0x3c0   : > { %v1316_v32 = vpop.permute.xlu0 %1315 }
 0x3c1   : > { %4992 = vmatprep.mubr.msk.bf16.mxu1 %vm1015_vm0, %v1316_v32 }
 0x3e0   : > { %v1320_v4 = vpop.permute.xlu0 %1319 }
 0x3fc   : > { %v1324_v21 = vpop.permute.xlu0 %1323 }
 0x400   : > { %v1328_v20 = vpop.permute.xlu0 %1327 }
 0x404   : > { %v1332_v35 = vpop.permute.xlu0 %1331 }
 0x408   : > { %v1336_v38 = vpop.permute.xlu0 %1335 }
 0x40c   : > { %v1340_v40 = vpop.permute.xlu0 %1339 }
 0x414   : > { %v1590_v44 = vpop.permute.xlu1 %1589 }
 0x415   : > { %5029 = vmatmul.mubr.msk.bf16.vlgmr.msra.gmra.mrb[32].mxu0 %vm1015_vm0, %v1590_v44 }
 0x416   : > { %5033 = vmatpush3.bf16.msra.mxu0 %v5400_v33 }
 0x417   : > { %5034 = vmatprep.subr.bf16.mxu0 %v5401_v39 }
 0x418   : > { %v1318_v54 = vpop.permute.xlu1 %1317 }
 0x419   : > { %4993 = vmatmul.mubr.msk.bf16.gmra.mrb[20].mxu1 %vm1015_vm0, %v1318_v54 }
 0x41a   : > { %4996 = vmatprep.mubr.msk.bf16.mxu1 %vm1015_vm0, %v1320_v4  ;;  %5035 = vmatpush3.bf16.msra.mxu0 %v5401_v39 }
 0x41b   : > { %5036 = vmatprep.subr.bf16.mxu0 %v5402_v29 }
 0x41c   : > { %v1322_v9 = vpop.permute.xlu1 %1321 }
 0x41e   : > { %5037 = vmatpush3.bf16.msra.mxu0 %v5402_v29 }
 0x41f   : > { %5038 = vmatprep.subr.bf16.mxu0 %v5403_v58 }
 0x420   : > { %v1326_v49 = vpop.permute.xlu1 %1325 }
 0x421   : > { %4997 = vmatmul.mubr.msk.bf16.gmra.mrb[24].mxu1 %vm1015_vm0, %v1322_v9 }
 0x422   : > { %5000 = vmatprep.mubr.msk.bf16.mxu1 %vm1015_vm0, %v1324_v21  ;;  %5039 = vmatpush3.bf16.msra.mxu0 %v5403_v58 }
 0x423   : > { %5096 = vmatprep.subr.bf16.mxu0 %v5580_v48 }
 0x424   : > { %v1330_v23 = vpop.permute.xlu1 %1329 }
 0x428   : > { %v1334_v45 = vpop.permute.xlu1 %1333 }
 0x429   : > { %5001 = vmatmul.mubr.msk.bf16.gmra.mrb[28].mxu1 %vm1015_vm0, %v1326_v49 }
 0x42a   : > { %5004 = vmatprep.mubr.msk.bf16.mxu1 %vm1015_vm0, %v1328_v20 }
 0x42c   : > { %v1338_v57 = vpop.permute.xlu1 %1337 }
 0x430   : > { %v1342_v51 = vpop.permute.xlu1 %1341 }
 0x431   : > { %5005 = vmatmul.mubr.msk.bf16.gmra.mrb[32].mxu1 %vm1015_vm0, %v1330_v23 }
 0x432   : > { %5008 = vmatprep.mubr.msk.bf16.mxu1 %vm1015_vm0, %v1332_v35 }
 0x439   : > { %5009 = vmatmul.mubr.msk.bf16.gmra.mrb[36].mxu1 %vm1015_vm0, %v1334_v45 }
 0x43a   : > { %5012 = vmatprep.mubr.msk.bf16.mxu1 %vm1015_vm0, %v1336_v38 }
 0x441   : > { %5013 = vmatmul.mubr.msk.bf16.gmra.mrb[40].mxu1 %vm1015_vm0, %v1338_v57 }
 0x442   : > { %5016 = vmatprep.mubr.msk.bf16.mxu1 %vm1015_vm0, %v1340_v40 }
 0x449   : > { %5017 = vmatmul.mubr.msk.bf16.gmra.mrb[44].mxu1 %vm1015_vm0, %v1342_v51 }
 0x48d   : > { %v4990_v50 = vpop.f32.mrb[16].mxu1 }
 0x48e   : > { %v1449_v52 = vpop.f32.mrb[17].mxu1  ;;  %v1665_v62 = vadd.f32 %v4990_v50, %v6207_v56 }
 0x48f   : > { %v4991_v46 = vpop.f32.mrb[18].mxu1  ;;  %v1663_v60 = vadd.f32 %v6207_v56, %v1449_v52 }
 0x490   : > { %v1452_v13 = vpop.f32.mrb[19].mxu1  ;;  %v1666_v1 = vadd.f32 %v4991_v46, %v6207_v56 }
 0x491   : > { %v1664_v2 = vadd.f32 %v6207_v56, %v1452_v13 }
 0x4e8   : > { %v6213_v63 = vpop.f32.mrb[32].mxu0 }
 0x4e9   : > { %v6220_v30 = vrot.slane %v6213_v63, %v6210_v59  ;;  %v5030_v5 = vpop.f32.mrb[33].mxu0 }
 0x4ea   : > { %v1655_v6 = vpop.f32.mrb[34].mxu0 }
 0x4eb   : > { %v5031_v7 = vpop.f32.mrb[35].mxu0  ;;  %v1683_v8 = vadd.f32 %v6220_v30, %v1663_v60  ;;  %v1684_v10 = vadd.f32 %v6220_v30, %v1664_v2  ;;  %v1685_v11 = vadd.f32 %v6220_v30, %v1665_v62  ;;  %v1686_v0 = vadd.f32 %v6220_v30, %v1666_v1 }
 0x4ec   : > { %v4994_v12 = vpop.f32.mrb[20].mxu1 }
 0x4ed   : > { %v1669_v14 = vadd.f32 %v4994_v12, %v6207_v56  ;;  %v1465_v15 = vpop.f32.mrb[21].mxu1  ;;  %v1699_v26 = vmax.f32 %v1683_v8, 0.0  ;;  %v1700_v17 = vmax.f32 %v1684_v10, 0.0  ;;  %v1701_v18 = vmax.f32 %v1685_v11, 0.0 }
 0x4ee   : > { %v1667_v36 = vadd.f32 %v6207_v56, %v1465_v15  ;;  %v4995_v19 = vpop.f32.mrb[22].mxu1  ;;  %v1702_v61 = vmax.f32 %v1686_v0, 0.0 }
 0x4ef   : > { %v1689_v22 = vadd.f32 %v6220_v30, %v1669_v14  ;;  %v1670_v43 = vadd.f32 %v4995_v19, %v6207_v56  ;;  %v1468_v31 = vpop.f32.mrb[23].mxu1  ;;  %v1724_v55 = vpack.c.bf16 %v1700_v17, %v1699_v26 }
 0x4f0   : > { %v1687_v24 = vadd.f32 %v6220_v30, %v1667_v36  ;;  %v1668_v25 = vadd.f32 %v6207_v56, %v1468_v31  ;;  %v1725_v27 = vpack.c.bf16 %v1702_v61, %v1701_v18 }
 0x4f1   : > { %v1690_v28 = vadd.f32 %v6220_v30, %v1670_v43  ;;  %5040 = vmatprep.mubr.msk.bf16.mxu0 %vm1015_vm0, %v1724_v55  ;;  %v1705_v34 = vmax.f32 %v1689_v22, 0.0 }
 0x4f2   : > { %v1688_v41 = vadd.f32 %v6220_v30, %v1668_v25  ;;  %5041 = vmatmul.mubr.msk.bf16.vlgmr.msra.gmra.mrb[36].mxu0 %vm1015_vm0, %v1725_v27  ;;  %v1703_v42 = vmax.f32 %v1687_v24, 0.0 }
 0x4f3   : > { %v1706_v37 = vmax.f32 %v1690_v28, 0.0  ;;  %v4557_v28 = vld [vmem:[%s7260_s2 + $0x7] ss:$0 sm:$0xff] }
 0x4f4   : > { %v1704_v47 = vmax.f32 %v1688_v41, 0.0  ;;  %v4998_v3 = vpop.f32.mrb[24].mxu1 }
 0x4f5   : > { %v1727_v32 = vpack.c.bf16 %v1706_v37, %v1705_v34  ;;  %v1673_v33 = vadd.f32 %v4998_v3, %v6207_v56  ;;  %v1481_v39 = vpop.f32.mrb[25].mxu1 }
 0x4f6   : > { %v1726_v44 = vpack.c.bf16 %v1704_v47, %v1703_v42  ;;  %v1671_v54 = vadd.f32 %v6207_v56, %v1481_v39  ;;  %v4999_v4 = vpop.f32.mrb[26].mxu1 }
 0x4f7   : > { %v1693_v9 = vadd.f32 %v6220_v30, %v1673_v33  ;;  %v1674_v21 = vadd.f32 %v4999_v4, %v6207_v56  ;;  %v1484_v49 = vpop.f32.mrb[27].mxu1 }
 0x4f8   : > { %v1691_v20 = vadd.f32 %v6220_v30, %v1671_v54  ;;  %v1672_v23 = vadd.f32 %v6207_v56, %v1484_v49  ;;  %5044 = vmatprep.mubr.msk.bf16.mxu0 %vm1015_vm0, %v1726_v44 }
 0x4f9   : > { %v1694_v35 = vadd.f32 %v6220_v30, %v1674_v21  ;;  %v1709_v38 = vmax.f32 %v1693_v9, 0.0 }
 0x4fa   : > { %v1692_v45 = vadd.f32 %v6220_v30, %v1672_v23  ;;  %5045 = vmatmul.mubr.msk.bf16.gmra.mrb[40].mxu0 %vm1015_vm0, %v1727_v32  ;;  %v1707_v40 = vmax.f32 %v1691_v20, 0.0 }
 0x4fb   : > { %v1710_v57 = vmax.f32 %v1694_v35, 0.0 }
 0x4fc   : > { %v1708_v51 = vmax.f32 %v1692_v45, 0.0  ;;  %v5002_v29 = vpop.f32.mrb[28].mxu1 }
 0x4fd   : > { %v1729_v58 = vpack.c.bf16 %v1710_v57, %v1709_v38  ;;  %v1677_v50 = vadd.f32 %v5002_v29, %v6207_v56  ;;  %v1497_v52 = vpop.f32.mrb[29].mxu1 }
 0x4fe   : > { %v1728_v46 = vpack.c.bf16 %v1708_v51, %v1707_v40  ;;  %v1675_v13 = vadd.f32 %v6207_v56, %v1497_v52  ;;  %v5003_v53 = vpop.f32.mrb[30].mxu1 }
 0x4ff   : > { %v1697_v62 = vadd.f32 %v6220_v30, %v1677_v50  ;;  %v1678_v60 = vadd.f32 %v5003_v53, %v6207_v56  ;;  %v1500_v1 = vpop.f32.mrb[31].mxu1 }
 0x500   : > { %v1695_v2 = vadd.f32 %v6220_v30, %v1675_v13  ;;  %v1676_v5 = vadd.f32 %v6207_v56, %v1500_v1  ;;  %5048 = vmatprep.mubr.msk.bf16.mxu0 %vm1015_vm0, %v1728_v46  ;;  %v5404_v1 = vld [vmem:[#allocation2 + $0x20] sm:$0xff]  }
 0x501   : > { %v1698_v6 = vadd.f32 %v6220_v30, %v1678_v60  ;;  %v1713_v8 = vmax.f32 %v1697_v62, 0.0  ;;  %5056 = vmatprep.subr.bf16.mxu1 %v5404_v1 }
 0x502   : > { %v1696_v7 = vadd.f32 %v6220_v30, %v1676_v5  ;;  %5049 = vmatmul.mubr.msk.bf16.gmra.mrb[44].mxu0 %vm1015_vm0, %v1729_v58  ;;  %v1711_v11 = vmax.f32 %v1695_v2, 0.0  ;;  %v5405_v2 = vld [vmem:[#allocation2 + $0x28] sm:$0xff]   ;;  %5057 = vmatpush3.bf16.msra.mxu1 %v5404_v1  ;;  %v5406_v5 = vld [vmem:[#allocation2 + $0x30] sm:$0xff]  }
 0x503   : > { %v1714_v10 = vmax.f32 %v1698_v6, 0.0  ;;  %5058 = vmatprep.subr.bf16.mxu1 %v5405_v2  ;;  %v6312_v6 = vsub.s32 1, %v6202_v16 }
 0x504   : > { %v1712_v0 = vmax.f32 %v1696_v7, 0.0  ;;  %v6256_v12 = vpop.f32.mrb[32].mxu1  ;;  %v5407_v7 = vld [vmem:[#allocation2 + $0x38] sm:$0xff]  }
 0x505   : > { %v1731_v14 = vpack.c.bf16 %v1714_v10, %v1713_v8  ;;  %v6258_v15 = vpop.f32.mrb[33].mxu1  ;;  %v6316_v10 = vrot.slane %v6213_v63, %v6312_v6 }
 0x506   : > { %v1730_v26 = vpack.c.bf16 %v1712_v0, %v1711_v11  ;;  %v6260_v17 = vpop.f32.mrb[34].mxu1  ;;  %5059 = vmatpush3.bf16.msra.mxu1 %v5405_v2 }
 0x507   : > { %v6262_v56 = vpop.f32.mrb[35].mxu1  ;;  %5060 = vmatprep.subr.bf16.mxu1 %v5406_v5 }
 0x508   : > { %5052 = vmatprep.mubr.msk.bf16.mxu0 %vm1015_vm0, %v1730_v26 }
 0x50a   : > { %5053 = vmatmul.mubr.msk.bf16.gmra.mrb[48].mxu0 %vm1015_vm0, %v1731_v14  ;;  %5061 = vmatpush3.bf16.msra.mxu1 %v5406_v5 }
 0x50b   : > { %5104 = vmatprep.mubr.msk.bf16.mxu0 %vm5581_vm2, %v5580_v48  ;;  %5062 = vmatprep.subr.bf16.mxu1 %v5407_v7 }
 0x50c   : > { %v6268_v30 = vpop.f32.mrb[36].mxu1 }
 0x50d   : > { %v6270_v18 = vpop.f32.mrb[37].mxu1 }
 0x50e   : > { %v6272_v36 = vpop.f32.mrb[38].mxu1  ;;  %5063 = vmatpush3.bf16.msra.mxu1 %v5407_v7 }
 0x50f   : > { %v6274_v19 = vpop.f32.mrb[39].mxu1 }
 0x514   : > { %v6276_v61 = vpop.f32.mrb[40].mxu1 }
 0x515   : > { %v6278_v22 = vpop.f32.mrb[41].mxu1 }
 0x516   : > { %v6280_v43 = vpop.f32.mrb[42].mxu1 }
 0x517   : > { %v6282_v31 = vpop.f32.mrb[43].mxu1 }
 0x51c   : > { %v6284_v55 = vpop.f32.mrb[44].mxu1 }
 0x51d   : > { %v6286_v24 = vpop.f32.mrb[45].mxu1 }
 0x51e   : > { %v6288_v25 = vpop.f32.mrb[46].mxu1 }
 0x51f   : > { %v6290_v27 = vpop.f32.mrb[47].mxu1 }
 0x5c5   : > { %v5042_v41 = vpop.f32.mrb[36].mxu0 }
 0x5c6   : > { %v1828_v34 = vadd.f32 %v5042_v41, %v4557_v28  ;;  %v1819_v37 = vpop.f32.mrb[37].mxu0 }
 0x5c7   : > { %v5043_v42 = vpop.f32.mrb[38].mxu0  ;;  %v1820_v32 = vadd.f32 %v4557_v28, %v1819_v37 }
 0x5c8   : > { %v1831_v47 = vadd.f32 %v5043_v42, %v4557_v28  ;;  %1902 = vrot.lane.b32.xlu0 %v1828_v34, %s5579_s18  ;;  %v1822_v3 = vpop.f32.mrb[39].mxu0 }
 0x5c9   : > { %v1823_v33 = vadd.f32 %v4557_v28, %v1822_v3 }
 0x5ca   : > { %1904 = vrot.lane.b32.xlu1 %v1831_v47, %s5579_s18 }
 0x5cc   : > { %1898 = vrot.lane.b32.xlu0 %v1820_v32, %s5579_s18 }
 0x5cd   : > { %v5046_v39 = vpop.f32.mrb[40].mxu0 }
 0x5ce   : > { %v1844_v44 = vadd.f32 %v5046_v39, %v4557_v28  ;;  %1900 = vrot.lane.b32.xlu1 %v1823_v33, %s5579_s18  ;;  %v1835_v54 = vpop.f32.mrb[41].mxu0  ;;  %v5408_v39 = vld [vmem:[#allocation5 + $0x20] sm:$0xff]  }
 0x5cf   : > { %v5047_v4 = vpop.f32.mrb[42].mxu0  ;;  %v1836_v49 = vadd.f32 %v4557_v28, %v1835_v54  ;;  %5097 = vmatpush3.bf16.msra.mxu0 %v5408_v39 }
 0x5d0   : > { %v1847_v9 = vadd.f32 %v5047_v4, %v4557_v28  ;;  %1910 = vrot.lane.b32.xlu0 %v1844_v44, %s5579_s18  ;;  %v1838_v21 = vpop.f32.mrb[43].mxu0  ;;  %5098 = vmatprep.subr.bf16.mxu0 %v5580_v48 }
 0x5d1   : > { %v1839_v20 = vadd.f32 %v4557_v28, %v1838_v21 }
 0x5d2   : > { %1912 = vrot.lane.b32.xlu1 %v1847_v9, %s5579_s18 }
 0x5d4   : > { %1906 = vrot.lane.b32.xlu0 %v1836_v49, %s5579_s18 }
 0x5d5   : > { %v5050_v23 = vpop.f32.mrb[44].mxu0 }
 0x5d6   : > { %v1860_v35 = vadd.f32 %v5050_v23, %v4557_v28  ;;  %1908 = vrot.lane.b32.xlu1 %v1839_v20, %s5579_s18  ;;  %v1851_v45 = vpop.f32.mrb[45].mxu0 }
 0x5d7   : > { %v5051_v38 = vpop.f32.mrb[46].mxu0  ;;  %v1852_v51 = vadd.f32 %v4557_v28, %v1851_v45 }
 0x5d8   : > { %v1863_v57 = vadd.f32 %v5051_v38, %v4557_v28  ;;  %1918 = vrot.lane.b32.xlu0 %v1860_v35, %s5579_s18  ;;  %v1854_v40 = vpop.f32.mrb[47].mxu0 }
 0x5d9   : > { %v1855_v29 = vadd.f32 %v4557_v28, %v1854_v40 }
 0x5da   : > { %1920 = vrot.lane.b32.xlu1 %v1863_v57, %s5579_s18 }
 0x5dc   : > { %1914 = vrot.lane.b32.xlu0 %v1852_v51, %s5579_s18 }
 0x5dd   : > { %v5054_v58 = vpop.f32.mrb[48].mxu0 }
 0x5de   : > { %1916 = vrot.lane.b32.xlu1 %v1855_v29, %s5579_s18  ;;  %v1867_v50 = vpop.f32.mrb[49].mxu0  ;;  %v1876_v62 = vadd.f32 %v5054_v58, %v4557_v28 }
 0x5df   : > { %v1868_v52 = vadd.f32 %v4557_v28, %v1867_v50  ;;  %v5055_v46 = vpop.f32.mrb[50].mxu0 }
 0x5e0   : > { %v1870_v13 = vpop.f32.mrb[51].mxu0  ;;  %v1879_v60 = vadd.f32 %v5055_v46, %v4557_v28 }
 0x5e1   : > { %v1871_v53 = vadd.f32 %v4557_v28, %v1870_v13  ;;  %1922 = vrot.lane.b32.xlu0 %v1868_v52, %s5579_s18 }
 0x5e3   : > { %1924 = vrot.lane.b32.xlu1 %v1871_v53, %s5579_s18 }
 0x5e5   : > { %1926 = vrot.lane.b32.xlu0 %v1876_v62, %s5579_s18 }
 0x5e7   : > { %1928 = vrot.lane.b32.xlu1 %v1879_v60, %s5579_s18 }
 0x63a   : > { %v1903_v8 = vpop.permute.xlu0 %1902 }
 0x63b   : > { %v1948_v11 = vadd.f32 %v6256_v12, %v1903_v8 }
 0x63c   : > { %v1905_v0 = vpop.permute.xlu1 %1904 }
 0x63d   : > { %v6320_v14 = vadd.f32 %v6316_v10, %v1948_v11  ;;  %v1949_v26 = vadd.f32 %v6260_v17, %v1905_v0 }
 0x63e   : > { %v1899_v28 = vpop.permute.xlu0 %1898 }
 0x63f   : > { %v6324_v16 = vadd.f32 %v6316_v10, %v1949_v26  ;;  %v1946_v41 = vadd.f32 %v1899_v28, %v6258_v15  ;;  %v2021_v37 = vmax.f32 %v6320_v14, 0.0  ;;  %v1984_v9 = vsel %vm1217_vm1, %v6320_v14, -inf }
 0x640   : > { %v1901_v34 = vpop.permute.xlu1 %1900 }
 0x641   : > { %v2022_v63 = vmax.f32 %v6324_v16, 0.0  ;;  %v6330_v42 = vadd.f32 %v6316_v10, %v1946_v41  ;;  %v1947_v12 = vadd.f32 %v1901_v34, %v6262_v56  ;;  %v2053_v17 = vpack.c.bf16 %v6324_v16, %v6320_v14 }
 0x642   : > { %v1911_v47 = vpop.permute.xlu0 %1910  ;;  %v1985_v35 = vsel %vm1217_vm1, %v6324_v16, -inf }
 0x643   : > { %v6336_v3 = vadd.f32 %v6316_v10, %v1947_v12  ;;  %v1952_v32 = vadd.f32 %v6268_v30, %v1911_v47  ;;  %v2045_v15 = vpack.c.bf16 %v2022_v63, %v2021_v37  ;;  %v2019_v56 = vmax.f32 %v6330_v42, 0.0 }
 0x644   : > { %v1913_v33 = vpop.permute.xlu1 %1912  ;;  %v1982_v46 = vsel %vm1217_vm1, %v6330_v42, -inf }
 0x645   : > { %v6340_v44 = vadd.f32 %v6316_v10, %v1952_v32  ;;  %v1953_v54 = vadd.f32 %v6272_v36, %v1913_v33  ;;  %2078 = vrot.lane.b32.xlu1 %v2045_v15, %s5579_s18  ;;  %v2020_v4 = vmax.f32 %v6336_v3, 0.0  ;;  %v2052_v30 = vpack.c.bf16 %v6336_v3, %v6330_v42  ;;  %v5409_v15 = vld [vmem:[#allocation5 + $0x28] sm:$0xff]  }
 0x646   : > { %v1907_v21 = vpop.permute.xlu0 %1906  ;;  %v1983_v62 = vsel %vm1217_vm1, %v6336_v3, -inf  ;;  %5099 = vmatpush3.bf16.msra.mxu0 %v5409_v15 }
 0x647   : > { %v1990_v49 = vsel %vm1217_vm1, %v6340_v44, -inf  ;;  %v6353_v20 = vadd.f32 %v6316_v10, %v1953_v54  ;;  %v1950_v36 = vadd.f32 %v1907_v21, %v6270_v18  ;;  %v2044_v23 = vpack.c.bf16 %v2020_v4, %v2019_v56  ;;  %5100 = vmatprep.subr.bf16.mxu0 %v5580_v48 }
 0x648   : > { %v1991_v45 = vmax.f32 %v1984_v9, %v1990_v49  ;;  %v1909_v38 = vpop.permute.xlu1 %1908  ;;  %v2025_v50 = vmax.f32 %v6340_v44, 0.0 }
 0x649   : > { %v1992_v57 = vsel %vm1217_vm1, %v6353_v20, -inf  ;;  %v6362_v40 = vadd.f32 %v6316_v10, %v1950_v36  ;;  %v1951_v51 = vadd.f32 %v1909_v38, %v6274_v19  ;;  %2076 = vrot.lane.b32.xlu0 %v2044_v23, %s5579_s18  ;;  %v2026_v18 = vmax.f32 %v6353_v20, 0.0 }
 0x64a   : > { %v1993_v29 = vmax.f32 %v1985_v35, %v1992_v57  ;;  %v1919_v58 = vpop.permute.xlu0 %1918  ;;  %v2055_v52 = vpack.c.bf16 %v6353_v20, %v6340_v44 }
 0x64b   : > { %v1986_v13 = vsel %vm1217_vm1, %v6362_v40, -inf  ;;  %v6375_v53 = vadd.f32 %v6316_v10, %v1951_v51  ;;  %v1956_v19 = vadd.f32 %v6276_v61, %v1919_v58  ;;  %v2023_v1 = vmax.f32 %v6362_v40, 0.0 }
 0x64c   : > { %v1987_v60 = vmax.f32 %v1982_v46, %v1986_v13  ;;  %v1921_v2 = vpop.permute.xlu1 %1920  ;;  %v6381_v5 = vpack.c.bf16 %v2026_v18, %v2025_v50 }
 0x64d   : > { %v1988_v7 = vsel %vm1217_vm1, %v6375_v53, -inf  ;;  %v2024_v8 = vmax.f32 %v6375_v53, 0.0  ;;  %v6387_v11 = vadd.f32 %v6316_v10, %v1956_v19  ;;  %v1957_v0 = vadd.f32 %v6280_v43, %v1921_v2 }
 0x64e   : > { %v1989_v61 = vmax.f32 %v1983_v62, %v1988_v7  ;;  %v1915_v26 = vpop.permute.xlu0 %1914  ;;  %v2054_v28 = vpack.c.bf16 %v6375_v53, %v6362_v40 }
 0x64f   : > { %v1998_v41 = vsel %vm1217_vm1, %v6387_v11, -inf  ;;  %v6395_v34 = vadd.f32 %v6316_v10, %v1957_v0  ;;  %v1954_v37 = vadd.f32 %v1915_v26, %v6278_v22  ;;  %v2046_v63 = vpack.c.bf16 %v2024_v8, %v2023_v1 }
 0x650   : > { %v1999_v12 = vmax.f32 %v1991_v45, %v1998_v41  ;;  %v1917_v47 = vpop.permute.xlu1 %1916  ;;  %v2029_v32 = vmax.f32 %v6387_v11, 0.0 }
 0x651   : > { %v2000_v43 = vsel %vm1217_vm1, %v6395_v34, -inf  ;;  %v1974_v33 = vadd.f32 %v6316_v10, %v1954_v37  ;;  %v1955_v39 = vadd.f32 %v1917_v47, %v6282_v31  ;;  %2080 = vrot.lane.b32.xlu1 %v2046_v63, %s5579_s18  ;;  %v2030_v54 = vmax.f32 %v6395_v34, 0.0 }
 0x652   : > { %v2001_v56 = vmax.f32 %v1993_v29, %v2000_v43  ;;  %v2057_v22 = vpack.c.bf16 %v6395_v34, %v6387_v11 }
 0x653   : > { %v1994_v4 = vsel %vm1217_vm1, %v1974_v33, -inf  ;;  %v1975_v9 = vadd.f32 %v6316_v10, %v1955_v39  ;;  %v1923_v21 = vpop.permute.xlu0 %1922  ;;  %v2049_v49 = vpack.c.bf16 %v2030_v54, %v2029_v32  ;;  %v2027_v23 = vmax.f32 %v1974_v33, 0.0  ;;  %v5411_v39 = vld [vmem:[#allocation5 + $0x38] sm:$0xff]  }
 0x654   : > { %v1995_v36 = vmax.f32 %v1987_v60, %v1994_v4  ;;  %v1958_v31 = vadd.f32 %v1923_v21, %v6286_v24  ;;  %v5410_v24 = vld [vmem:[#allocation5 + $0x30] sm:$0xff]  }
 0x655   : > { %v1996_v35 = vsel %vm1217_vm1, %v1975_v9, -inf  ;;  %v2028_v45 = vmax.f32 %v1975_v9, 0.0  ;;  %v1925_v38 = vpop.permute.xlu1 %1924  ;;  %v2056_v57 = vpack.c.bf16 %v1975_v9, %v1974_v33  ;;  %5101 = vmatpush3.bf16.msra.mxu0 %v5410_v24 }
 0x656   : > { %v1997_v51 = vmax.f32 %v1989_v61, %v1996_v35  ;;  %v1978_v18 = vadd.f32 %v6316_v10, %v1958_v31  ;;  %v1959_v29 = vadd.f32 %v1925_v38, %v6290_v27  ;;  %5102 = vmatprep.subr.bf16.mxu0 %v5580_v48  ;;  %v5413_v35 = vld [vmem:[%s7264_s6 + $0x48] sm:$0xff]  }
 0x657   : > { %v1927_v58 = vpop.permute.xlu0 %1926  ;;  %v2048_v50 = vpack.c.bf16 %v2028_v45, %v2027_v23  ;;  %v5412_v23 = vld [vmem:[%s7264_s6 + $0x40] sm:$0xff]  }
 0x658   : > { %v2002_v46 = vsel %vm1217_vm1, %v1978_v18, -inf  ;;  %v1979_v13 = vadd.f32 %v6316_v10, %v1959_v29  ;;  %v1960_v19 = vadd.f32 %v6284_v55, %v1927_v58  ;;  %v2031_v60 = vmax.f32 %v1978_v18, 0.0 }
 0x659   : > { %v2003_v62 = vmax.f32 %v1995_v36, %v2002_v46  ;;  %2084 = vrot.lane.b32.xlu1 %v2048_v50, %s5579_s18  ;;  %v1929_v1 = vpop.permute.xlu1 %1928  ;;  %5103 = vmatpush3.bf16.msra.mxu0 %v5411_v39  ;;  %v6488_v46 = vld [vmem:[%s7260_s2 + $0x3] ss:$0 sm:$0xff] }
 0x65a   : > { %v2004_v2 = vsel %vm1217_vm1, %v1979_v13, -inf  ;;  %v2032_v7 = vmax.f32 %v1979_v13, 0.0  ;;  %v1980_v8 = vadd.f32 %v6316_v10, %v1960_v19  ;;  %v1961_v27 = vadd.f32 %v6288_v25, %v1929_v1  ;;  %5108 = vmatprep.subr.bf16.mxu0 %v5412_v23 }
 0x65b   : > { %v2005_v0 = vmax.f32 %v1997_v51, %v2004_v2  ;;  %v2058_v61 = vpack.c.bf16 %v1979_v13, %v1978_v18  ;;  %v5415_v51 = vld [vmem:[%s7264_s6 + $0x58] sm:$0xff]  }
 0x65c   : > { %v2006_v55 = vsel %vm1217_vm1, %v1980_v8, -inf  ;;  %v1981_v26 = vadd.f32 %v6316_v10, %v1961_v27  ;;  %v2050_v41 = vpack.c.bf16 %v2032_v7, %v2031_v60  ;;  %v2033_v32 = vmax.f32 %v1980_v8, 0.0 }
 0x65d   : > { %v2010_v37 = vmax.f32 %v2003_v62, %v2005_v0  ;;  %v2007_v63 = vmax.f32 %v1999_v12, %v2006_v55 }
 0x65e   : > { %v2008_v47 = vsel %vm1217_vm1, %v1981_v26, -inf  ;;  %2088 = vrot.lane.b32.xlu1 %v2050_v41, %s5579_s18  ;;  %v2034_v15 = vmax.f32 %v1981_v26, 0.0  ;;  %v2059_v43 = vpack.c.bf16 %v1981_v26, %v1980_v8 }
 0x65f   : > { %v2009_v25 = vmax.f32 %v2001_v56, %v2008_v47 }
 0x660   : > { %v2051_v33 = vpack.c.bf16 %v2034_v15, %v2033_v32 }
 0x661   : > { %v2011_v54 = vmax.f32 %v2007_v63, %v2009_v25 }
 0x662   : > { %2092 = vrot.lane.b32.xlu1 %v2052_v30, %s5579_s18 }
 0x663   : > { %v2012_v10 = vmax.f32 %v2010_v37, %v2011_v54 }
 0x665   : > { %v2013_v4 = vrot.slane %v2012_v10, 4 }
 0x666   : > { %2096 = vrot.lane.b32.xlu1 %v2054_v28, %s5579_s18 }
 0x667   : > { %v2014_v12 = vmax.f32 %v2012_v10, %v2013_v4 }
 0x669   : > { %v2015_v9 = vrot.slane %v2014_v12, 2 }
 0x66a   : > { %2100 = vrot.lane.b32.xlu1 %v2056_v57, %s5579_s18  ;;  %v5414_v57 = vld [vmem:[%s7264_s6 + $0x50] sm:$0xff]  }
 0x66b   : > { %v2016_v56 = vmax.f32 %v2014_v12, %v2015_v9 }
 0x66d   : > { %v2017_v21 = vrot.slane %v2016_v56, 1 }
 0x66e   : > { %2104 = vrot.lane.b32.xlu1 %v2058_v61, %s5579_s18 }
 0x66f   : > { %v2018_v36 = vmax.f32 %v2016_v56, %v2017_v21 }
 0x671   : > { %v2341_v31 = vmax.f32 %v2018_v36, 0.0 }
 0x673   : > { %v2342_v42 = vsel %vm1577_vm3, %v2341_v31, %v2018_v36 }
 0x674   : > { %v2352_v3 = vpack.c.bf16 %v2342_v42, %v2342_v42 }
 0x676   : > { %2354 = vrot.lane.b32.xlu0 %v2352_v3, %s5579_s18 }
 0x67a   : > { %2082 = vrot.lane.b32.xlu0 %v6381_v5, %s5579_s18 }
 0x67e   : > { %2086 = vrot.lane.b32.xlu0 %v2049_v49, %s5579_s18 }
 0x682   : > { %2090 = vrot.lane.b32.xlu0 %v2051_v33, %s5579_s18 }
 0x686   : > { %2094 = vrot.lane.b32.xlu0 %v2053_v17, %s5579_s18 }
 0x68a   : > { %2098 = vrot.lane.b32.xlu0 %v2055_v52, %s5579_s18 }
 0x68e   : > { %2102 = vrot.lane.b32.xlu0 %v2057_v22, %s5579_s18 }
 0x692   : > { %2106 = vrot.lane.b32.xlu0 %v2059_v43, %s5579_s18 }
 0x6b7   : > { %v2079_v40 = vpop.permute.xlu1 %2078 }
 0x6bb   : > { %v2077_v30 = vpop.permute.xlu0 %2076 }
 0x6bc   : > { %5064 = vmatprep.mubr.msk.bf16.mxu1 %vm1015_vm0, %v2077_v30 }
 0x6bd   : > { %5065 = vmatmul.mubr.msk.bf16.vlgmr.msra.gmra.mrb[48].mxu1 %vm1015_vm0, %v2079_v40 }
 0x6c3   : > { %v2081_v14 = vpop.permute.xlu1 %2080 }
 0x6c4   : > { %5068 = vmatprep.mubr.msk.bf16.mxu1 %vm1015_vm0, %v2081_v14 }
 0x6cb   : > { %v2085_v44 = vpop.permute.xlu1 %2084 }
 0x6d0   : > { %v2089_v52 = vpop.permute.xlu1 %2088 }
 0x6d4   : > { %v2093_v5 = vpop.permute.xlu1 %2092 }
 0x6d8   : > { %v2097_v28 = vpop.permute.xlu1 %2096 }
 0x6dc   : > { %v2101_v22 = vpop.permute.xlu1 %2100 }
 0x6e0   : > { %v2105_v45 = vpop.permute.xlu1 %2104 }
 0x6e8   : > { %v2355_v16 = vpop.permute.xlu0 %2354 }
 0x6e9   : > { %5105 = vmatmul.mubr.msk.bf16.vlgmr.msra.gmra.mrb[52].mxu0 %vm1015_vm0, %v2355_v16 }
 0x6ea   : > { %5109 = vmatpush3.bf16.msra.mxu0 %v5412_v23 }
 0x6eb   : > { %5110 = vmatprep.subr.bf16.mxu0 %v5413_v35 }
 0x6ec   : > { %v2083_v17 = vpop.permute.xlu0 %2082 }
 0x6ed   : > { %5069 = vmatmul.mubr.msk.bf16.gmra.mrb[52].mxu1 %vm1015_vm0, %v2083_v17 }
 0x6ee   : > { %5072 = vmatprep.mubr.msk.bf16.mxu1 %vm1015_vm0, %v2085_v44  ;;  %5111 = vmatpush3.bf16.msra.mxu0 %v5413_v35 }
 0x6ef   : > { %5112 = vmatprep.subr.bf16.mxu0 %v5414_v57 }
 0x6f0   : > { %v2087_v20 = vpop.permute.xlu0 %2086 }
 0x6f2   : > { %5113 = vmatpush3.bf16.msra.mxu0 %v5414_v57 }
 0x6f3   : > { %5114 = vmatprep.subr.bf16.mxu0 %v5415_v51 }
 0x6f4   : > { %v2091_v53 = vpop.permute.xlu0 %2090 }
 0x6f5   : > { %5073 = vmatmul.mubr.msk.bf16.gmra.mrb[56].mxu1 %vm1015_vm0, %v2087_v20 }
 0x6f6   : > { %5076 = vmatprep.mubr.msk.bf16.mxu1 %vm1015_vm0, %v2089_v52  ;;  %5115 = vmatpush3.bf16.msra.mxu0 %v5415_v51 }
 0x6f7   : > { %5172 = vmatprep.subr.bf16.mxu0 %v5580_v48 }
 0x6f8   : > { %v2095_v11 = vpop.permute.xlu0 %2094 }
 0x6fc   : > { %v2099_v34 = vpop.permute.xlu0 %2098 }
 0x6fd   : > { %5077 = vmatmul.mubr.msk.bf16.gmra.mrb[60].mxu1 %vm1015_vm0, %v2091_v53 }
 0x6fe   : > { %5080 = vmatprep.mubr.msk.bf16.mxu1 %vm1015_vm0, %v2093_v5 }
 0x700   : > { %v2103_v49 = vpop.permute.xlu0 %2102 }
 0x704   : > { %v2107_v38 = vpop.permute.xlu0 %2106 }
 0x705   : > { %5081 = vmatmul.mubr.msk.bf16.gmra.mrb[64].mxu1 %vm1015_vm0, %v2095_v11 }
 0x706   : > { %5084 = vmatprep.mubr.msk.bf16.mxu1 %vm1015_vm0, %v2097_v28 }
 0x70d   : > { %5085 = vmatmul.mubr.msk.bf16.gmra.mrb[68].mxu1 %vm1015_vm0, %v2099_v34 }
 0x70e   : > { %5088 = vmatprep.mubr.msk.bf16.mxu1 %vm1015_vm0, %v2101_v22 }
 0x715   : > { %5089 = vmatmul.mubr.msk.bf16.gmra.mrb[72].mxu1 %vm1015_vm0, %v2103_v49 }
 0x716   : > { %5092 = vmatprep.mubr.msk.bf16.mxu1 %vm1015_vm0, %v2105_v45 }
 0x71d   : > { %5093 = vmatmul.mubr.msk.bf16.gmra.mrb[76].mxu1 %vm1015_vm0, %v2107_v38 }
 0x790   : > { %v5066_v18 = vpop.f32.mrb[48].mxu1 }
 0x791   : > { %v2214_v29 = vpop.f32.mrb[49].mxu1  ;;  %v2430_v13 = vadd.f32 %v5066_v18, %v6488_v46 }
 0x792   : > { %v5067_v58 = vpop.f32.mrb[50].mxu1  ;;  %v2428_v24 = vadd.f32 %v6488_v46, %v2214_v29 }
 0x793   : > { %v2217_v50 = vpop.f32.mrb[51].mxu1  ;;  %v2431_v62 = vadd.f32 %v5067_v58, %v6488_v46 }
 0x794   : > { %v2429_v60 = vadd.f32 %v6488_v46, %v2217_v50 }
 0x7bc   : > { %v6491_v19 = vpop.f32.mrb[52].mxu0 }
 0x7bd   : > { %v6498_v1 = vrot.slane %v6491_v19, %v6210_v59  ;;  %v5106_v2 = vpop.f32.mrb[53].mxu0 }
 0x7be   : > { %v2420_v7 = vpop.f32.mrb[54].mxu0 }
 0x7bf   : > { %v5107_v8 = vpop.f32.mrb[55].mxu0  ;;  %v2448_v27 = vadd.f32 %v6498_v1, %v2428_v24  ;;  %v2449_v0 = vadd.f32 %v6498_v1, %v2429_v60  ;;  %v2450_v61 = vadd.f32 %v6498_v1, %v2430_v13  ;;  %v2451_v55 = vadd.f32 %v6498_v1, %v2431_v62 }
 0x7c0   : > { %v5070_v26 = vpop.f32.mrb[52].mxu1 }
 0x7c1   : > { %v2434_v41 = vadd.f32 %v5070_v26, %v6488_v46  ;;  %v2230_v37 = vpop.f32.mrb[53].mxu1  ;;  %v2464_v63 = vmax.f32 %v2448_v27, 0.0  ;;  %v2465_v47 = vmax.f32 %v2449_v0, 0.0  ;;  %v2466_v32 = vmax.f32 %v2450_v61, 0.0 }
 0x7c2   : > { %v2432_v15 = vadd.f32 %v6488_v46, %v2230_v37  ;;  %v5071_v43 = vpop.f32.mrb[54].mxu1  ;;  %v2467_v25 = vmax.f32 %v2451_v55, 0.0 }
 0x7c3   : > { %v2454_v33 = vadd.f32 %v6498_v1, %v2434_v41  ;;  %v2435_v39 = vadd.f32 %v5071_v43, %v6488_v46  ;;  %v2233_v54 = vpop.f32.mrb[55].mxu1  ;;  %v2489_v10 = vpack.c.bf16 %v2465_v47, %v2464_v63 }
 0x7c4   : > { %v2452_v4 = vadd.f32 %v6498_v1, %v2432_v15  ;;  %v2433_v12 = vadd.f32 %v6488_v46, %v2233_v54  ;;  %v2490_v9 = vpack.c.bf16 %v2467_v25, %v2466_v32 }
 0x7c5   : > { %v2455_v56 = vadd.f32 %v6498_v1, %v2435_v39  ;;  %5116 = vmatprep.mubr.msk.bf16.mxu0 %vm1015_vm0, %v2489_v10  ;;  %v2470_v36 = vmax.f32 %v2454_v33, 0.0 }
 0x7c6   : > { %v2453_v21 = vadd.f32 %v6498_v1, %v2433_v12  ;;  %5117 = vmatmul.mubr.msk.bf16.vlgmr.msra.gmra.mrb[56].mxu0 %vm1015_vm0, %v2490_v9  ;;  %v2468_v42 = vmax.f32 %v2452_v4, 0.0 }
 0x7c7   : > { %v2471_v31 = vmax.f32 %v2455_v56, 0.0  ;;  %v4604_v56 = vld [vmem:[%s7260_s2 + $0x8] ss:$0 sm:$0xff] }
 0x7c8   : > { %v2469_v3 = vmax.f32 %v2453_v21, 0.0  ;;  %v5074_v30 = vpop.f32.mrb[56].mxu1 }
 0x7c9   : > { %v2492_v40 = vpack.c.bf16 %v2471_v31, %v2470_v36  ;;  %v2438_v14 = vadd.f32 %v5074_v30, %v6488_v46  ;;  %v2246_v16 = vpop.f32.mrb[57].mxu1 }
 0x7ca   : > { %v2491_v17 = vpack.c.bf16 %v2469_v3, %v2468_v42  ;;  %v2436_v44 = vadd.f32 %v6488_v46, %v2246_v16  ;;  %v5075_v20 = vpop.f32.mrb[58].mxu1 }
 0x7cb   : > { %v2458_v52 = vadd.f32 %v6498_v1, %v2438_v14  ;;  %v2439_v53 = vadd.f32 %v5075_v20, %v6488_v46  ;;  %v2249_v5 = vpop.f32.mrb[59].mxu1 }
 0x7cc   : > { %v2456_v11 = vadd.f32 %v6498_v1, %v2436_v44  ;;  %v2437_v28 = vadd.f32 %v6488_v46, %v2249_v5  ;;  %5120 = vmatprep.mubr.msk.bf16.mxu0 %vm1015_vm0, %v2491_v17 }
 0x7cd   : > { %v2459_v34 = vadd.f32 %v6498_v1, %v2439_v53  ;;  %v2474_v49 = vmax.f32 %v2458_v52, 0.0 }
 0x7ce   : > { %v2457_v22 = vadd.f32 %v6498_v1, %v2437_v28  ;;  %5121 = vmatmul.mubr.msk.bf16.gmra.mrb[60].mxu0 %vm1015_vm0, %v2492_v40  ;;  %v2472_v35 = vmax.f32 %v2456_v11, 0.0 }
 0x7cf   : > { %v2475_v23 = vmax.f32 %v2459_v34, 0.0 }
 0x7d0   : > { %v2473_v45 = vmax.f32 %v2457_v22, 0.0  ;;  %v5078_v38 = vpop.f32.mrb[60].mxu1 }
 0x7d1   : > { %v2494_v57 = vpack.c.bf16 %v2475_v23, %v2474_v49  ;;  %v2442_v51 = vadd.f32 %v5078_v38, %v6488_v46  ;;  %v2262_v18 = vpop.f32.mrb[61].mxu1 }
 0x7d2   : > { %v2493_v29 = vpack.c.bf16 %v2473_v45, %v2472_v35  ;;  %v2440_v58 = vadd.f32 %v6488_v46, %v2262_v18  ;;  %v5079_v50 = vpop.f32.mrb[62].mxu1 }
 0x7d3   : > { %v2462_v13 = vadd.f32 %v6498_v1, %v2442_v51  ;;  %v2443_v24 = vadd.f32 %v5079_v50, %v6488_v46  ;;  %v2265_v62 = vpop.f32.mrb[63].mxu1 }
 0x7d4   : > { %v2460_v60 = vadd.f32 %v6498_v1, %v2440_v58  ;;  %v2441_v2 = vadd.f32 %v6488_v46, %v2265_v62  ;;  %5124 = vmatprep.mubr.msk.bf16.mxu0 %vm1015_vm0, %v2493_v29  ;;  %v5416_v62 = vld [vmem:[#allocation2 + $0x40] sm:$0xff]  }
 0x7d5   : > { %v2463_v7 = vadd.f32 %v6498_v1, %v2443_v24  ;;  %v2478_v27 = vmax.f32 %v2462_v13, 0.0  ;;  %5132 = vmatprep.subr.bf16.mxu1 %v5416_v62 }
 0x7d6   : > { %v2461_v8 = vadd.f32 %v6498_v1, %v2441_v2  ;;  %5125 = vmatmul.mubr.msk.bf16.gmra.mrb[64].mxu0 %vm1015_vm0, %v2494_v57  ;;  %v2476_v61 = vmax.f32 %v2460_v60, 0.0  ;;  %v5417_v60 = vld [vmem:[#allocation2 + $0x48] sm:$0xff]   ;;  %5133 = vmatpush3.bf16.msra.mxu1 %v5416_v62  ;;  %v5418_v2 = vld [vmem:[#allocation2 + $0x50] sm:$0xff]  }
 0x7d7   : > { %v2479_v0 = vmax.f32 %v2463_v7, 0.0  ;;  %5134 = vmatprep.subr.bf16.mxu1 %v5417_v60  ;;  %v5419_v7 = vld [vmem:[#allocation2 + $0x58] sm:$0xff]  }
 0x7d8   : > { %v2477_v55 = vmax.f32 %v2461_v8, 0.0  ;;  %v6534_v26 = vpop.f32.mrb[64].mxu1 }
 0x7d9   : > { %v2496_v41 = vpack.c.bf16 %v2479_v0, %v2478_v27  ;;  %v6536_v37 = vpop.f32.mrb[65].mxu1  ;;  %v6591_v27 = vrot.slane %v6491_v19, %v6312_v6 }
 0x7da   : > { %v2495_v63 = vpack.c.bf16 %v2477_v55, %v2476_v61  ;;  %v6538_v47 = vpop.f32.mrb[66].mxu1  ;;  %5135 = vmatpush3.bf16.msra.mxu1 %v5417_v60 }
 0x7db   : > { %v6540_v46 = vpop.f32.mrb[67].mxu1  ;;  %5136 = vmatprep.subr.bf16.mxu1 %v5418_v2 }
 0x7dc   : > { %5128 = vmatprep.mubr.msk.bf16.mxu0 %vm1015_vm0, %v2495_v63 }
 0x7de   : > { %5129 = vmatmul.mubr.msk.bf16.gmra.mrb[68].mxu0 %vm1015_vm0, %v2496_v41  ;;  %5137 = vmatpush3.bf16.msra.mxu1 %v5418_v2 }
 0x7df   : > { %5180 = vmatprep.mubr.msk.bf16.mxu0 %vm5581_vm2, %v5580_v48  ;;  %5138 = vmatprep.subr.bf16.mxu1 %v5419_v7 }
 0x7e0   : > { %v6546_v1 = vpop.f32.mrb[68].mxu1 }
 0x7e1   : > { %v6548_v32 = vpop.f32.mrb[69].mxu1 }
 0x7e2   : > { %v6550_v15 = vpop.f32.mrb[70].mxu1  ;;  %5139 = vmatpush3.bf16.msra.mxu1 %v5419_v7 }
 0x7e3   : > { %v6552_v43 = vpop.f32.mrb[71].mxu1  ;;  %5248 = vmatprep.subr.bf16.mxu1 %v5580_v48 }
 0x7e8   : > { %v6554_v25 = vpop.f32.mrb[72].mxu1 }
 0x7e9   : > { %v6556_v33 = vpop.f32.mrb[73].mxu1 }
 0x7ea   : > { %v6558_v39 = vpop.f32.mrb[74].mxu1 }
 0x7eb   : > { %v6560_v54 = vpop.f32.mrb[75].mxu1 }
 0x7f0   : > { %v6562_v10 = vpop.f32.mrb[76].mxu1 }
 0x7f1   : > { %v6564_v4 = vpop.f32.mrb[77].mxu1 }
 0x7f2   : > { %v6566_v12 = vpop.f32.mrb[78].mxu1 }
 0x7f3   : > { %v6568_v9 = vpop.f32.mrb[79].mxu1 }
 0x899   : > { %v5118_v21 = vpop.f32.mrb[56].mxu0 }
 0x89a   : > { %v2593_v36 = vadd.f32 %v5118_v21, %v4604_v56  ;;  %v2584_v31 = vpop.f32.mrb[57].mxu0 }
 0x89b   : > { %v5119_v42 = vpop.f32.mrb[58].mxu0  ;;  %v2585_v40 = vadd.f32 %v4604_v56, %v2584_v31 }
 0x89c   : > { %v2596_v3 = vadd.f32 %v5119_v42, %v4604_v56  ;;  %2667 = vrot.lane.b32.xlu1 %v2593_v36, %s5579_s18  ;;  %v2587_v30 = vpop.f32.mrb[59].mxu0 }
 0x89d   : > { %v2588_v14 = vadd.f32 %v4604_v56, %v2587_v30 }
 0x89e   : > { %2669 = vrot.lane.b32.xlu0 %v2596_v3, %s5579_s18 }
 0x8a0   : > { %2663 = vrot.lane.b32.xlu1 %v2585_v40, %s5579_s18 }
 0x8a1   : > { %v5122_v16 = vpop.f32.mrb[60].mxu0 }
 0x8a2   : > { %v2609_v17 = vadd.f32 %v5122_v16, %v4604_v56  ;;  %2665 = vrot.lane.b32.xlu0 %v2588_v14, %s5579_s18  ;;  %v2600_v44 = vpop.f32.mrb[61].mxu0 }
 0x8a3   : > { %v5123_v20 = vpop.f32.mrb[62].mxu0  ;;  %v2601_v5 = vadd.f32 %v4604_v56, %v2600_v44  ;;  %v5420_v44 = vld [vmem:[#allocation5 + $0x40] sm:$0xff]  }
 0x8a4   : > { %v2612_v52 = vadd.f32 %v5123_v20, %v4604_v56  ;;  %2675 = vrot.lane.b32.xlu1 %v2609_v17, %s5579_s18  ;;  %v2603_v53 = vpop.f32.mrb[63].mxu0  ;;  %5173 = vmatpush3.bf16.msra.mxu0 %v5420_v44 }
 0x8a5   : > { %v2604_v11 = vadd.f32 %v4604_v56, %v2603_v53  ;;  %5174 = vmatprep.subr.bf16.mxu0 %v5580_v48 }
 0x8a6   : > { %2677 = vrot.lane.b32.xlu0 %v2612_v52, %s5579_s18 }
 0x8a8   : > { %2671 = vrot.lane.b32.xlu1 %v2601_v5, %s5579_s18 }
 0x8a9   : > { %v5126_v28 = vpop.f32.mrb[64].mxu0 }
 0x8aa   : > { %v2625_v34 = vadd.f32 %v5126_v28, %v4604_v56  ;;  %2673 = vrot.lane.b32.xlu0 %v2604_v11, %s5579_s18  ;;  %v2616_v22 = vpop.f32.mrb[65].mxu0 }
 0x8ab   : > { %v5127_v49 = vpop.f32.mrb[66].mxu0  ;;  %v2617_v45 = vadd.f32 %v4604_v56, %v2616_v22 }
 0x8ac   : > { %v2628_v23 = vadd.f32 %v5127_v49, %v4604_v56  ;;  %2683 = vrot.lane.b32.xlu1 %v2625_v34, %s5579_s18  ;;  %v2619_v35 = vpop.f32.mrb[67].mxu0 }
 0x8ad   : > { %v2620_v38 = vadd.f32 %v4604_v56, %v2619_v35 }
 0x8ae   : > { %2685 = vrot.lane.b32.xlu0 %v2628_v23, %s5579_s18 }
 0x8b0   : > { %2679 = vrot.lane.b32.xlu1 %v2617_v45, %s5579_s18 }
 0x8b1   : > { %v5130_v57 = vpop.f32.mrb[68].mxu0 }
 0x8b2   : > { %2681 = vrot.lane.b32.xlu0 %v2620_v38, %s5579_s18  ;;  %v2632_v51 = vpop.f32.mrb[69].mxu0  ;;  %v2641_v13 = vadd.f32 %v5130_v57, %v4604_v56 }
 0x8b3   : > { %v2633_v18 = vadd.f32 %v4604_v56, %v2632_v51  ;;  %v5131_v29 = vpop.f32.mrb[70].mxu0 }
 0x8b4   : > { %v2635_v58 = vpop.f32.mrb[71].mxu0  ;;  %v2644_v24 = vadd.f32 %v5131_v29, %v4604_v56 }
 0x8b5   : > { %v2636_v50 = vadd.f32 %v4604_v56, %v2635_v58  ;;  %2687 = vrot.lane.b32.xlu1 %v2633_v18, %s5579_s18 }
 0x8b7   : > { %2689 = vrot.lane.b32.xlu0 %v2636_v50, %s5579_s18 }
 0x8b9   : > { %2691 = vrot.lane.b32.xlu1 %v2641_v13, %s5579_s18 }
 0x8bb   : > { %2693 = vrot.lane.b32.xlu0 %v2644_v24, %s5579_s18 }
 0x90e   : > { %v2668_v8 = vpop.permute.xlu1 %2667 }
 0x90f   : > { %v2713_v0 = vadd.f32 %v6534_v26, %v2668_v8 }
 0x910   : > { %v2670_v61 = vpop.permute.xlu0 %2669 }
 0x911   : > { %v6596_v55 = vadd.f32 %v6591_v27, %v2713_v0  ;;  %v2714_v41 = vadd.f32 %v6538_v47, %v2670_v61 }
 0x912   : > { %v2664_v63 = vpop.permute.xlu1 %2663 }
 0x913   : > { %v6600_v56 = vadd.f32 %v6591_v27, %v2714_v41  ;;  %v2711_v21 = vadd.f32 %v2664_v63, %v6536_v37  ;;  %v2786_v19 = vmax.f32 %v6596_v55, 0.0  ;;  %v2749_v53 = vsel %vm1217_vm1, %v6596_v55, -inf }
 0x914   : > { %v2666_v36 = vpop.permute.xlu0 %2665 }
 0x915   : > { %v2787_v31 = vmax.f32 %v6600_v56, 0.0  ;;  %v2818_v26 = vpack.c.bf16 %v6600_v56, %v6596_v55  ;;  %v6608_v42 = vadd.f32 %v6591_v27, %v2711_v21  ;;  %v2712_v3 = vadd.f32 %v2666_v36, %v6540_v46 }
 0x916   : > { %v2676_v47 = vpop.permute.xlu1 %2675  ;;  %v2750_v28 = vsel %vm1217_vm1, %v6600_v56, -inf }
 0x917   : > { %v2717_v30 = vadd.f32 %v6546_v1, %v2676_v47  ;;  %v2810_v40 = vpack.c.bf16 %v2787_v31, %v2786_v19  ;;  %v6613_v14 = vadd.f32 %v6591_v27, %v2712_v3  ;;  %v2784_v20 = vmax.f32 %v6608_v42, 0.0 }
 0x918   : > { %v2678_v37 = vpop.permute.xlu0 %2677  ;;  %v2747_v29 = vsel %vm1217_vm1, %v6608_v42, -inf }
 0x919   : > { %v6616_v16 = vadd.f32 %v6591_v27, %v2717_v30  ;;  %v2718_v17 = vadd.f32 %v6550_v15, %v2678_v37  ;;  %2843 = vrot.lane.b32.xlu0 %v2810_v40, %s5579_s18  ;;  %v2785_v46 = vmax.f32 %v6613_v14, 0.0  ;;  %v2817_v1 = vpack.c.bf16 %v6613_v14, %v6608_v42  ;;  %v5421_v30 = vld [vmem:[#allocation5 + $0x48] sm:$0xff]  }
 0x91a   : > { %v2672_v52 = vpop.permute.xlu1 %2671  ;;  %5175 = vmatpush3.bf16.msra.mxu0 %v5421_v30 }
 0x91b   : > { %v2755_v5 = vsel %vm1217_vm1, %v6616_v16, -inf  ;;  %v6629_v11 = vadd.f32 %v6591_v27, %v2718_v17  ;;  %v2715_v15 = vadd.f32 %v2672_v52, %v6548_v32  ;;  %v2790_v22 = vmax.f32 %v6616_v16, 0.0  ;;  %5176 = vmatprep.subr.bf16.mxu0 %v5580_v48 }
 0x91c   : > { %v2756_v34 = vmax.f32 %v2749_v53, %v2755_v5  ;;  %v2674_v49 = vpop.permute.xlu0 %2673  ;;  %v2809_v23 = vpack.c.bf16 %v2785_v46, %v2784_v20 }
 0x91d   : > { %v2757_v35 = vsel %vm1217_vm1, %v6629_v11, -inf  ;;  %v2791_v45 = vmax.f32 %v6629_v11, 0.0  ;;  %v2820_v38 = vpack.c.bf16 %v6629_v11, %v6616_v16  ;;  %v6642_v32 = vadd.f32 %v6591_v27, %v2715_v15 }
 0x91e   : > { %v2758_v57 = vmax.f32 %v2750_v28, %v2757_v35  ;;  %v2716_v51 = vadd.f32 %v2674_v49, %v6552_v43  ;;  %2841 = vrot.lane.b32.xlu1 %v2809_v23, %s5579_s18  ;;  %v2684_v18 = vpop.permute.xlu1 %2683  ;;  %v2748_v43 = vsel %vm1217_vm1, %v6613_v14, -inf }
 0x91f   : > { %v2751_v58 = vsel %vm1217_vm1, %v6642_v32, -inf  ;;  %v2721_v50 = vadd.f32 %v6554_v25, %v2684_v18  ;;  %v6651_v13 = vpack.c.bf16 %v2791_v45, %v2790_v22  ;;  %v2788_v8 = vmax.f32 %v6642_v32, 0.0 }
 0x920   : > { %v2752_v24 = vmax.f32 %v2747_v29, %v2751_v58  ;;  %v6654_v62 = vadd.f32 %v6591_v27, %v2716_v51  ;;  %v2686_v60 = vpop.permute.xlu0 %2685 }
 0x921   : > { %v6659_v2 = vadd.f32 %v6591_v27, %v2721_v50  ;;  %v2722_v7 = vadd.f32 %v6558_v39, %v2686_v60 }
 0x922   : > { %v2753_v25 = vsel %vm1217_vm1, %v6654_v62, -inf  ;;  %v2789_v0 = vmax.f32 %v6654_v62, 0.0  ;;  %v2819_v61 = vpack.c.bf16 %v6654_v62, %v6642_v32  ;;  %v2680_v41 = vpop.permute.xlu1 %2679 }
 0x923   : > { %v2754_v63 = vmax.f32 %v2748_v43, %v2753_v25  ;;  %v2763_v21 = vsel %vm1217_vm1, %v6659_v2, -inf  ;;  %v6671_v36 = vadd.f32 %v6591_v27, %v2722_v7  ;;  %v2794_v39 = vmax.f32 %v6659_v2, 0.0 }
 0x924   : > { %v2764_v19 = vmax.f32 %v2756_v34, %v2763_v21  ;;  %v2719_v31 = vadd.f32 %v2680_v41, %v6556_v33  ;;  %v2682_v3 = vpop.permute.xlu0 %2681  ;;  %v2811_v47 = vpack.c.bf16 %v2789_v0, %v2788_v8 }
 0x925   : > { %v2765_v40 = vsel %vm1217_vm1, %v6671_v36, -inf  ;;  %v2795_v37 = vmax.f32 %v6671_v36, 0.0  ;;  %v2822_v17 = vpack.c.bf16 %v6671_v36, %v6659_v2  ;;  %v2720_v44 = vadd.f32 %v2682_v3, %v6560_v54 }
 0x926   : > { %v2766_v20 = vmax.f32 %v2758_v57, %v2765_v40  ;;  %v2739_v46 = vadd.f32 %v6591_v27, %v2719_v31  ;;  %2845 = vrot.lane.b32.xlu0 %v2811_v47, %s5579_s18 }
 0x927   : > { %v2740_v33 = vadd.f32 %v6591_v27, %v2720_v44  ;;  %v2688_v52 = vpop.permute.xlu1 %2687  ;;  %v2814_v53 = vpack.c.bf16 %v2795_v37, %v2794_v39  ;;  %v5423_v44 = vld [vmem:[#allocation5 + $0x58] sm:$0xff]  }
 0x928   : > { %v2759_v5 = vsel %vm1217_vm1, %v2739_v46, -inf  ;;  %v2792_v15 = vmax.f32 %v2739_v46, 0.0  ;;  %v2723_v28 = vadd.f32 %v2688_v52, %v6564_v4  ;;  %v5422_v4 = vld [vmem:[#allocation5 + $0x50] sm:$0xff]  }
 0x929   : > { %v2760_v34 = vmax.f32 %v2752_v24, %v2759_v5  ;;  %v2761_v54 = vsel %vm1217_vm1, %v2740_v33, -inf  ;;  %v2793_v22 = vmax.f32 %v2740_v33, 0.0  ;;  %v2821_v49 = vpack.c.bf16 %v2740_v33, %v2739_v46  ;;  %v2690_v23 = vpop.permute.xlu0 %2689  ;;  %5177 = vmatpush3.bf16.msra.mxu0 %v5422_v4 }
 0x92a   : > { %v2762_v35 = vmax.f32 %v2754_v63, %v2761_v54  ;;  %v2743_v45 = vadd.f32 %v6591_v27, %v2723_v28  ;;  %v2724_v57 = vadd.f32 %v2690_v23, %v6568_v9  ;;  %5178 = vmatprep.subr.bf16.mxu0 %v5580_v48  ;;  %v5425_v54 = vld [vmem:[%s7264_s6 + $0x68] sm:$0xff]   ;;  %v5426_v23 = vld [vmem:[%s7264_s6 + $0x70] sm:$0xff]  }
 0x92b   : > { %v2692_v51 = vpop.permute.xlu1 %2691  ;;  %v2813_v18 = vpack.c.bf16 %v2793_v22, %v2792_v15 }
 0x92c   : > { %v2767_v29 = vsel %vm1217_vm1, %v2743_v45, -inf  ;;  %v2744_v58 = vadd.f32 %v6591_v27, %v2724_v57  ;;  %v2725_v50 = vadd.f32 %v6562_v10, %v2692_v51  ;;  %v2796_v60 = vmax.f32 %v2743_v45, 0.0 }
 0x92d   : > { %v2768_v24 = vmax.f32 %v2760_v34, %v2767_v29  ;;  %v2694_v43 = vpop.permute.xlu0 %2693  ;;  %2849 = vrot.lane.b32.xlu0 %v2813_v18, %s5579_s18  ;;  %5179 = vmatpush3.bf16.msra.mxu0 %v5423_v44  ;;  %v5424_v34 = vld [vmem:[%s7264_s6 + $0x60] sm:$0xff]  }
 0x92e   : > { %v2769_v7 = vsel %vm1217_vm1, %v2744_v58, -inf  ;;  %v2797_v8 = vmax.f32 %v2744_v58, 0.0  ;;  %v2823_v25 = vpack.c.bf16 %v2744_v58, %v2743_v45  ;;  %v2745_v9 = vadd.f32 %v6591_v27, %v2725_v50  ;;  %5184 = vmatprep.subr.bf16.mxu0 %v5424_v34  ;;  %v6765_v29 = vld [vmem:[%s7260_s2 + $0x4] ss:$0 sm:$0xff] }
 0x92f   : > { %v2770_v0 = vmax.f32 %v2762_v35, %v2769_v7  ;;  %v2726_v41 = vadd.f32 %v6566_v12, %v2694_v43  ;;  %v5427_v35 = vld [vmem:[%s7264_s6 + $0x78] sm:$0xff]  }
 0x930   : > { %v2771_v10 = vsel %vm1217_vm1, %v2745_v9, -inf  ;;  %v2815_v63 = vpack.c.bf16 %v2797_v8, %v2796_v60  ;;  %v2798_v3 = vmax.f32 %v2745_v9, 0.0 }
 0x931   : > { %v2775_v21 = vmax.f32 %v2768_v24, %v2770_v0  ;;  %v2772_v39 = vmax.f32 %v2764_v19, %v2771_v10  ;;  %v2746_v31 = vadd.f32 %v6591_v27, %v2726_v41 }
 0x932   : > { %2853 = vrot.lane.b32.xlu0 %v2815_v63, %s5579_s18 }
 0x933   : > { %v2773_v47 = vsel %vm1217_vm1, %v2746_v31, -inf  ;;  %v2799_v30 = vmax.f32 %v2746_v31, 0.0  ;;  %v2824_v40 = vpack.c.bf16 %v2746_v31, %v2745_v9 }
 0x934   : > { %v2774_v37 = vmax.f32 %v2766_v20, %v2773_v47 }
 0x935   : > { %v2816_v46 = vpack.c.bf16 %v2799_v30, %v2798_v3 }
 0x936   : > { %v2776_v12 = vmax.f32 %v2772_v39, %v2774_v37  ;;  %2857 = vrot.lane.b32.xlu0 %v2817_v1, %s5579_s18 }
 0x938   : > { %v2777_v19 = vmax.f32 %v2775_v21, %v2776_v12 }
 0x93a   : > { %v2778_v33 = vrot.slane %v2777_v19, 4  ;;  %2861 = vrot.lane.b32.xlu0 %v2819_v61, %s5579_s18 }
 0x93c   : > { %v2779_v27 = vmax.f32 %v2777_v19, %v2778_v33 }
 0x93e   : > { %v2780_v52 = vrot.slane %v2779_v27, 2  ;;  %2865 = vrot.lane.b32.xlu0 %v2821_v49, %s5579_s18 }
 0x940   : > { %v2781_v20 = vmax.f32 %v2779_v27, %v2780_v52 }
 0x942   : > { %2869 = vrot.lane.b32.xlu0 %v2823_v25, %s5579_s18  ;;  %v2782_v5 = vrot.slane %v2781_v20, 1 }
 0x944   : > { %v2783_v15 = vmax.f32 %v2781_v20, %v2782_v5 }
 0x946   : > { %v3106_v28 = vmax.f32 %v2783_v15, 0.0 }
 0x948   : > { %v3107_v42 = vsel %vm1577_vm3, %v3106_v28, %v2783_v15 }
 0x949   : > { %v3117_v14 = vpack.c.bf16 %v3107_v42, %v3107_v42 }
 0x94b   : > { %3119 = vrot.lane.b32.xlu1 %v3117_v14, %s5579_s18 }
 0x94f   : > { %2847 = vrot.lane.b32.xlu1 %v6651_v13, %s5579_s18 }
 0x953   : > { %2851 = vrot.lane.b32.xlu1 %v2814_v53, %s5579_s18 }
 0x957   : > { %2855 = vrot.lane.b32.xlu1 %v2816_v46, %s5579_s18 }
 0x95b   : > { %2859 = vrot.lane.b32.xlu1 %v2818_v26, %s5579_s18 }
 0x95f   : > { %2863 = vrot.lane.b32.xlu1 %v2820_v38, %s5579_s18 }
 0x963   : > { %2867 = vrot.lane.b32.xlu1 %v2822_v17, %s5579_s18 }
 0x967   : > { %2871 = vrot.lane.b32.xlu1 %v2824_v40, %s5579_s18 }
 0x98b   : > { %v2844_v32 = vpop.permute.xlu0 %2843 }
 0x990   : > { %v2842_v1 = vpop.permute.xlu1 %2841 }
 0x991   : > { %5140 = vmatprep.mubr.msk.bf16.mxu1 %vm1015_vm0, %v2842_v1 }
 0x992   : > { %5141 = vmatmul.mubr.msk.bf16.vlgmr.msra.gmra.mrb[80].mxu1 %vm1015_vm0, %v2844_v32 }
 0x998   : > { %v2846_v55 = vpop.permute.xlu0 %2845 }
 0x999   : > { %5144 = vmatprep.mubr.msk.bf16.mxu1 %vm1015_vm0, %v2846_v55 }
 0x99f   : > { %v2850_v16 = vpop.permute.xlu0 %2849 }
 0x9a4   : > { %v2854_v38 = vpop.permute.xlu0 %2853 }
 0x9a8   : > { %v2858_v62 = vpop.permute.xlu0 %2857 }
 0x9ac   : > { %v2862_v61 = vpop.permute.xlu0 %2861 }
 0x9b0   : > { %v2866_v17 = vpop.permute.xlu0 %2865 }
 0x9b4   : > { %v2870_v22 = vpop.permute.xlu0 %2869 }
 0x9bd   : > { %v3120_v56 = vpop.permute.xlu1 %3119 }
 0x9be   : > { %5181 = vmatmul.mubr.msk.bf16.vlgmr.msra.gmra.mrb[72].mxu0 %vm1015_vm0, %v3120_v56 }
 0x9bf   : > { %5185 = vmatpush3.bf16.msra.mxu0 %v5424_v34 }
 0x9c0   : > { %5186 = vmatprep.subr.bf16.mxu0 %v5425_v54 }
 0x9c1   : > { %v2848_v26 = vpop.permute.xlu1 %2847 }
 0x9c2   : > { %5145 = vmatmul.mubr.msk.bf16.gmra.mrb[84].mxu1 %vm1015_vm0, %v2848_v26 }
 0x9c3   : > { %5148 = vmatprep.mubr.msk.bf16.mxu1 %vm1015_vm0, %v2850_v16  ;;  %5187 = vmatpush3.bf16.msra.mxu0 %v5425_v54 }
 0x9c4   : > { %5188 = vmatprep.subr.bf16.mxu0 %v5426_v23 }
 0x9c5   : > { %v2852_v11 = vpop.permute.xlu1 %2851 }
 0x9c7   : > { %5189 = vmatpush3.bf16.msra.mxu0 %v5426_v23 }
 0x9c8   : > { %5190 = vmatprep.subr.bf16.mxu0 %v5427_v35 }
 0x9c9   : > { %v2856_v13 = vpop.permute.xlu1 %2855 }
 0x9ca   : > { %5149 = vmatmul.mubr.msk.bf16.gmra.mrb[88].mxu1 %vm1015_vm0, %v2852_v11 }
 0x9cb   : > { %5152 = vmatprep.mubr.msk.bf16.mxu1 %vm1015_vm0, %v2854_v38  ;;  %5191 = vmatpush3.bf16.msra.mxu0 %v5427_v35 }
 0x9cd   : > { %v2860_v2 = vpop.permute.xlu1 %2859 }
 0x9d1   : > { %v2864_v36 = vpop.permute.xlu1 %2863 }
 0x9d2   : > { %5153 = vmatmul.mubr.msk.bf16.gmra.mrb[92].mxu1 %vm1015_vm0, %v2856_v13 }
 0x9d3   : > { %5156 = vmatprep.mubr.msk.bf16.mxu1 %vm1015_vm0, %v2858_v62 }
 0x9d5   : > { %v2868_v53 = vpop.permute.xlu1 %2867 }
 0x9d9   : > { %v2872_v49 = vpop.permute.xlu1 %2871 }
 0x9da   : > { %5157 = vmatmul.mubr.msk.bf16.gmra.mrb[96].mxu1 %vm1015_vm0, %v2860_v2 }
 0x9db   : > { %5160 = vmatprep.mubr.msk.bf16.mxu1 %vm1015_vm0, %v2862_v61 }
 0x9e2   : > { %5161 = vmatmul.mubr.msk.bf16.gmra.mrb[100].mxu1 %vm1015_vm0, %v2864_v36 }
 0x9e3   : > { %5164 = vmatprep.mubr.msk.bf16.mxu1 %vm1015_vm0, %v2866_v17 }
 0x9ea   : > { %5165 = vmatmul.mubr.msk.bf16.gmra.mrb[104].mxu1 %vm1015_vm0, %v2868_v53 }
 0x9eb   : > { %5168 = vmatprep.mubr.msk.bf16.mxu1 %vm1015_vm0, %v2870_v22 }
 0x9f2   : > { %5169 = vmatmul.mubr.msk.bf16.gmra.mrb[108].mxu1 %vm1015_vm0, %v2872_v49 }
 0x9f3   : > { %5256 = vmatprep.mubr.msk.bf16.mxu1 %vm5581_vm2, %v5580_v48 }
 0xa65   : > { %v5142_v45 = vpop.f32.mrb[80].mxu1 }
 0xa66   : > { %v2979_v57 = vpop.f32.mrb[81].mxu1  ;;  %v3195_v58 = vadd.f32 %v5142_v45, %v6765_v29 }
 0xa67   : > { %v5143_v51 = vpop.f32.mrb[82].mxu1  ;;  %v3193_v4 = vadd.f32 %v6765_v29, %v2979_v57 }
 0xa68   : > { %v2982_v18 = vpop.f32.mrb[83].mxu1  ;;  %v3196_v24 = vadd.f32 %v5143_v51, %v6765_v29 }
 0xa69   : > { %v3194_v60 = vadd.f32 %v6765_v29, %v2982_v18 }
 0xa91   : > { %v6768_v50 = vpop.f32.mrb[72].mxu0 }
 0xa92   : > { %v6775_v43 = vrot.slane %v6768_v50, %v6210_v59  ;;  %v5182_v7 = vpop.f32.mrb[73].mxu0 }
 0xa93   : > { %v3185_v8 = vpop.f32.mrb[74].mxu0 }
 0xa94   : > { %v5183_v25 = vpop.f32.mrb[75].mxu0  ;;  %v3213_v9 = vadd.f32 %v6775_v43, %v3193_v4  ;;  %v3214_v0 = vadd.f32 %v6775_v43, %v3194_v60  ;;  %v3215_v41 = vadd.f32 %v6775_v43, %v3195_v58  ;;  %v3216_v10 = vadd.f32 %v6775_v43, %v3196_v24 }
 0xa95   : > { %v5146_v63 = vpop.f32.mrb[84].mxu1 }
 0xa96   : > { %v3199_v21 = vadd.f32 %v5146_v63, %v6765_v29  ;;  %v2995_v39 = vpop.f32.mrb[85].mxu1  ;;  %v3229_v31 = vmax.f32 %v3213_v9, 0.0  ;;  %v3230_v3 = vmax.f32 %v3214_v0, 0.0  ;;  %v3231_v47 = vmax.f32 %v3215_v41, 0.0 }
 0xa97   : > { %v3197_v30 = vadd.f32 %v6765_v29, %v2995_v39  ;;  %v5147_v40 = vpop.f32.mrb[86].mxu1  ;;  %v3232_v37 = vmax.f32 %v3216_v10, 0.0 }
 0xa98   : > { %v3219_v44 = vadd.f32 %v6775_v43, %v3199_v21  ;;  %v3200_v46 = vadd.f32 %v5147_v40, %v6765_v29  ;;  %v2998_v12 = vpop.f32.mrb[87].mxu1  ;;  %v3254_v19 = vpack.c.bf16 %v3230_v3, %v3229_v31 }
 0xa99   : > { %v3217_v33 = vadd.f32 %v6775_v43, %v3197_v30  ;;  %v3198_v27 = vadd.f32 %v6765_v29, %v2998_v12  ;;  %v3255_v52 = vpack.c.bf16 %v3232_v37, %v3231_v47 }
 0xa9a   : > { %v3220_v20 = vadd.f32 %v6775_v43, %v3200_v46  ;;  %5192 = vmatprep.mubr.msk.bf16.mxu0 %vm1015_vm0, %v3254_v19  ;;  %v3235_v15 = vmax.f32 %v3219_v44, 0.0 }
 0xa9b   : > { %v3218_v5 = vadd.f32 %v6775_v43, %v3198_v27  ;;  %5193 = vmatmul.mubr.msk.bf16.vlgmr.msra.gmra.mrb[76].mxu0 %vm1015_vm0, %v3255_v52  ;;  %v3233_v42 = vmax.f32 %v3217_v33, 0.0 }
 0xa9c   : > { %v3236_v28 = vmax.f32 %v3220_v20, 0.0  ;;  %v4651_v20 = vld [vmem:[%s7260_s2 + $0x9] ss:$0 sm:$0xff] }
 0xa9d   : > { %v3234_v14 = vmax.f32 %v3218_v5, 0.0  ;;  %v5150_v1 = vpop.f32.mrb[88].mxu1 }
 0xa9e   : > { %v3257_v32 = vpack.c.bf16 %v3236_v28, %v3235_v15  ;;  %v3203_v55 = vadd.f32 %v5150_v1, %v6765_v29  ;;  %v3011_v56 = vpop.f32.mrb[89].mxu1 }
 0xa9f   : > { %v3256_v26 = vpack.c.bf16 %v3234_v14, %v3233_v42  ;;  %v3201_v16 = vadd.f32 %v6765_v29, %v3011_v56  ;;  %v5151_v11 = vpop.f32.mrb[90].mxu1 }
 0xaa0   : > { %v3223_v38 = vadd.f32 %v6775_v43, %v3203_v55  ;;  %v3204_v13 = vadd.f32 %v5151_v11, %v6765_v29  ;;  %v3014_v62 = vpop.f32.mrb[91].mxu1 }
 0xaa1   : > { %v3221_v2 = vadd.f32 %v6775_v43, %v3201_v16  ;;  %v3202_v61 = vadd.f32 %v6765_v29, %v3014_v62  ;;  %5196 = vmatprep.mubr.msk.bf16.mxu0 %vm1015_vm0, %v3256_v26 }
 0xaa2   : > { %v3224_v36 = vadd.f32 %v6775_v43, %v3204_v13  ;;  %v3239_v53 = vmax.f32 %v3223_v38, 0.0 }
 0xaa3   : > { %v3222_v17 = vadd.f32 %v6775_v43, %v3202_v61  ;;  %5197 = vmatmul.mubr.msk.bf16.gmra.mrb[80].mxu0 %vm1015_vm0, %v3257_v32  ;;  %v3237_v54 = vmax.f32 %v3221_v2, 0.0 }
 0xaa4   : > { %v3240_v34 = vmax.f32 %v3224_v36, 0.0 }
 0xaa5   : > { %v3238_v22 = vmax.f32 %v3222_v17, 0.0  ;;  %v5154_v49 = vpop.f32.mrb[92].mxu1 }
 0xaa6   : > { %v3259_v23 = vpack.c.bf16 %v3240_v34, %v3239_v53  ;;  %v3207_v35 = vadd.f32 %v5154_v49, %v6765_v29  ;;  %v3027_v45 = vpop.f32.mrb[93].mxu1 }
 0xaa7   : > { %v3258_v57 = vpack.c.bf16 %v3238_v22, %v3237_v54  ;;  %v3205_v51 = vadd.f32 %v6765_v29, %v3027_v45  ;;  %v5155_v18 = vpop.f32.mrb[94].mxu1 }
 0xaa8   : > { %v3227_v58 = vadd.f32 %v6775_v43, %v3207_v35  ;;  %v3208_v4 = vadd.f32 %v5155_v18, %v6765_v29  ;;  %v3030_v24 = vpop.f32.mrb[95].mxu1 }
 0xaa9   : > { %v3225_v60 = vadd.f32 %v6775_v43, %v3205_v51  ;;  %v3206_v7 = vadd.f32 %v6765_v29, %v3030_v24  ;;  %5200 = vmatprep.mubr.msk.bf16.mxu0 %vm1015_vm0, %v3258_v57  ;;  %v5428_v24 = vld [vmem:[#allocation5 + $0x60] sm:$0xff]  }
 0xaaa   : > { %v3228_v8 = vadd.f32 %v6775_v43, %v3208_v4  ;;  %v3243_v9 = vmax.f32 %v3227_v58, 0.0  ;;  %5249 = vmatpush3.bf16.msra.mxu1 %v5428_v24 }
 0xaab   : > { %v3226_v25 = vadd.f32 %v6775_v43, %v3206_v7  ;;  %5201 = vmatmul.mubr.msk.bf16.gmra.mrb[84].mxu0 %vm1015_vm0, %v3259_v23  ;;  %v3241_v41 = vmax.f32 %v3225_v60, 0.0  ;;  %v5429_v60 = vld [vmem:[#allocation2 + $0x60] sm:$0xff]   ;;  %v5430_v7 = vld [vmem:[#allocation2 + $0x68] sm:$0xff]   ;;  %5250 = vmatprep.subr.bf16.mxu1 %v5580_v48 }
 0xaac   : > { %v3244_v0 = vmax.f32 %v3228_v8, 0.0  ;;  %5208 = vmatprep.subr.bf16.mxu0 %v5429_v60  ;;  %v5431_v8 = vld [vmem:[#allocation2 + $0x70] sm:$0xff]  }
 0xaad   : > { %v3242_v10 = vmax.f32 %v3226_v25, 0.0  ;;  %v6811_v63 = vpop.f32.mrb[96].mxu1  ;;  %5209 = vmatpush3.bf16.msra.mxu0 %v5429_v60  ;;  %v5432_v25 = vld [vmem:[#allocation2 + $0x78] sm:$0xff]  }
 0xaae   : > { %v3261_v21 = vpack.c.bf16 %v3244_v0, %v3243_v9  ;;  %v6813_v39 = vpop.f32.mrb[97].mxu1  ;;  %5210 = vmatprep.subr.bf16.mxu0 %v5430_v7  ;;  %v5433_v9 = vld [vmem:[#allocation5 + $0x68] sm:$0xff]  }
 0xaaf   : > { %v3260_v31 = vpack.c.bf16 %v3242_v10, %v3241_v41  ;;  %v6815_v3 = vpop.f32.mrb[98].mxu1  ;;  %5251 = vmatpush3.bf16.msra.mxu1 %v5433_v9  ;;  %v6868_v41 = vrot.slane %v6768_v50, %v6312_v6 }
 0xab0   : > { %v6817_v29 = vpop.f32.mrb[99].mxu1  ;;  %5252 = vmatprep.subr.bf16.mxu1 %v5580_v48 }
 0xab1   : > { %5204 = vmatprep.mubr.msk.bf16.mxu0 %vm1015_vm0, %v3260_v31  ;;  %5211 = vmatpush3.bf16.msra.mxu0 %v5430_v7 }
 0xab2   : > { %5212 = vmatprep.subr.bf16.mxu0 %v5431_v8 }
 0xab3   : > { %5205 = vmatmul.mubr.msk.bf16.gmra.mrb[88].mxu0 %vm1015_vm0, %v3261_v21 }
 0xab5   : > { %v6821_v43 = vpop.f32.mrb[100].mxu1  ;;  %5213 = vmatpush3.bf16.msra.mxu0 %v5431_v8 }
 0xab6   : > { %v6823_v47 = vpop.f32.mrb[101].mxu1  ;;  %5214 = vmatprep.subr.bf16.mxu0 %v5432_v25 }
 0xab7   : > { %v6825_v30 = vpop.f32.mrb[102].mxu1 }
 0xab8   : > { %v6827_v40 = vpop.f32.mrb[103].mxu1 }
 0xab9   : > { %5215 = vmatpush3.bf16.msra.mxu0 %v5432_v25 }
 0xabd   : > { %v6829_v37 = vpop.f32.mrb[104].mxu1 }
 0xabe   : > { %v6831_v44 = vpop.f32.mrb[105].mxu1 }
 0xabf   : > { %v6833_v46 = vpop.f32.mrb[106].mxu1 }
 0xac0   : > { %v6835_v12 = vpop.f32.mrb[107].mxu1 }
 0xac5   : > { %v6837_v19 = vpop.f32.mrb[108].mxu1 }
 0xac6   : > { %v6839_v33 = vpop.f32.mrb[109].mxu1 }
 0xac7   : > { %v6841_v27 = vpop.f32.mrb[110].mxu1 }
 0xac8   : > { %v6843_v52 = vpop.f32.mrb[111].mxu1 }
 0xb6e   : > { %v5194_v5 = vpop.f32.mrb[76].mxu0 }
 0xb6f   : > { %v3358_v15 = vadd.f32 %v5194_v5, %v4651_v20  ;;  %v3349_v28 = vpop.f32.mrb[77].mxu0 }
 0xb70   : > { %v5195_v42 = vpop.f32.mrb[78].mxu0  ;;  %v3350_v32 = vadd.f32 %v4651_v20, %v3349_v28 }
 0xb71   : > { %v3361_v14 = vadd.f32 %v5195_v42, %v4651_v20  ;;  %3432 = vrot.lane.b32.xlu0 %v3358_v15, %s5579_s18  ;;  %v3352_v1 = vpop.f32.mrb[79].mxu0 }
 0xb72   : > { %v3353_v55 = vadd.f32 %v4651_v20, %v3352_v1 }
 0xb73   : > { %3434 = vrot.lane.b32.xlu1 %v3361_v14, %s5579_s18 }
 0xb75   : > { %3428 = vrot.lane.b32.xlu0 %v3350_v32, %s5579_s18 }
 0xb76   : > { %v5198_v56 = vpop.f32.mrb[80].mxu0 }
 0xb77   : > { %v3374_v26 = vadd.f32 %v5198_v56, %v4651_v20  ;;  %3430 = vrot.lane.b32.xlu1 %v3353_v55, %s5579_s18  ;;  %v3365_v16 = vpop.f32.mrb[81].mxu0 }
 0xb78   : > { %v5199_v11 = vpop.f32.mrb[82].mxu0  ;;  %v3366_v62 = vadd.f32 %v4651_v20, %v3365_v16 }
 0xb79   : > { %v3377_v38 = vadd.f32 %v5199_v11, %v4651_v20  ;;  %3440 = vrot.lane.b32.xlu0 %v3374_v26, %s5579_s18  ;;  %v3368_v13 = vpop.f32.mrb[83].mxu0 }
 0xb7a   : > { %v3369_v2 = vadd.f32 %v4651_v20, %v3368_v13 }
 0xb7b   : > { %3442 = vrot.lane.b32.xlu1 %v3377_v38, %s5579_s18  ;;  %v5434_v38 = vld [vmem:[#allocation5 + $0x70] sm:$0xff]  }
 0xb7c   : > { %5253 = vmatpush3.bf16.msra.mxu1 %v5434_v38 }
 0xb7d   : > { %3436 = vrot.lane.b32.xlu0 %v3366_v62, %s5579_s18  ;;  %5254 = vmatprep.subr.bf16.mxu1 %v5580_v48 }
 0xb7e   : > { %v5202_v61 = vpop.f32.mrb[84].mxu0 }
 0xb7f   : > { %v3390_v36 = vadd.f32 %v5202_v61, %v4651_v20  ;;  %3438 = vrot.lane.b32.xlu1 %v3369_v2, %s5579_s18  ;;  %v3381_v17 = vpop.f32.mrb[85].mxu0 }
 0xb80   : > { %v5203_v53 = vpop.f32.mrb[86].mxu0  ;;  %v3382_v22 = vadd.f32 %v4651_v20, %v3381_v17 }
 0xb81   : > { %v3393_v34 = vadd.f32 %v5203_v53, %v4651_v20  ;;  %3448 = vrot.lane.b32.xlu0 %v3390_v36, %s5579_s18  ;;  %v3384_v54 = vpop.f32.mrb[87].mxu0 }
 0xb82   : > { %v3385_v49 = vadd.f32 %v4651_v20, %v3384_v54 }
 0xb83   : > { %3450 = vrot.lane.b32.xlu1 %v3393_v34, %s5579_s18 }
 0xb85   : > { %3444 = vrot.lane.b32.xlu0 %v3382_v22, %s5579_s18 }
 0xb86   : > { %v5206_v23 = vpop.f32.mrb[88].mxu0 }
 0xb87   : > { %3446 = vrot.lane.b32.xlu1 %v3385_v49, %s5579_s18  ;;  %v3397_v35 = vpop.f32.mrb[89].mxu0  ;;  %v3406_v58 = vadd.f32 %v5206_v23, %v4651_v20 }
 0xb88   : > { %v3398_v45 = vadd.f32 %v4651_v20, %v3397_v35  ;;  %v5207_v57 = vpop.f32.mrb[90].mxu0 }
 0xb89   : > { %v3400_v51 = vpop.f32.mrb[91].mxu0  ;;  %v3409_v4 = vadd.f32 %v5207_v57, %v4651_v20 }
 0xb8a   : > { %v3401_v18 = vadd.f32 %v4651_v20, %v3400_v51  ;;  %3452 = vrot.lane.b32.xlu0 %v3398_v45, %s5579_s18 }
 0xb8c   : > { %3454 = vrot.lane.b32.xlu1 %v3401_v18, %s5579_s18 }
 0xb8e   : > { %3456 = vrot.lane.b32.xlu0 %v3406_v58, %s5579_s18 }
 0xb90   : > { %3458 = vrot.lane.b32.xlu1 %v3409_v4, %s5579_s18 }
 0xbe3   : > { %v3433_v0 = vpop.permute.xlu0 %3432 }
 0xbe4   : > { %v3478_v10 = vadd.f32 %v6811_v63, %v3433_v0 }
 0xbe5   : > { %v3435_v21 = vpop.permute.xlu1 %3434 }
 0xbe6   : > { %v6872_v31 = vadd.f32 %v6868_v41, %v3478_v10  ;;  %v3479_v20 = vadd.f32 %v6815_v3, %v3435_v21 }
 0xbe7   : > { %v3429_v5 = vpop.permute.xlu0 %3428 }
 0xbe8   : > { %v6876_v15 = vadd.f32 %v6868_v41, %v3479_v20  ;;  %v3476_v28 = vadd.f32 %v3429_v5, %v6813_v39  ;;  %v3551_v14 = vmax.f32 %v6872_v31, 0.0  ;;  %v3514_v2 = vsel %vm1217_vm1, %v6872_v31, -inf }
 0xbe9   : > { %v3431_v42 = vpop.permute.xlu1 %3430 }
 0xbea   : > { %v3552_v50 = vmax.f32 %v6876_v15, 0.0  ;;  %v3583_v63 = vpack.c.bf16 %v6876_v15, %v6872_v31  ;;  %v6884_v1 = vadd.f32 %v6868_v41, %v3476_v28  ;;  %v3477_v32 = vadd.f32 %v3431_v42, %v6817_v29 }
 0xbeb   : > { %v3441_v3 = vpop.permute.xlu0 %3440  ;;  %v3515_v17 = vsel %vm1217_vm1, %v6876_v15, -inf }
 0xbec   : > { %v3482_v55 = vadd.f32 %v6821_v43, %v3441_v3  ;;  %v3575_v56 = vpack.c.bf16 %v3552_v50, %v3551_v14  ;;  %v6889_v26 = vadd.f32 %v6868_v41, %v3477_v32  ;;  %v3549_v13 = vmax.f32 %v6884_v1, 0.0 }
 0xbed   : > { %v3443_v39 = vpop.permute.xlu1 %3442  ;;  %v3512_v18 = vsel %vm1217_vm1, %v6884_v1, -inf }
 0xbee   : > { %v6892_v16 = vadd.f32 %v6868_v41, %v3482_v55  ;;  %v3483_v11 = vadd.f32 %v6825_v30, %v3443_v39  ;;  %3608 = vrot.lane.b32.xlu1 %v3575_v56, %s5579_s18  ;;  %v3550_v29 = vmax.f32 %v6889_v26, 0.0  ;;  %v3582_v43 = vpack.c.bf16 %v6889_v26, %v6884_v1 }
 0xbef   : > { %v3437_v62 = vpop.permute.xlu0 %3436 }
 0xbf0   : > { %v3520_v61 = vsel %vm1217_vm1, %v6892_v16, -inf  ;;  %v6905_v36 = vadd.f32 %v6868_v41, %v3483_v11  ;;  %v3480_v30 = vadd.f32 %v3437_v62, %v6823_v47  ;;  %v3555_v34 = vmax.f32 %v6892_v16, 0.0 }
 0xbf1   : > { %v3521_v53 = vmax.f32 %v3514_v2, %v3520_v61  ;;  %v3439_v54 = vpop.permute.xlu1 %3438  ;;  %v3574_v22 = vpack.c.bf16 %v3550_v29, %v3549_v13 }
 0xbf2   : > { %v3522_v49 = vsel %vm1217_vm1, %v6905_v36, -inf  ;;  %v3556_v23 = vmax.f32 %v6905_v36, 0.0  ;;  %v3585_v35 = vpack.c.bf16 %v6905_v36, %v6892_v16  ;;  %v6918_v47 = vadd.f32 %v6868_v41, %v3480_v30 }
 0xbf3   : > { %v3523_v45 = vmax.f32 %v3515_v17, %v3522_v49  ;;  %v3481_v57 = vadd.f32 %v3439_v54, %v6827_v40  ;;  %3606 = vrot.lane.b32.xlu0 %v3574_v22, %s5579_s18  ;;  %v3449_v51 = vpop.permute.xlu0 %3448  ;;  %v3513_v40 = vsel %vm1217_vm1, %v6889_v26, -inf }
 0xbf4   : > { %v3516_v58 = vsel %vm1217_vm1, %v6918_v47, -inf  ;;  %v3486_v4 = vadd.f32 %v6829_v37, %v3449_v51  ;;  %v6927_v24 = vpack.c.bf16 %v3556_v23, %v3555_v34  ;;  %v3553_v0 = vmax.f32 %v6918_v47, 0.0 }
 0xbf5   : > { %v3517_v60 = vmax.f32 %v3512_v18, %v3516_v58  ;;  %v6930_v7 = vadd.f32 %v6868_v41, %v3481_v57  ;;  %v3451_v8 = vpop.permute.xlu1 %3450 }
 0xbf6   : > { %v6935_v25 = vadd.f32 %v6868_v41, %v3486_v4  ;;  %v3487_v9 = vadd.f32 %v6833_v46, %v3451_v8 }
 0xbf7   : > { %v3518_v37 = vsel %vm1217_vm1, %v6930_v7, -inf  ;;  %v3554_v10 = vmax.f32 %v6930_v7, 0.0  ;;  %v3584_v21 = vpack.c.bf16 %v6930_v7, %v6918_v47  ;;  %v3445_v20 = vpop.permute.xlu0 %3444 }
 0xbf8   : > { %v3519_v5 = vmax.f32 %v3513_v40, %v3518_v37  ;;  %v3528_v28 = vsel %vm1217_vm1, %v6935_v25, -inf  ;;  %v6947_v42 = vadd.f32 %v6868_v41, %v3487_v9  ;;  %v3559_v46 = vmax.f32 %v6935_v25, 0.0 }
 0xbf9   : > { %v3529_v14 = vmax.f32 %v3521_v53, %v3528_v28  ;;  %v3484_v50 = vadd.f32 %v3445_v20, %v6831_v44  ;;  %v3447_v32 = vpop.permute.xlu1 %3446  ;;  %v3576_v3 = vpack.c.bf16 %v3554_v10, %v3553_v0 }
 0xbfa   : > { %v3530_v55 = vsel %vm1217_vm1, %v6947_v42, -inf  ;;  %v3560_v56 = vmax.f32 %v6947_v42, 0.0  ;;  %v3587_v39 = vpack.c.bf16 %v6947_v42, %v6935_v25  ;;  %v3485_v11 = vadd.f32 %v3447_v32, %v6835_v12 }
 0xbfb   : > { %v3531_v38 = vmax.f32 %v3523_v45, %v3530_v55  ;;  %v3504_v13 = vadd.f32 %v6868_v41, %v3484_v50  ;;  %3610 = vrot.lane.b32.xlu1 %v3576_v3, %s5579_s18 }
 0xbfc   : > { %v3505_v29 = vadd.f32 %v6868_v41, %v3485_v11  ;;  %v3453_v44 = vpop.permute.xlu0 %3452  ;;  %v3579_v62 = vpack.c.bf16 %v3560_v56, %v3559_v46 }
 0xbfd   : > { %v3524_v2 = vsel %vm1217_vm1, %v3504_v13, -inf  ;;  %v3557_v61 = vmax.f32 %v3504_v13, 0.0  ;;  %v3488_v30 = vadd.f32 %v3453_v44, %v6839_v33  ;;  %v5435_v33 = vld [vmem:[#allocation5 + $0x78] sm:$0xff]  }
 0xbfe   : > { %v3525_v17 = vmax.f32 %v3517_v60, %v3524_v2  ;;  %v3526_v53 = vsel %vm1217_vm1, %v3505_v29, -inf  ;;  %v3558_v34 = vmax.f32 %v3505_v29, 0.0  ;;  %v3586_v54 = vpack.c.bf16 %v3505_v29, %v3504_v13  ;;  %v3455_v12 = vpop.permute.xlu1 %3454  ;;  %5255 = vmatpush3.bf16.msra.mxu1 %v5435_v33 }
 0xbff   : > { %v3527_v22 = vmax.f32 %v3519_v5, %v3526_v53  ;;  %v3508_v49 = vadd.f32 %v6868_v41, %v3488_v30  ;;  %v3489_v23 = vadd.f32 %v3455_v12, %v6843_v52  ;;  %v5436_v30 = vld [vmem:[%s7264_s6 + $0x80] sm:$0xff]   ;;  %v5439_v12 = vld [vmem:[%s7264_s6 + $0x98] sm:$0xff]  }
 0xc00   : > { %v3457_v45 = vpop.permute.xlu0 %3456  ;;  %v3578_v57 = vpack.c.bf16 %v3558_v34, %v3557_v61  ;;  %5260 = vmatprep.subr.bf16.mxu1 %v5436_v30 }
 0xc01   : > { %v3532_v51 = vsel %vm1217_vm1, %v3508_v49, -inf  ;;  %v3509_v18 = vadd.f32 %v6868_v41, %v3489_v23  ;;  %v3490_v58 = vadd.f32 %v6837_v19, %v3457_v45  ;;  %v3561_v60 = vmax.f32 %v3508_v49, 0.0 }
 0xc02   : > { %v3533_v4 = vmax.f32 %v3525_v17, %v3532_v51  ;;  %3614 = vrot.lane.b32.xlu1 %v3578_v57, %s5579_s18  ;;  %v3459_v8 = vpop.permute.xlu1 %3458  ;;  %v5437_v17 = vld [vmem:[%s7264_s6 + $0x88] sm:$0xff]   ;;  %v7038_v57 = vld [vmem:[%s7260_s2 + $0x5] ss:$0 sm:$0xff] }
 0xc03   : > { %v3534_v40 = vsel %vm1217_vm1, %v3509_v18, -inf  ;;  %v3562_v9 = vmax.f32 %v3509_v18, 0.0  ;;  %v3588_v0 = vpack.c.bf16 %v3509_v18, %v3508_v49  ;;  %v3510_v52 = vadd.f32 %v6868_v41, %v3490_v58 }
 0xc04   : > { %v3535_v37 = vmax.f32 %v3527_v22, %v3534_v40  ;;  %v3491_v10 = vadd.f32 %v6841_v27, %v3459_v8 }
 0xc05   : > { %v3536_v20 = vsel %vm1217_vm1, %v3510_v52, -inf  ;;  %v3580_v5 = vpack.c.bf16 %v3562_v9, %v3561_v60  ;;  %v3563_v50 = vmax.f32 %v3510_v52, 0.0 }
 0xc06   : > { %v3540_v19 = vmax.f32 %v3533_v4, %v3535_v37  ;;  %v3537_v28 = vmax.f32 %v3529_v14, %v3536_v20  ;;  %v3511_v46 = vadd.f32 %v6868_v41, %v3491_v10 }
 0xc07   : > { %3618 = vrot.lane.b32.xlu1 %v3580_v5, %s5579_s18 }
 0xc08   : > { %v3538_v32 = vsel %vm1217_vm1, %v3511_v46, -inf  ;;  %v3564_v3 = vmax.f32 %v3511_v46, 0.0  ;;  %v3589_v55 = vpack.c.bf16 %v3511_v46, %v3510_v52 }
 0xc09   : > { %v3539_v56 = vmax.f32 %v3531_v38, %v3538_v32 }
 0xc0a   : > { %v3581_v11 = vpack.c.bf16 %v3564_v3, %v3563_v50 }
 0xc0b   : > { %v3541_v13 = vmax.f32 %v3537_v28, %v3539_v56  ;;  %3622 = vrot.lane.b32.xlu1 %v3582_v43, %s5579_s18 }
 0xc0d   : > { %v3542_v27 = vmax.f32 %v3540_v19, %v3541_v13 }
 0xc0f   : > { %v3543_v29 = vrot.slane %v3542_v27, 4  ;;  %3626 = vrot.lane.b32.xlu1 %v3584_v21, %s5579_s18 }
 0xc11   : > { %v3544_v41 = vmax.f32 %v3542_v27, %v3543_v29 }
 0xc13   : > { %v3545_v14 = vrot.slane %v3544_v41, 2  ;;  %3630 = vrot.lane.b32.xlu1 %v3586_v54, %s5579_s18  ;;  %v5438_v54 = vld [vmem:[%s7264_s6 + $0x90] sm:$0xff]  }
 0xc15   : > { %v3546_v44 = vmax.f32 %v3544_v41, %v3545_v14 }
 0xc17   : > { %3634 = vrot.lane.b32.xlu1 %v3588_v0, %s5579_s18  ;;  %v3547_v38 = vrot.slane %v3546_v44, 1 }
 0xc19   : > { %v3548_v2 = vmax.f32 %v3546_v44, %v3547_v38 }
 0xc1b   : > { %v3871_v61 = vmax.f32 %v3548_v2, 0.0 }
 0xc1d   : > { %v3872_v1 = vsel %vm1577_vm3, %v3871_v61, %v3548_v2 }
 0xc1e   : > { %v3882_v26 = vpack.c.bf16 %v3872_v1, %v3872_v1 }
 0xc20   : > { %3884 = vrot.lane.b32.xlu0 %v3882_v26, %s5579_s18 }
 0xc24   : > { %3612 = vrot.lane.b32.xlu0 %v6927_v24, %s5579_s18 }
 0xc28   : > { %3616 = vrot.lane.b32.xlu0 %v3579_v62, %s5579_s18 }
 0xc2c   : > { %3620 = vrot.lane.b32.xlu0 %v3581_v11, %s5579_s18 }
 0xc30   : > { %3624 = vrot.lane.b32.xlu0 %v3583_v63, %s5579_s18 }
 0xc34   : > { %3628 = vrot.lane.b32.xlu0 %v3585_v35, %s5579_s18 }
 0xc38   : > { %3632 = vrot.lane.b32.xlu0 %v3587_v39, %s5579_s18 }
 0xc3c   : > { %3636 = vrot.lane.b32.xlu0 %v3589_v55, %s5579_s18 }
 0xc60   : > { %v3609_v47 = vpop.permute.xlu1 %3608 }
 0xc65   : > { %v3607_v43 = vpop.permute.xlu0 %3606 }
 0xc66   : > { %5216 = vmatprep.mubr.msk.bf16.mxu0 %vm1015_vm0, %v3607_v43 }
 0xc67   : > { %5217 = vmatmul.mubr.msk.bf16.vlgmr.msra.gmra.mrb[92].mxu0 %vm1015_vm0, %v3609_v47 }
 0xc6d   : > { %v3611_v31 = vpop.permute.xlu1 %3610 }
 0xc6e   : > { %5220 = vmatprep.mubr.msk.bf16.mxu0 %vm1015_vm0, %v3611_v31 }
 0xc74   : > { %v3615_v16 = vpop.permute.xlu1 %3614 }
 0xc79   : > { %v3619_v35 = vpop.permute.xlu1 %3618 }
 0xc7d   : > { %v3623_v7 = vpop.permute.xlu1 %3622 }
 0xc81   : > { %v3627_v21 = vpop.permute.xlu1 %3626 }
 0xc85   : > { %v3631_v39 = vpop.permute.xlu1 %3630 }
 0xc89   : > { %v3635_v53 = vpop.permute.xlu1 %3634 }
 0xc92   : > { %v3885_v15 = vpop.permute.xlu0 %3884 }
 0xc93   : > { %5257 = vmatmul.mubr.msk.bf16.vlgmr.msra.gmra.mrb[112].mxu1 %vm1015_vm0, %v3885_v15 }
 0xc94   : > { %5261 = vmatpush3.bf16.msra.mxu1 %v5436_v30 }
 0xc95   : > { %5262 = vmatprep.subr.bf16.mxu1 %v5437_v17 }
 0xc96   : > { %v3613_v63 = vpop.permute.xlu0 %3612 }
 0xc97   : > { %5221 = vmatmul.mubr.msk.bf16.gmra.mrb[96].mxu0 %vm1015_vm0, %v3613_v63 }
 0xc98   : > { %5224 = vmatprep.mubr.msk.bf16.mxu0 %vm1015_vm0, %v3615_v16  ;;  %5263 = vmatpush3.bf16.msra.mxu1 %v5437_v17 }
 0xc99   : > { %5264 = vmatprep.subr.bf16.mxu1 %v5438_v54 }
 0xc9a   : > { %v3617_v36 = vpop.permute.xlu0 %3616 }
 0xc9c   : > { %5265 = vmatpush3.bf16.msra.mxu1 %v5438_v54 }
 0xc9d   : > { %5266 = vmatprep.subr.bf16.mxu1 %v5439_v12 }
 0xc9e   : > { %v3621_v24 = vpop.permute.xlu0 %3620 }
 0xc9f   : > { %5225 = vmatmul.mubr.msk.bf16.gmra.mrb[100].mxu0 %vm1015_vm0, %v3617_v36 }
 0xca0   : > { %5228 = vmatprep.mubr.msk.bf16.mxu0 %vm1015_vm0, %v3619_v35  ;;  %5267 = vmatpush3.bf16.msra.mxu1 %v5439_v12 }
 0xca1   : > { %5284 = vmatprep.subr.bf16.mxu1 %v5580_v48 }
 0xca2   : > { %v3625_v25 = vpop.permute.xlu0 %3624 }
 0xca6   : > { %v3629_v42 = vpop.permute.xlu0 %3628 }
 0xca7   : > { %5229 = vmatmul.mubr.msk.bf16.gmra.mrb[104].mxu0 %vm1015_vm0, %v3621_v24 }
 0xca8   : > { %5232 = vmatprep.mubr.msk.bf16.mxu0 %vm1015_vm0, %v3623_v7 }
 0xcaa   : > { %v3633_v62 = vpop.permute.xlu0 %3632 }
 0xcae   : > { %v3637_v34 = vpop.permute.xlu0 %3636 }
 0xcaf   : > { %5233 = vmatmul.mubr.msk.bf16.gmra.mrb[108].mxu0 %vm1015_vm0, %v3625_v25 }
 0xcb0   : > { %5236 = vmatprep.mubr.msk.bf16.mxu0 %vm1015_vm0, %v3627_v21 }
 0xcb7   : > { %5237 = vmatmul.mubr.msk.bf16.gmra.mrb[112].mxu0 %vm1015_vm0, %v3629_v42 }
 0xcb8   : > { %5240 = vmatprep.mubr.msk.bf16.mxu0 %vm1015_vm0, %v3631_v39 }
 0xcbf   : > { %5241 = vmatmul.mubr.msk.bf16.gmra.mrb[116].mxu0 %vm1015_vm0, %v3633_v62 }
 0xcc0   : > { %5244 = vmatprep.mubr.msk.bf16.mxu0 %vm1015_vm0, %v3635_v53 }
 0xcc7   : > { %5245 = vmatmul.mubr.msk.bf16.gmra.mrb[120].mxu0 %vm1015_vm0, %v3637_v34 }
 0xd3a   : > { %v5218_v22 = vpop.f32.mrb[92].mxu0 }
 0xd3b   : > { %v3744_v49 = vpop.f32.mrb[93].mxu0  ;;  %v3960_v51 = vadd.f32 %v5218_v22, %v7038_v57 }
 0xd3c   : > { %v5219_v23 = vpop.f32.mrb[94].mxu0  ;;  %v3958_v58 = vadd.f32 %v7038_v57, %v3744_v49 }
 0xd3d   : > { %v3747_v45 = vpop.f32.mrb[95].mxu0  ;;  %v3961_v33 = vadd.f32 %v5219_v23, %v7038_v57 }
 0xd3e   : > { %v3959_v4 = vadd.f32 %v7038_v57, %v3747_v45 }
 0xd66   : > { %v7041_v18 = vpop.f32.mrb[112].mxu1 }
 0xd67   : > { %v7048_v60 = vrot.slane %v7041_v18, %v6210_v59  ;;  %v5258_v8 = vpop.f32.mrb[113].mxu1 }
 0xd68   : > { %v3950_v40 = vpop.f32.mrb[114].mxu1 }
 0xd69   : > { %v5259_v9 = vpop.f32.mrb[115].mxu1  ;;  %v3978_v0 = vadd.f32 %v7048_v60, %v3958_v58  ;;  %v3979_v52 = vadd.f32 %v7048_v60, %v3959_v4  ;;  %v3980_v37 = vadd.f32 %v7048_v60, %v3960_v51  ;;  %v3981_v10 = vadd.f32 %v7048_v60, %v3961_v33 }
 0xd6a   : > { %v5222_v20 = vpop.f32.mrb[96].mxu0 }
 0xd6b   : > { %v3964_v5 = vadd.f32 %v5222_v20, %v7038_v57  ;;  %v3760_v19 = vpop.f32.mrb[97].mxu0  ;;  %v3994_v28 = vmax.f32 %v3978_v0, 0.0  ;;  %v3995_v46 = vmax.f32 %v3979_v52, 0.0  ;;  %v3996_v50 = vmax.f32 %v3980_v37, 0.0 }
 0xd6c   : > { %v3962_v59 = vadd.f32 %v7038_v57, %v3760_v19  ;;  %v5223_v32 = vpop.f32.mrb[98].mxu0  ;;  %v3997_v3 = vmax.f32 %v3981_v10, 0.0 }
 0xd6d   : > { %v3984_v55 = vadd.f32 %v7048_v60, %v3964_v5  ;;  %v3965_v56 = vadd.f32 %v5223_v32, %v7038_v57  ;;  %v3763_v11 = vpop.f32.mrb[99].mxu0  ;;  %v4019_v13 = vpack.c.bf16 %v3995_v46, %v3994_v28 }
 0xd6e   : > { %v3982_v27 = vadd.f32 %v7048_v60, %v3962_v59  ;;  %v3963_v29 = vadd.f32 %v7038_v57, %v3763_v11  ;;  %v4020_v41 = vpack.c.bf16 %v3997_v3, %v3996_v50 }
 0xd6f   : > { %v3985_v14 = vadd.f32 %v7048_v60, %v3965_v56  ;;  %5268 = vmatprep.mubr.msk.bf16.mxu1 %vm1015_vm0, %v4019_v13  ;;  %v4000_v38 = vmax.f32 %v3984_v55, 0.0 }
 0xd70   : > { %v3983_v44 = vadd.f32 %v7048_v60, %v3963_v29  ;;  %5269 = vmatmul.mubr.msk.bf16.vlgmr.msra.gmra.mrb[116].mxu1 %vm1015_vm0, %v4020_v41  ;;  %v3998_v61 = vmax.f32 %v3982_v27, 0.0  ;;  %v4698_v41 = vld [vmem:[%s7260_s2 + $0xa] ss:$0 sm:$0xff] }
 0xd71   : > { %v4001_v2 = vmax.f32 %v3985_v14, 0.0 }
 0xd72   : > { %v3999_v1 = vmax.f32 %v3983_v44, 0.0  ;;  %v5226_v26 = vpop.f32.mrb[100].mxu0 }
 0xd73   : > { %v4022_v43 = vpack.c.bf16 %v4001_v2, %v4000_v38  ;;  %v3968_v47 = vadd.f32 %v5226_v26, %v7038_v57  ;;  %v3776_v31 = vpop.f32.mrb[101].mxu0 }
 0xd74   : > { %v4021_v15 = vpack.c.bf16 %v3999_v1, %v3998_v61  ;;  %v3966_v63 = vadd.f32 %v7038_v57, %v3776_v31  ;;  %v5227_v16 = vpop.f32.mrb[102].mxu0 }
 0xd75   : > { %v3988_v36 = vadd.f32 %v7048_v60, %v3968_v47  ;;  %v3969_v35 = vadd.f32 %v5227_v16, %v7038_v57  ;;  %v3779_v24 = vpop.f32.mrb[103].mxu0 }
 0xd76   : > { %v3986_v7 = vadd.f32 %v7048_v60, %v3966_v63  ;;  %v3967_v25 = vadd.f32 %v7038_v57, %v3779_v24  ;;  %5272 = vmatprep.mubr.msk.bf16.mxu1 %vm1015_vm0, %v4021_v15 }
 0xd77   : > { %v3989_v21 = vadd.f32 %v7048_v60, %v3969_v35  ;;  %v4004_v39 = vmax.f32 %v3988_v36, 0.0 }
 0xd78   : > { %v3987_v42 = vadd.f32 %v7048_v60, %v3967_v25  ;;  %5273 = vmatmul.mubr.msk.bf16.gmra.mrb[120].mxu1 %vm1015_vm0, %v4022_v43  ;;  %v4002_v30 = vmax.f32 %v3986_v7, 0.0 }
 0xd79   : > { %v4005_v62 = vmax.f32 %v3989_v21, 0.0 }
 0xd7a   : > { %v4003_v17 = vmax.f32 %v3987_v42, 0.0  ;;  %v5230_v53 = vpop.f32.mrb[104].mxu0 }
 0xd7b   : > { %v4024_v34 = vpack.c.bf16 %v4005_v62, %v4004_v39  ;;  %v3972_v54 = vadd.f32 %v5230_v53, %v7038_v57  ;;  %v3792_v12 = vpop.f32.mrb[105].mxu0 }
 0xd7c   : > { %v4023_v22 = vpack.c.bf16 %v4003_v17, %v4002_v30  ;;  %v3970_v49 = vadd.f32 %v7038_v57, %v3792_v12  ;;  %v5231_v23 = vpop.f32.mrb[106].mxu0 }
 0xd7d   : > { %v3992_v45 = vadd.f32 %v7048_v60, %v3972_v54  ;;  %v3973_v51 = vadd.f32 %v5231_v23, %v7038_v57  ;;  %v3795_v58 = vpop.f32.mrb[107].mxu0 }
 0xd7e   : > { %v3990_v33 = vadd.f32 %v7048_v60, %v3970_v49  ;;  %v3971_v4 = vadd.f32 %v7038_v57, %v3795_v58  ;;  %5276 = vmatprep.mubr.msk.bf16.mxu1 %vm1015_vm0, %v4023_v22  ;;  %v5441_v58 = vld [vmem:[%s7265_s7 + $0x8] sm:$0xff]  }
 0xd7f   : > { %v3993_v8 = vadd.f32 %v7048_v60, %v3973_v51  ;;  %v4008_v9 = vmax.f32 %v3992_v45, 0.0  ;;  %v5440_v51 = vld [vmem:[%s7265_s7] sm:$0xff]  }
 0xd80   : > { %v3991_v40 = vadd.f32 %v7048_v60, %v3971_v4  ;;  %5277 = vmatmul.mubr.msk.bf16.gmra.mrb[124].mxu1 %vm1015_vm0, %v4024_v34  ;;  %v4006_v52 = vmax.f32 %v3990_v33, 0.0  ;;  %v5442_v33 = vld [vmem:[%s7265_s7 + $0x10] sm:$0xff]   ;;  %v5443_v4 = vld [vmem:[%s7265_s7 + $0x18] sm:$0xff]  }
 0xd81   : > { %v4009_v0 = vmax.f32 %v3993_v8, 0.0  ;;  %5285 = vmatpush3.bf16.msra.mxu1 %v5440_v51 }
 0xd82   : > { %v4007_v37 = vmax.f32 %v3991_v40, 0.0  ;;  %v7084_v10 = vpop.f32.mrb[108].mxu0  ;;  %5286 = vmatprep.subr.bf16.mxu1 %v5580_v48  ;;  %v7156_v40 = vrot.slane %v7041_v18, %v6312_v6 }
 0xd83   : > { %v4026_v20 = vpack.c.bf16 %v4009_v0, %v4008_v9  ;;  %v7086_v5 = vpop.f32.mrb[109].mxu0 }
 0xd84   : > { %v4025_v19 = vpack.c.bf16 %v4007_v37, %v4006_v52  ;;  %v7088_v28 = vpop.f32.mrb[110].mxu0 }
 0xd85   : > { %v7090_v57 = vpop.f32.mrb[111].mxu0  ;;  %5287 = vmatpush3.bf16.msra.mxu1 %v5441_v58 }
 0xd86   : > { %5280 = vmatprep.mubr.msk.bf16.mxu1 %vm1015_vm0, %v4025_v19  ;;  %5288 = vmatprep.subr.bf16.mxu1 %v5580_v48 }
 0xd88   : > { %5281 = vmatmul.mubr.msk.bf16.gmra.mrb[128].mxu1 %vm1015_vm0, %v4026_v20 }
 0xd89   : > { %5292 = vmatprep.mubr.msk.bf16.mxu1 %vm5581_vm2, %v5580_v48  ;;  %5289 = vmatpush3.bf16.msra.mxu1 %v5442_v33 }
 0xd8a   : > { %v7096_v60 = vpop.f32.mrb[112].mxu0  ;;  %5290 = vmatprep.subr.bf16.mxu1 %v5580_v48 }
 0xd8b   : > { %v7098_v46 = vpop.f32.mrb[113].mxu0 }
 0xd8c   : > { %v7100_v50 = vpop.f32.mrb[114].mxu0 }
 0xd8d   : > { %v7102_v59 = vpop.f32.mrb[115].mxu0  ;;  %5291 = vmatpush3.bf16.msra.mxu1 %v5443_v4 }
 0xd92   : > { %v7104_v32 = vpop.f32.mrb[116].mxu0 }
 0xd93   : > { %v7106_v3 = vpop.f32.mrb[117].mxu0 }
 0xd94   : > { %v7108_v55 = vpop.f32.mrb[118].mxu0 }
 0xd95   : > { %v7110_v56 = vpop.f32.mrb[119].mxu0 }
 0xd9a   : > { %v7112_v11 = vpop.f32.mrb[120].mxu0 }
 0xd9b   : > { %v7114_v13 = vpop.f32.mrb[121].mxu0 }
 0xd9c   : > { %v7116_v27 = vpop.f32.mrb[122].mxu0 }
 0xd9d   : > { %v7118_v29 = vpop.f32.mrb[123].mxu0 }
 0xe43   : > { %v5270_v14 = vpop.f32.mrb[116].mxu1 }
 0xe44   : > { %v4123_v44 = vadd.f32 %v5270_v14, %v4698_v41  ;;  %v4114_v38 = vpop.f32.mrb[117].mxu1 }
 0xe45   : > { %v5271_v2 = vpop.f32.mrb[118].mxu1  ;;  %v4115_v26 = vadd.f32 %v4698_v41, %v4114_v38 }
 0xe46   : > { %v4126_v61 = vadd.f32 %v5271_v2, %v4698_v41  ;;  %4197 = vrot.lane.b32.xlu1 %v4123_v44, %s5579_s18  ;;  %v4117_v1 = vpop.f32.mrb[119].mxu1 }
 0xe47   : > { %v4118_v43 = vadd.f32 %v4698_v41, %v4117_v1 }
 0xe48   : > { %4199 = vrot.lane.b32.xlu0 %v4126_v61, %s5579_s18 }
 0xe4a   : > { %4193 = vrot.lane.b32.xlu1 %v4115_v26, %s5579_s18 }
 0xe4b   : > { %v5274_v47 = vpop.f32.mrb[120].mxu1 }
 0xe4c   : > { %v4139_v31 = vadd.f32 %v5274_v47, %v4698_v41  ;;  %4195 = vrot.lane.b32.xlu0 %v4118_v43, %s5579_s18  ;;  %v4130_v15 = vpop.f32.mrb[121].mxu1 }
 0xe4d   : > { %v5275_v63 = vpop.f32.mrb[122].mxu1  ;;  %v4131_v35 = vadd.f32 %v4698_v41, %v4130_v15 }
 0xe4e   : > { %v4142_v16 = vadd.f32 %v5275_v63, %v4698_v41  ;;  %4205 = vrot.lane.b32.xlu1 %v4139_v31, %s5579_s18  ;;  %v4133_v36 = vpop.f32.mrb[123].mxu1 }
 0xe4f   : > { %v4134_v24 = vadd.f32 %v4698_v41, %v4133_v36 }
 0xe50   : > { %4207 = vrot.lane.b32.xlu0 %v4142_v16, %s5579_s18 }
 0xe52   : > { %4201 = vrot.lane.b32.xlu1 %v4131_v35, %s5579_s18 }
 0xe53   : > { %v5278_v7 = vpop.f32.mrb[124].mxu1 }
 0xe54   : > { %v4155_v25 = vadd.f32 %v5278_v7, %v4698_v41  ;;  %4203 = vrot.lane.b32.xlu0 %v4134_v24, %s5579_s18  ;;  %v4146_v21 = vpop.f32.mrb[125].mxu1 }
 0xe55   : > { %v5279_v42 = vpop.f32.mrb[126].mxu1  ;;  %v4147_v30 = vadd.f32 %v4698_v41, %v4146_v21 }
 0xe56   : > { %v4158_v39 = vadd.f32 %v5279_v42, %v4698_v41  ;;  %4213 = vrot.lane.b32.xlu1 %v4155_v25, %s5579_s18  ;;  %v4149_v62 = vpop.f32.mrb[127].mxu1 }
 0xe57   : > { %v4150_v17 = vadd.f32 %v4698_v41, %v4149_v62 }
 0xe58   : > { %4215 = vrot.lane.b32.xlu0 %v4158_v39, %s5579_s18 }
 0xe5a   : > { %4209 = vrot.lane.b32.xlu1 %v4147_v30, %s5579_s18 }
 0xe5b   : > { %v5282_v53 = vpop.f32.mrb[128].mxu1 }
 0xe5c   : > { %4211 = vrot.lane.b32.xlu0 %v4150_v17, %s5579_s18  ;;  %v4162_v34 = vpop.f32.mrb[129].mxu1  ;;  %v4171_v23 = vadd.f32 %v5282_v53, %v4698_v41 }
 0xe5d   : > { %v4163_v54 = vadd.f32 %v4698_v41, %v4162_v34  ;;  %v5283_v12 = vpop.f32.mrb[130].mxu1 }
 0xe5e   : > { %v4165_v22 = vpop.f32.mrb[131].mxu1  ;;  %v4174_v45 = vadd.f32 %v5283_v12, %v4698_v41 }
 0xe5f   : > { %v4166_v49 = vadd.f32 %v4698_v41, %v4165_v22  ;;  %4217 = vrot.lane.b32.xlu1 %v4163_v54, %s5579_s18 }
 0xe61   : > { %4219 = vrot.lane.b32.xlu0 %v4166_v49, %s5579_s18 }
 0xe63   : > { %4221 = vrot.lane.b32.xlu1 %v4171_v23, %s5579_s18 }
 0xe65   : > { %4223 = vrot.lane.b32.xlu0 %v4174_v45, %s5579_s18 }
 0xeb8   : > { %v4198_v8 = vpop.permute.xlu1 %4197 }
 0xeb9   : > { %v4243_v9 = vadd.f32 %v7084_v10, %v4198_v8 }
 0xeba   : > { %v4200_v0 = vpop.permute.xlu0 %4199 }
 0xebb   : > { %v4263_v52 = vadd.f32 %v7156_v40, %v4243_v9  ;;  %v4244_v37 = vadd.f32 %v7088_v28, %v4200_v0 }
 0xebc   : > { %v4194_v20 = vpop.permute.xlu1 %4193 }
 0xebd   : > { %v4264_v19 = vadd.f32 %v7156_v40, %v4244_v37  ;;  %v4241_v41 = vadd.f32 %v4194_v20, %v7086_v5  ;;  %v4279_v1 = vsel %vm1217_vm1, %v4263_v52, -inf }
 0xebe   : > { %v4196_v14 = vpop.permute.xlu0 %4195 }
 0xebf   : > { %v4261_v48 = vadd.f32 %v7156_v40, %v4241_v41  ;;  %v4242_v44 = vadd.f32 %v4196_v14, %v7090_v57  ;;  %v4280_v31 = vsel %vm1217_vm1, %v4264_v19, -inf }
 0xec0   : > { %v4206_v38 = vpop.permute.xlu1 %4205 }
 0xec1   : > { %v4262_v6 = vadd.f32 %v7156_v40, %v4242_v44  ;;  %v4247_v18 = vadd.f32 %v7096_v60, %v4206_v38  ;;  %v4277_v36 = vsel %vm1217_vm1, %v4261_v48, -inf }
 0xec2   : > { %v4208_v10 = vpop.permute.xlu0 %4207 }
 0xec3   : > { %v4267_v2 = vadd.f32 %v7156_v40, %v4247_v18  ;;  %v4248_v28 = vadd.f32 %v7100_v50, %v4208_v10  ;;  %v4278_v21 = vsel %vm1217_vm1, %v4262_v6, -inf }
 0xec4   : > { %v4202_v61 = vpop.permute.xlu1 %4201 }
 0xec5   : > { %v4285_v5 = vsel %vm1217_vm1, %v4267_v2, -inf  ;;  %v4268_v26 = vadd.f32 %v7156_v40, %v4248_v28  ;;  %v4245_v43 = vadd.f32 %v4202_v61, %v7098_v46 }
 0xec6   : > { %v4286_v57 = vmax.f32 %v4279_v1, %v4285_v5  ;;  %v4204_v47 = vpop.permute.xlu0 %4203 }
 0xec7   : > { %v4287_v60 = vsel %vm1217_vm1, %v4268_v26, -inf  ;;  %v4265_v15 = vadd.f32 %v7156_v40, %v4245_v43  ;;  %v4246_v63 = vadd.f32 %v4204_v47, %v7102_v59 }
 0xec8   : > { %v4288_v50 = vmax.f32 %v4280_v31, %v4287_v60  ;;  %v4214_v16 = vpop.permute.xlu1 %4213  ;;  %v4324_v31 = vld [vmem:[%s7260_s2 + $0xb] sm:$0x1] }
 0xec9   : > { %v4281_v35 = vsel %vm1217_vm1, %v4265_v15, -inf  ;;  %v4266_v24 = vadd.f32 %v7156_v40, %v4246_v63  ;;  %v4251_v46 = vadd.f32 %v7104_v32, %v4214_v16 }
 0xeca   : > { %v4282_v7 = vmax.f32 %v4277_v36, %v4281_v35  ;;  %v4216_v25 = vpop.permute.xlu0 %4215 }
 0xecb   : > { %v4283_v42 = vsel %vm1217_vm1, %v4266_v24, -inf  ;;  %v4271_v39 = vadd.f32 %v7156_v40, %v4251_v46  ;;  %v4252_v59 = vadd.f32 %v7108_v55, %v4216_v25 }
 0xecc   : > { %v4284_v62 = vmax.f32 %v4278_v21, %v4283_v42  ;;  %v4210_v30 = vpop.permute.xlu1 %4209 }
 0xecd   : > { %v4293_v17 = vsel %vm1217_vm1, %v4271_v39, -inf  ;;  %v4272_v53 = vadd.f32 %v7156_v40, %v4252_v59  ;;  %v4249_v34 = vadd.f32 %v4210_v30, %v7106_v3 }
 0xece   : > { %v4294_v54 = vmax.f32 %v4286_v57, %v4293_v17  ;;  %v4212_v32 = vpop.permute.xlu0 %4211 }
 0xecf   : > { %v4295_v12 = vsel %vm1217_vm1, %v4272_v53, -inf  ;;  %v4269_v22 = vadd.f32 %v7156_v40, %v4249_v34  ;;  %v4250_v49 = vadd.f32 %v4212_v32, %v7110_v56 }
 0xed0   : > { %v4296_v23 = vmax.f32 %v4288_v50, %v4295_v12 }
 0xed1   : > { %v4289_v45 = vsel %vm1217_vm1, %v4269_v22, -inf  ;;  %v4270_v55 = vadd.f32 %v7156_v40, %v4250_v49  ;;  %v4218_v51 = vpop.permute.xlu1 %4217 }
 0xed2   : > { %v4290_v58 = vmax.f32 %v4282_v7, %v4289_v45  ;;  %v4253_v33 = vadd.f32 %v4218_v51, %v7114_v13 }
 0xed3   : > { %v4291_v4 = vsel %vm1217_vm1, %v4270_v55, -inf  ;;  %v4220_v3 = vpop.permute.xlu0 %4219 }
 0xed4   : > { %v4292_v8 = vmax.f32 %v4284_v62, %v4291_v4  ;;  %v4273_v9 = vadd.f32 %v7156_v40, %v4253_v33  ;;  %v4254_v0 = vadd.f32 %v4220_v3, %v7118_v29 }
 0xed5   : > { %v4222_v52 = vpop.permute.xlu1 %4221 }
 0xed6   : > { %v4297_v56 = vsel %vm1217_vm1, %v4273_v9, -inf  ;;  %v4274_v37 = vadd.f32 %v7156_v40, %v4254_v0  ;;  %v4255_v20 = vadd.f32 %v7112_v11, %v4222_v52 }
 0xed7   : > { %v4298_v19 = vmax.f32 %v4290_v58, %v4297_v56  ;;  %v4224_v41 = vpop.permute.xlu0 %4223 }
 0xed8   : > { %v4299_v14 = vsel %vm1217_vm1, %v4274_v37, -inf  ;;  %v4275_v13 = vadd.f32 %v7156_v40, %v4255_v20  ;;  %v4256_v48 = vadd.f32 %v7116_v27, %v4224_v41 }
 0xed9   : > { %v4300_v44 = vmax.f32 %v4292_v8, %v4299_v14 }
 0xeda   : > { %v4301_v38 = vsel %vm1217_vm1, %v4275_v13, -inf  ;;  %v4276_v29 = vadd.f32 %v7156_v40, %v4256_v48 }
 0xedb   : > { %v4305_v6 = vmax.f32 %v4298_v19, %v4300_v44  ;;  %v4302_v18 = vmax.f32 %v4294_v54, %v4301_v38 }
 0xedc   : > { %v4303_v10 = vsel %vm1217_vm1, %v4276_v29, -inf }
 0xedd   : > { %v4304_v2 = vmax.f32 %v4296_v23, %v4303_v10 }
 0xedf   : > { %v4306_v11 = vmax.f32 %v4302_v18, %v4304_v2 }
 0xee1   : > { %v4307_v28 = vmax.f32 %v4305_v6, %v4306_v11 }
 0xee3   : > { %v4308_v61 = vrot.slane %v4307_v28, 4 }
 0xee5   : > { %v4309_v1 = vmax.f32 %v4307_v28, %v4308_v61 }
 0xee7   : > { %v4310_v5 = vrot.slane %v4309_v1, 2 }
 0xee9   : > { %v4311_v26 = vmax.f32 %v4309_v1, %v4310_v5 }
 0xeeb   : > { %v4312_v43 = vrot.slane %v4311_v26, 1 }
 0xeed   : > { %v4313_v27 = vmax.f32 %v4311_v26, %v4312_v43 }
 0xeef   : > { %v4314_v57 = vmax.f32 %v4313_v27, 0.0 }
 0xef1   : > { %v4323_v47 = vpack.c.bf16 %v4314_v57, %v4314_v57 }
 0xef3   : > { %4326 = vrot.lane.b32.xlu1 %v4323_v47, %s5579_s18  ;;  %s4398_s18 = scalar_lea.sflag [#allocation4], %s327_s19 }
 0xf65   : > { %v4327_v40 = vpop.permute.xlu1 %4326 }
 0xf66   : > { %5293 = vmatmul.mubr.msk.bf16.vlgmr.msra.gmra.mrb[132].mxu1 %vm1015_vm0, %v4327_v40 }
0x1039   : > { %v4389_v60 = vpop.f32.mrb[132].mxu1 }
0x103a   : > { %v4390_v15 = vadd.f32 %v4389_v60, %v4324_v31  ;;  %v5294_v63 = vpop.f32.mrb[133].mxu1 }
0x103b   : > { %v4392_v50 = vpop.f32.mrb[134].mxu1 }
0x103c   : > { %v5295_v16 = vpop.f32.mrb[135].mxu1  ;;  %4396 = vst.msk [vmem:[%s328_s17] sm:$0x1] %vm4395_vm4, %v4390_v15 }
0x103d   : > { %5513 = shalt.err (!%p5510_p11)
}
0x103e   : > { %s5514_s20 = scalar_lea.hbm %s7216_s9, 16  ;;  %s5518_s19 = scalar_lea.hbm %s7266_s8, 32 }
0x103f   : > { %p5515_p13 = scmp.ne.s32.totalorder %s7216_s9, %s5514_s20  ;;  %p5519_p6 = scmp.lt.u32.totalorder %s7216_s9, %s7266_s8 }
0x1040   : > { %p5520_p9 = scmp.lt.u32.totalorder %s5518_s19, %s5514_s20  ;;  %p5522_p10 = scmp.lt.u32.totalorder %s5514_s20, %s7216_s9 }
0x1041   : > { %p5516_p5 = pnand %p5515_p13, %p7282_p1 }
0x1042   : > { %p5521_p12 = por %p5520_p9, %p5519_p6 }
0x1043   : > { %p5517_p0 = pneg %p5516_p5 }
0x1044   : > { %p5523_p2 = por %p5522_p10, %p5521_p12 }
0x1046   : > { %p5524_p3 = pnand %p5523_p2, %p5517_p0 }
0x1048   : > { %5527 = shalt.err (!%p5524_p3)
}
0x1049   : > { %5304 = dma.vmem_to_hbm [thread:$0]  (%p7282_p1), %s7218_s22, 16, %s7216_s9, %s4398_s18  }
0x104a PF: > { %p5321_p4 = scmp.ge.s32.totalorder %s5570_s30, 2  ;;  %s4422_s17 = sand.u32 1, %s5558_s27  }
0x104b   : > { %p7283_p7 = scmp.ne.s32.totalorder %s7274_s16, 0  ;;  %s4423_s21 = scalar_lea.sflag [#allocation4], %s4422_s17 }
0x104d   : > { %p5314_p8 = pnand %p5321_p4, %p7283_p7 }
0x104f   : > { %5553 = dma.done.wait (!%p5314_p8), %s4423_s21, 16  }
0x1050   : > { %5555 = vsyncadd (!%p5314_p8), %s4423_s21, 4294967280  ;;  %s7284_s23 = sld [smem:[#allocation11_spill]]  ;;  %s7285_s29 = sld [smem:[#allocation12_spill]] }
0x1051   : > { %p20_p11 = scmp.ge.s32.totalorder %s5653_s11, 4   ;;  %s7286_s27 = smov %s5562_s28 }
0x1052   : > { %s7288_s30 = smov %s5653_s11 }
0x1053   :  { %22 = sbr.rel (!%p20_p11) target bundleno = 5 (0x5), region = 106 }
0x1056   : > { %s7287_s28 = smov %s7284_s23 }
0x105a   :  { %4427 = vsyncpa [#allocation3], 1 }
0x105b   :  { %4429 = vsyncpa [#allocation3 + $0x1], 1 }
0x105c   :  { %4430 = vsyncpa [#allocation6], 1 }
0x105d   :  { %4431 = vsyncpa [#allocation4], 1 }
0x105e   :  { %4433 = vsyncpa [#allocation4 + $0x1], 1 }

</bundles_post_ra>
